<compile_context>
chip_gen: v7x
topology: tpu7x:2x2x1
jax: 0.10.0
libtpu: 0.0.40
codegen_flags: <defaults>
</compile_context>

<pallas_src>
import math

import jax
import jax.numpy as jnp
from jax.experimental import pallas as pl
from jax.experimental.pallas import tpu as pltpu


_VMEM_LIMIT = 32 * 1024 * 1024  # fits v5e/v6e (128 MiB) and v7x (64 MiB) with headroom


def _round_up(a, m):
    return (a + m - 1) // m * m


def _batch_tile(b, max_tile):
    """Per-grid-step batch tile: <= max_tile (VMEM bound) and, when b >= 2,
    at least 2 grid steps so v7x's two TensorCores both get work."""
    if b <= 1:
        return 1, max(b, 1)
    t = min(max_tile, max(1, b // 2))
    return t, _round_up(b, t)


# --------------------------------------------------------------------------
# Kernel 1: conv1 (+bias +ReLU) + MaxPool(3,3) + BatchNorm1 (eval), fused
# --------------------------------------------------------------------------
# cols rows are window-element-major: 9 groups of 88 rows per image.  Group
# k = (di, dj) row p = ho*9+wo holds the conv1 im2col patch of conv pixel
# (3*ho+di, 3*wo+dj); rows 81..87 of each group are zero pad so every group
# starts on a sublane-aligned (multiple-of-8) offset.  The 3x3/stride-3 pool is
# then an elementwise max over the 9 group slabs -- pure VPU, no strided
# sublane gathers -- fused into the matmul epilogue.

def _conv1_pool_bn_kernel(cols_ref, w_ref, b_ref, s_ref, t_ref, o_ref):
    tb = cols_ref.shape[0]
    cols = cols_ref[...].reshape(tb * 792, 128)          # 792 % 8 == 0 -> clean merge
    y = jnp.dot(cols, w_ref[...], preferred_element_type=jnp.float32)
    y = jnp.maximum(y + b_ref[...], 0.0)                 # bias + ReLU (f32 epilogue)
    y = y.reshape(tb, 9, 88, 128)                        # 88 % 8 == 0 -> clean split
    m = y[:, 0]
    for k in range(1, 9):                                # static unroll, VPU max
        m = jnp.maximum(m, y[:, k])
    m = m[:, :81, :64]                                   # drop pad rows / pad channels
    o_ref[...] = (m * s_ref[...] + t_ref[...]).astype(o_ref.dtype)   # BN1 (eval)


def conv1_pool_bn(cols, w1, b1, s1, t1, *, tile_b):
    """cols:[Bp,792,128] bf16 -> pooled+BN activation [Bp,81,64] bf16."""
    bp = cols.shape[0]
    assert bp % tile_b == 0, (bp, tile_b)
    return pl.pallas_call(
        _conv1_pool_bn_kernel,
        out_shape=jax.ShapeDtypeStruct((bp, 81, 64), jnp.bfloat16),
        grid=(bp // tile_b,),
        in_specs=[
            pl.BlockSpec((tile_b, 792, 128), lambda i: (i, 0, 0)),
            pl.BlockSpec((128, 128), lambda i: (0, 0)),
            pl.BlockSpec((1, 128), lambda i: (0, 0)),
            pl.BlockSpec((1, 64), lambda i: (0, 0)),
            pl.BlockSpec((1, 64), lambda i: (0, 0)),
        ],
        out_specs=pl.BlockSpec((tile_b, 81, 64), lambda i: (i, 0, 0)),
        compiler_params=pltpu.CompilerParams(
            dimension_semantics=("parallel",), vmem_limit_bytes=_VMEM_LIMIT),
    )(cols, w1, b1, s1, t1)


# --------------------------------------------------------------------------
# Kernel 2: fused, image-batched tail
#   conv2 + ReLU + MaxPool(3,3) + BN2 + fc1(+BN3) + ReLU + fc2(+BN4) + ReLU + fc3
# --------------------------------------------------------------------------

def _tail_kernel(p2_ref, w2_ref, b2_ref, s2_ref, t2_ref,
                 w3_ref, b3_ref, w4_ref, b4_ref, w5_ref, b5_ref, o_ref):
    tb = o_ref.shape[1]
    # conv2 (+bias +ReLU) over all 16 window rows of tile_b images: M = tb*16.
    y = jnp.dot(p2_ref[...], w2_ref[...], preferred_element_type=jnp.float32)
    y = jnp.maximum(y + b2_ref[...], 0.0)                # [tb*16, 128] f32
    # MaxPool2d(3, stride=3) on conv2's 5x5 map has a single output that reads
    # the 9 positions h2,w2 in {0,1,2}; rows 9..15 are wrapper-side duplicates
    # of rows 0..6, so one axis reduction over all 16 rows == max over the 9.
    m = jnp.max(y.reshape(tb, 16, 128), axis=1)          # [tb, 128]
    f = m * s2_ref[...] + t2_ref[...]                    # BN2 (eval, folded)
    # fc1 (+BN3 folded) + ReLU
    h = jnp.dot(f.astype(w3_ref.dtype), w3_ref[...],
                preferred_element_type=jnp.float32) + b3_ref[...]
    h = jnp.maximum(h, 0.0)
    # fc2 (+BN4 folded) + ReLU
    h = jnp.dot(h.astype(w4_ref.dtype), w4_ref[...],
                preferred_element_type=jnp.float32) + b4_ref[...]
    h = jnp.maximum(h, 0.0)
    # fc3 (output width padded 10 -> 128 for a lane-dense store)
    o = jnp.dot(h.astype(w5_ref.dtype), w5_ref[...],
                preferred_element_type=jnp.float32) + b5_ref[...]
    o_ref[0] = o                                         # [tb, 128] f32


def tail_forward(p2_flat, w2, b2, s2, t2, w3, b3, w4, b4, w5, b5, *, tile_b):
    """p2_flat:[Bp*16,1600] bf16 conv2 window patches -> padded logits [Bp,128] f32."""
    bp = p2_flat.shape[0] // 16
    assert bp % tile_b == 0, (bp, tile_b)
    nsteps = bp // tile_b
    const2 = lambda i: (0, 0)
    out = pl.pallas_call(
        _tail_kernel,
        out_shape=jax.ShapeDtypeStruct((nsteps, tile_b, 128), jnp.float32),
        grid=(nsteps,),
        in_specs=[
            pl.BlockSpec((tile_b * 16, 1600), lambda i: (i, 0)),
            pl.BlockSpec(w2.shape, const2),
            pl.BlockSpec(b2.shape, const2),
            pl.BlockSpec(s2.shape, const2),
            pl.BlockSpec(t2.shape, const2),
            pl.BlockSpec(w3.shape, const2),
            pl.BlockSpec(b3.shape, const2),
            pl.BlockSpec(w4.shape, const2),
            pl.BlockSpec(b4.shape, const2),
            pl.BlockSpec(w5.shape, const2),
            pl.BlockSpec(b5.shape, const2),
        ],
        out_specs=pl.BlockSpec((1, tile_b, 128), lambda i: (i, 0, 0)),
        compiler_params=pltpu.CompilerParams(
            dimension_semantics=("parallel",), vmem_limit_bytes=_VMEM_LIMIT),
    )(p2_flat, w2, b2, s2, t2, w3, b3, w4, b4, w5, b5)
    return out.reshape(bp, 128)


# --------------------------------------------------------------------------
# JAX glue (layout plumbing only -- no heavy compute)
# --------------------------------------------------------------------------

def _bn_fold(bn, eps=1e-5):
    """Fold eval-mode BatchNorm into per-channel (scale, shift) in f32."""
    scale = bn["gamma"] / jnp.sqrt(bn["var"] + eps)
    shift = bn["beta"] - bn["mean"] * scale
    return scale, shift


def tfnet_forward(x_nchw, params):
    b = x_nchw.shape[0]
    # NCHW (PyTorch) -> NHWC (kernel layout); bf16 for all inter-kernel traffic.
    x = jnp.transpose(x_nchw, (0, 2, 3, 1)).astype(jnp.bfloat16)       # [B,32,32,3]

    # ---- block 1: Conv2d(3,64,5)+ReLU+MaxPool(3,3)+BN(64)+Dropout(eval), one kernel ----
    # im2col only at the 27x27 conv pixels the pool reads, window-element-major
    # (9 groups of 88 rows per image); K padded 75 -> 128 for lane density.
    pat = jnp.stack([x[:, i:i + 28, j:j + 28, :] for i in range(5) for j in range(5)],
                    axis=3).reshape(b, 28, 28, 75)
    groups = []
    for di in range(3):
        for dj in range(3):
            g = pat[:, di:27:3, dj:27:3, :].reshape(b, 81, 75)         # rows (ho,wo)
            groups.append(jnp.pad(g, ((0, 0), (0, 7), (0, 0))))        # 81 -> 88 rows
    cols = jnp.concatenate(groups, axis=1)                             # [B,792,75]
    cols = jnp.pad(cols, ((0, 0), (0, 0), (0, 53)))                    # K 75 -> 128, bf16

    w1 = jnp.pad(params["w1"].reshape(75, 64),
                 ((0, 53), (0, 64))).astype(jnp.bfloat16)              # [128,128]
    b1 = jnp.pad(params["b1"], (0, 64)).reshape(1, 128).astype(jnp.float32)
    s1, t1 = _bn_fold(params["bn1"])
    s1 = s1.reshape(1, 64).astype(jnp.float32)
    t1 = t1.reshape(1, 64).astype(jnp.float32)

    tb1, bp1 = _batch_tile(b, 8)                                       # <=8 imgs/step
    if bp1 != b:
        cols = jnp.pad(cols, ((0, bp1 - b), (0, 0), (0, 0)))
    pooled = conv1_pool_bn(cols, w1, b1, s1, t1, tile_b=tb1)[:b]       # [B,81,64] bf16
    pooled = pooled.reshape(b, 9, 9, 64)

    # ---- block 2 + FC head: single fused, batched kernel ----
    # conv2 im2col only at the 9 output positions the final MaxPool(3,3) reads;
    # no channel padding (K = 25*64 = 1600).  Rows 9..15 duplicate rows 0..6 so
    # each image spans 16 sublane-aligned rows and the in-kernel pool is a
    # single axis reduction.
    wins = [pooled[:, h:h + 5, w:w + 5, :].reshape(b, 1, 1600)
            for h in range(3) for w in range(3)]
    p2 = jnp.concatenate(wins, axis=1)                                 # [B,9,1600] bf16
    p2 = jnp.concatenate([p2, p2[:, :7]], axis=1)                      # [B,16,1600]

    w2 = params["w2"].reshape(1600, 128).astype(jnp.bfloat16)          # no zero-row pad
    b2 = params["b2"].reshape(1, 128).astype(jnp.float32)
    s2, t2 = _bn_fold(params["bn2"])
    s2 = s2.reshape(1, 128).astype(jnp.float32)
    t2 = t2.reshape(1, 128).astype(jnp.float32)
    # Fold BN3 / BN4 (Linear -> BN -> ReLU) directly into the FC weights/biases.
    s3, t3 = _bn_fold(params["bn3"])
    w3 = (params["fc1_w"] * s3[None, :]).astype(jnp.bfloat16)          # [128,384]
    b3 = (params["fc1_b"] * s3 + t3).reshape(1, 384).astype(jnp.float32)
    s4, t4 = _bn_fold(params["bn4"])
    w4 = (params["fc2_w"] * s4[None, :]).astype(jnp.bfloat16)          # [384,192]
    b4 = (params["fc2_b"] * s4 + t4).reshape(1, 192).astype(jnp.float32)
    w5 = jnp.pad(params["fc3_w"], ((0, 0), (0, 118))).astype(jnp.bfloat16)  # [192,128]
    b5 = jnp.pad(params["fc3_b"], (0, 118)).reshape(1, 128).astype(jnp.float32)

    tb2, bp2 = _batch_tile(b, 128)                                     # <=128 imgs/step
    if bp2 != b:
        p2 = jnp.pad(p2, ((0, bp2 - b), (0, 0), (0, 0)))
    p2 = p2.reshape(bp2 * 16, 1600)
    logits = tail_forward(p2, w2, b2, s2, t2, w3, b3, w4, b4, w5, b5, tile_b=tb2)
    return logits[:b, :10]                                             # [B,10] f32


# --------------------------------------------------------------------------
# Deterministic parameter init (synthetic -- no checkpoint loading)
# --------------------------------------------------------------------------

def init_params(key):
    ks = jax.random.split(key, 24)

    def uni(k, shape, fan_in):
        bound = 1.0 / math.sqrt(fan_in)
        return jax.random.uniform(k, shape, jnp.float32, -bound, bound)

    def bn(k, c):
        k1, k2 = jax.random.split(k)
        return {
            "gamma": jax.random.uniform(k1, (c,), jnp.float32, 0.8, 1.2),
            "beta": jax.random.uniform(k2, (c,), jnp.float32, -0.1, 0.1),
            "mean": jnp.zeros((c,), jnp.float32),
            "var": jnp.ones((c,), jnp.float32),
        }

    p = {}
    p["w1"] = uni(ks[0], (5, 5, 3, 64), 5 * 5 * 3)       # HWIO conv weight
    p["b1"] = uni(ks[1], (64,), 5 * 5 * 3)
    p["bn1"] = bn(ks[2], 64)
    p["w2"] = uni(ks[3], (5, 5, 64, 128), 5 * 5 * 64)
    p["b2"] = uni(ks[4], (128,), 5 * 5 * 64)
    p["bn2"] = bn(ks[5], 128)
    p["fc1_w"] = uni(ks[6], (128, 384), 128)
    p["fc1_b"] = uni(ks[7], (384,), 128)
    p["bn3"] = bn(ks[8], 384)
    p["fc2_w"] = uni(ks[9], (384, 192), 384)
    p["fc2_b"] = uni(ks[10], (192,), 384)
    p["bn4"] = bn(ks[11], 192)
    p["fc3_w"] = uni(ks[12], (192, 10), 192)
    p["fc3_b"] = uni(ks[13], (10,), 192)
    return p


if __name__ == "__main__":
    # The View(c2*1*1) in the module forces 32x32 spatial input:
    # 32 -conv5-> 28 -pool3-> 9 -conv5-> 5 -pool3-> 1.
    kx, kp = jax.random.split(jax.random.PRNGKey(0))
    x = jax.random.normal(kx, (8, 3, 32, 32), jnp.float32)
    params = init_params(kp)

    fwd = jax.jit(tfnet_forward)
    out = fwd(x, params)
    out = jax.block_until_ready(out)

    assert out.shape == (8, 10), out.shape
    assert out.dtype == jnp.float32
    assert bool(jnp.all(jnp.isfinite(out)))
    print("KERNEL_OK")
</pallas_src>

<mosaic_0001>
module attributes {stable_mosaic.version = 11 : i64} {
  func.func @_conv1_pool_bn_kernel(%arg0: i32, %arg1: memref<4x792x128xbf16, #tpu.memory_space<vmem>>, %arg2: memref<128x128xbf16, #tpu.memory_space<vmem>>, %arg3: memref<1x128xf32, #tpu.memory_space<vmem>>, %arg4: memref<1x64xf32, #tpu.memory_space<vmem>>, %arg5: memref<1x64xf32, #tpu.memory_space<vmem>>, %arg6: memref<4x81x64xbf16, #tpu.memory_space<vmem>>) attributes {dimension_semantics = [#tpu.dimension_semantics<parallel>], iteration_bounds = array<i64: 2>, scalar_prefetch = 0 : i64, scratch_operands = 0 : i64, tpu.core_type = #tpu.core_type<tc>, window_params = [{transform_indices = @transform_0, window_bounds = array<i64: 4, 792, 128>}, {pipeline_mode = #tpu.pipeline_mode<synchronous>, transform_indices = @transform_1, window_bounds = array<i64: 128, 128>}, {pipeline_mode = #tpu.pipeline_mode<synchronous>, transform_indices = @transform_2, window_bounds = array<i64: 1, 128>}, {pipeline_mode = #tpu.pipeline_mode<synchronous>, transform_indices = @transform_3, window_bounds = array<i64: 1, 64>}, {pipeline_mode = #tpu.pipeline_mode<synchronous>, transform_indices = @transform_4, window_bounds = array<i64: 1, 64>}, {transform_indices = @transform_5, window_bounds = array<i64: 4, 81, 64>}]} {
    %c0 = arith.constant 0 : index
    %c0_0 = arith.constant 0 : index
    %c0_1 = arith.constant 0 : index
    %0 = vector.load %arg1[%c0, %c0_0, %c0_1] : memref<4x792x128xbf16, #tpu.memory_space<vmem>>, vector<4x792x128xbf16>
    %1 = vector.shape_cast %0 : vector<4x792x128xbf16> to vector<3168x128xbf16>
    %c0_2 = arith.constant 0 : index
    %c0_3 = arith.constant 0 : index
    %2 = vector.load %arg2[%c0_2, %c0_3] : memref<128x128xbf16, #tpu.memory_space<vmem>>, vector<128x128xbf16>
    %cst = arith.constant dense<0.000000e+00> : vector<3168x128xf32>
    %3 = tpu.matmul %1, %2, %cst {dimension_numbers = #tpu.dot_dimension_numbers<[1], [0], [0], [1], [0, 0, 1, 1], [], []>} : vector<3168x128xbf16>, vector<128x128xbf16>, vector<3168x128xf32> -> vector<3168x128xf32>
    %c0_4 = arith.constant 0 : index
    %c0_5 = arith.constant 0 : index
    %4 = vector.load %arg3[%c0_4, %c0_5] : memref<1x128xf32, #tpu.memory_space<vmem>>, vector<1x128xf32>
    %5 = vector.broadcast %4 : vector<1x128xf32> to vector<3168x128xf32>
    %6 = arith.addf %3, %5 : vector<3168x128xf32>
    %cst_6 = arith.constant 0.000000e+00 : f32
    %7 = vector.broadcast %cst_6 : f32 to vector<3168x128xf32>
    %8 = arith.maximumf %6, %7 : vector<3168x128xf32>
    %9 = vector.shape_cast %8 : vector<3168x128xf32> to vector<4x9x88x128xf32>
    %10 = vector.extract_strided_slice %9 {offsets = [0, 0, 0, 0], sizes = [4, 1, 88, 128], strides = [1, 1, 1, 1]} : vector<4x9x88x128xf32> to vector<4x1x88x128xf32>
    %11 = vector.shape_cast %10 : vector<4x1x88x128xf32> to vector<4x88x128xf32>
    %12 = vector.extract_strided_slice %9 {offsets = [0, 1, 0, 0], sizes = [4, 1, 88, 128], strides = [1, 1, 1, 1]} : vector<4x9x88x128xf32> to vector<4x1x88x128xf32>
    %13 = vector.shape_cast %12 : vector<4x1x88x128xf32> to vector<4x88x128xf32>
    %14 = arith.maximumf %11, %13 : vector<4x88x128xf32>
    %15 = vector.extract_strided_slice %9 {offsets = [0, 2, 0, 0], sizes = [4, 1, 88, 128], strides = [1, 1, 1, 1]} : vector<4x9x88x128xf32> to vector<4x1x88x128xf32>
    %16 = vector.shape_cast %15 : vector<4x1x88x128xf32> to vector<4x88x128xf32>
    %17 = arith.maximumf %14, %16 : vector<4x88x128xf32>
    %18 = vector.extract_strided_slice %9 {offsets = [0, 3, 0, 0], sizes = [4, 1, 88, 128], strides = [1, 1, 1, 1]} : vector<4x9x88x128xf32> to vector<4x1x88x128xf32>
    %19 = vector.shape_cast %18 : vector<4x1x88x128xf32> to vector<4x88x128xf32>
    %20 = arith.maximumf %17, %19 : vector<4x88x128xf32>
    %21 = vector.extract_strided_slice %9 {offsets = [0, 4, 0, 0], sizes = [4, 1, 88, 128], strides = [1, 1, 1, 1]} : vector<4x9x88x128xf32> to vector<4x1x88x128xf32>
    %22 = vector.shape_cast %21 : vector<4x1x88x128xf32> to vector<4x88x128xf32>
    %23 = arith.maximumf %20, %22 : vector<4x88x128xf32>
    %24 = vector.extract_strided_slice %9 {offsets = [0, 5, 0, 0], sizes = [4, 1, 88, 128], strides = [1, 1, 1, 1]} : vector<4x9x88x128xf32> to vector<4x1x88x128xf32>
    %25 = vector.shape_cast %24 : vector<4x1x88x128xf32> to vector<4x88x128xf32>
    %26 = arith.maximumf %23, %25 : vector<4x88x128xf32>
    %27 = vector.extract_strided_slice %9 {offsets = [0, 6, 0, 0], sizes = [4, 1, 88, 128], strides = [1, 1, 1, 1]} : vector<4x9x88x128xf32> to vector<4x1x88x128xf32>
    %28 = vector.shape_cast %27 : vector<4x1x88x128xf32> to vector<4x88x128xf32>
    %29 = arith.maximumf %26, %28 : vector<4x88x128xf32>
    %30 = vector.extract_strided_slice %9 {offsets = [0, 7, 0, 0], sizes = [4, 1, 88, 128], strides = [1, 1, 1, 1]} : vector<4x9x88x128xf32> to vector<4x1x88x128xf32>
    %31 = vector.shape_cast %30 : vector<4x1x88x128xf32> to vector<4x88x128xf32>
    %32 = arith.maximumf %29, %31 : vector<4x88x128xf32>
    %33 = vector.extract_strided_slice %9 {offsets = [0, 8, 0, 0], sizes = [4, 1, 88, 128], strides = [1, 1, 1, 1]} : vector<4x9x88x128xf32> to vector<4x1x88x128xf32>
    %34 = vector.shape_cast %33 : vector<4x1x88x128xf32> to vector<4x88x128xf32>
    %35 = arith.maximumf %32, %34 : vector<4x88x128xf32>
    %36 = vector.extract_strided_slice %35 {offsets = [0, 0, 0], sizes = [4, 81, 64], strides = [1, 1, 1]} : vector<4x88x128xf32> to vector<4x81x64xf32>
    %c0_7 = arith.constant 0 : index
    %c0_8 = arith.constant 0 : index
    %37 = vector.load %arg4[%c0_7, %c0_8] : memref<1x64xf32, #tpu.memory_space<vmem>>, vector<1x64xf32>
    %38 = vector.shape_cast %37 : vector<1x64xf32> to vector<1x1x64xf32>
    %39 = vector.broadcast %38 : vector<1x1x64xf32> to vector<4x81x64xf32>
    %40 = arith.mulf %36, %39 : vector<4x81x64xf32>
    %c0_9 = arith.constant 0 : index
    %c0_10 = arith.constant 0 : index
    %41 = vector.load %arg5[%c0_9, %c0_10] : memref<1x64xf32, #tpu.memory_space<vmem>>, vector<1x64xf32>
    %42 = vector.shape_cast %41 : vector<1x64xf32> to vector<1x1x64xf32>
    %43 = vector.broadcast %42 : vector<1x1x64xf32> to vector<4x81x64xf32>
    %44 = arith.addf %40, %43 : vector<4x81x64xf32>
    %45 = arith.truncf %44 : vector<4x81x64xf32> to vector<4x81x64xbf16>
    %c0_11 = arith.constant 0 : index
    %c0_12 = arith.constant 0 : index
    %c0_13 = arith.constant 0 : index
    %46 = vector.load %arg6[%c0_11, %c0_12, %c0_13] : memref<4x81x64xbf16, #tpu.memory_space<vmem>>, vector<4x81x64xbf16>
    tpu.vector_store %arg6[%c0_11, %c0_12, %c0_13], %45 {strides = array<i32>} : memref<4x81x64xbf16, #tpu.memory_space<vmem>>, vector<4x81x64xbf16>,
    return
  }
  func.func @transform_0(%arg0: i32) -> (i32, i32, i32) {
    %c0_i32 = arith.constant 0 : i32
    %c0_i32_0 = arith.constant 0 : i32
    %c0_i32_1 = arith.constant 0 : i32
    return %arg0, %c0_i32, %c0_i32_0 : i32, i32, i32
  }
  func.func @transform_1(%arg0: i32) -> (i32, i32) {
    %c0_i32 = arith.constant 0 : i32
    %c0_i32_0 = arith.constant 0 : i32
    %c0_i32_1 = arith.constant 0 : i32
    return %c0_i32, %c0_i32_0 : i32, i32
  }
  func.func @transform_2(%arg0: i32) -> (i32, i32) {
    %c0_i32 = arith.constant 0 : i32
    %c0_i32_0 = arith.constant 0 : i32
    %c0_i32_1 = arith.constant 0 : i32
    return %c0_i32, %c0_i32_0 : i32, i32
  }
  func.func @transform_3(%arg0: i32) -> (i32, i32) {
    %c0_i32 = arith.constant 0 : i32
    %c0_i32_0 = arith.constant 0 : i32
    %c0_i32_1 = arith.constant 0 : i32
    return %c0_i32, %c0_i32_0 : i32, i32
  }
  func.func @transform_4(%arg0: i32) -> (i32, i32) {
    %c0_i32 = arith.constant 0 : i32
    %c0_i32_0 = arith.constant 0 : i32
    %c0_i32_1 = arith.constant 0 : i32
    return %c0_i32, %c0_i32_0 : i32, i32
  }
  func.func @transform_5(%arg0: i32) -> (i32, i32, i32) {
    %c0_i32 = arith.constant 0 : i32
    %c0_i32_0 = arith.constant 0 : i32
    %c0_i32_1 = arith.constant 0 : i32
    return %arg0, %c0_i32, %c0_i32_0 : i32, i32, i32
  }
}

module attributes {stable_mosaic.version = 11 : i64} {
  func.func @_tail_kernel(%arg0: i32, %arg1: memref<64x1600xbf16, #tpu.memory_space<vmem>>, %arg2: memref<1600x128xbf16, #tpu.memory_space<vmem>>, %arg3: memref<1x128xf32, #tpu.memory_space<vmem>>, %arg4: memref<1x128xf32, #tpu.memory_space<vmem>>, %arg5: memref<1x128xf32, #tpu.memory_space<vmem>>, %arg6: memref<128x384xbf16, #tpu.memory_space<vmem>>, %arg7: memref<1x384xf32, #tpu.memory_space<vmem>>, %arg8: memref<384x192xbf16, #tpu.memory_space<vmem>>, %arg9: memref<1x192xf32, #tpu.memory_space<vmem>>, %arg10: memref<192x128xbf16, #tpu.memory_space<vmem>>, %arg11: memref<1x128xf32, #tpu.memory_space<vmem>>, %arg12: memref<1x4x128xf32, #tpu.memory_space<vmem>>) attributes {dimension_semantics = [#tpu.dimension_semantics<parallel>], iteration_bounds = array<i64: 2>, scalar_prefetch = 0 : i64, scratch_operands = 0 : i64, tpu.core_type = #tpu.core_type<tc>, window_params = [{transform_indices = @transform_0, window_bounds = array<i64: 64, 1600>}, {pipeline_mode = #tpu.pipeline_mode<synchronous>, transform_indices = @transform_1, window_bounds = array<i64: 1600, 128>}, {pipeline_mode = #tpu.pipeline_mode<synchronous>, transform_indices = @transform_2, window_bounds = array<i64: 1, 128>}, {pipeline_mode = #tpu.pipeline_mode<synchronous>, transform_indices = @transform_3, window_bounds = array<i64: 1, 128>}, {pipeline_mode = #tpu.pipeline_mode<synchronous>, transform_indices = @transform_4, window_bounds = array<i64: 1, 128>}, {pipeline_mode = #tpu.pipeline_mode<synchronous>, transform_indices = @transform_5, window_bounds = array<i64: 128, 384>}, {pipeline_mode = #tpu.pipeline_mode<synchronous>, transform_indices = @transform_6, window_bounds = array<i64: 1, 384>}, {pipeline_mode = #tpu.pipeline_mode<synchronous>, transform_indices = @transform_7, window_bounds = array<i64: 384, 192>}, {pipeline_mode = #tpu.pipeline_mode<synchronous>, transform_indices = @transform_8, window_bounds = array<i64: 1, 192>}, {pipeline_mode = #tpu.pipeline_mode<synchronous>, transform_indices = @transform_9, window_bounds = array<i64: 192, 128>}, {pipeline_mode = #tpu.pipeline_mode<synchronous>, transform_indices = @transform_10, window_bounds = array<i64: 1, 128>}, {transform_indices = @transform_11, window_bounds = array<i64: 1, 4, 128>}]} {
    %c0 = arith.constant 0 : index
    %c0_0 = arith.constant 0 : index
    %0 = vector.load %arg1[%c0, %c0_0] : memref<64x1600xbf16, #tpu.memory_space<vmem>>, vector<64x1600xbf16>
    %c0_1 = arith.constant 0 : index
    %c0_2 = arith.constant 0 : index
    %1 = vector.load %arg2[%c0_1, %c0_2] : memref<1600x128xbf16, #tpu.memory_space<vmem>>, vector<1600x128xbf16>
    %cst = arith.constant dense<0.000000e+00> : vector<64x128xf32>
    %2 = tpu.matmul %0, %1, %cst {dimension_numbers = #tpu.dot_dimension_numbers<[1], [0], [0], [1], [0, 0, 1, 1], [], []>} : vector<64x1600xbf16>, vector<1600x128xbf16>, vector<64x128xf32> -> vector<64x128xf32>
    %c0_3 = arith.constant 0 : index
    %c0_4 = arith.constant 0 : index
    %3 = vector.load %arg3[%c0_3, %c0_4] : memref<1x128xf32, #tpu.memory_space<vmem>>, vector<1x128xf32>
    %4 = vector.broadcast %3 : vector<1x128xf32> to vector<64x128xf32>
    %5 = arith.addf %2, %4 : vector<64x128xf32>
    %cst_5 = arith.constant 0.000000e+00 : f32
    %6 = vector.broadcast %cst_5 : f32 to vector<64x128xf32>
    %7 = arith.maximumf %5, %6 : vector<64x128xf32>
    %8 = vector.shape_cast %7 : vector<64x128xf32> to vector<4x16x128xf32>
    %cst_6 = arith.constant dense<0xFF800000> : vector<4x128xf32>
    %9 = vector.multi_reduction <maximumf>, %8, %cst_6 [1] : vector<4x16x128xf32> to vector<4x128xf32>
    %c0_7 = arith.constant 0 : index
    %c0_8 = arith.constant 0 : index
    %10 = vector.load %arg4[%c0_7, %c0_8] : memref<1x128xf32, #tpu.memory_space<vmem>>, vector<1x128xf32>
    %11 = vector.broadcast %10 : vector<1x128xf32> to vector<4x128xf32>
    %12 = arith.mulf %9, %11 : vector<4x128xf32>
    %c0_9 = arith.constant 0 : index
    %c0_10 = arith.constant 0 : index
    %13 = vector.load %arg5[%c0_9, %c0_10] : memref<1x128xf32, #tpu.memory_space<vmem>>, vector<1x128xf32>
    %14 = vector.broadcast %13 : vector<1x128xf32> to vector<4x128xf32>
    %15 = arith.addf %12, %14 : vector<4x128xf32>
    %16 = arith.truncf %15 : vector<4x128xf32> to vector<4x128xbf16>
    %c0_11 = arith.constant 0 : index
    %c0_12 = arith.constant 0 : index
    %17 = vector.load %arg6[%c0_11, %c0_12] : memref<128x384xbf16, #tpu.memory_space<vmem>>, vector<128x384xbf16>
    %cst_13 = arith.constant dense<0.000000e+00> : vector<4x384xf32>
    %18 = tpu.matmul %16, %17, %cst_13 {dimension_numbers = #tpu.dot_dimension_numbers<[1], [0], [0], [1], [0, 0, 1, 1], [], []>} : vector<4x128xbf16>, vector<128x384xbf16>, vector<4x384xf32> -> vector<4x384xf32>
    %c0_14 = arith.constant 0 : index
    %c0_15 = arith.constant 0 : index
    %19 = vector.load %arg7[%c0_14, %c0_15] : memref<1x384xf32, #tpu.memory_space<vmem>>, vector<1x384xf32>
    %20 = vector.broadcast %19 : vector<1x384xf32> to vector<4x384xf32>
    %21 = arith.addf %18, %20 : vector<4x384xf32>
    %cst_16 = arith.constant 0.000000e+00 : f32
    %22 = vector.broadcast %cst_16 : f32 to vector<4x384xf32>
    %23 = arith.maximumf %21, %22 : vector<4x384xf32>
    %24 = arith.truncf %23 : vector<4x384xf32> to vector<4x384xbf16>
    %c0_17 = arith.constant 0 : index
    %c0_18 = arith.constant 0 : index
    %25 = vector.load %arg8[%c0_17, %c0_18] : memref<384x192xbf16, #tpu.memory_space<vmem>>, vector<384x192xbf16>
    %cst_19 = arith.constant dense<0.000000e+00> : vector<4x192xf32>
    %26 = tpu.matmul %24, %25, %cst_19 {dimension_numbers = #tpu.dot_dimension_numbers<[1], [0], [0], [1], [0, 0, 1, 1], [], []>} : vector<4x384xbf16>, vector<384x192xbf16>, vector<4x192xf32> -> vector<4x192xf32>
    %c0_20 = arith.constant 0 : index
    %c0_21 = arith.constant 0 : index
    %27 = vector.load %arg9[%c0_20, %c0_21] : memref<1x192xf32, #tpu.memory_space<vmem>>, vector<1x192xf32>
    %28 = vector.broadcast %27 : vector<1x192xf32> to vector<4x192xf32>
    %29 = arith.addf %26, %28 : vector<4x192xf32>
    %cst_22 = arith.constant 0.000000e+00 : f32
    %30 = vector.broadcast %cst_22 : f32 to vector<4x192xf32>
    %31 = arith.maximumf %29, %30 : vector<4x192xf32>
    %32 = arith.truncf %31 : vector<4x192xf32> to vector<4x192xbf16>
    %c0_23 = arith.constant 0 : index
    %c0_24 = arith.constant 0 : index
    %33 = vector.load %arg10[%c0_23, %c0_24] : memref<192x128xbf16, #tpu.memory_space<vmem>>, vector<192x128xbf16>
    %cst_25 = arith.constant dense<0.000000e+00> : vector<4x128xf32>
    %34 = tpu.matmul %32, %33, %cst_25 {dimension_numbers = #tpu.dot_dimension_numbers<[1], [0], [0], [1], [0, 0, 1, 1], [], []>} : vector<4x192xbf16>, vector<192x128xbf16>, vector<4x128xf32> -> vector<4x128xf32>
    %c0_26 = arith.constant 0 : index
    %c0_27 = arith.constant 0 : index
    %35 = vector.load %arg11[%c0_26, %c0_27] : memref<1x128xf32, #tpu.memory_space<vmem>>, vector<1x128xf32>
    %36 = vector.broadcast %35 : vector<1x128xf32> to vector<4x128xf32>
    %37 = arith.addf %34, %36 : vector<4x128xf32>
    %c0_28 = arith.constant 0 : index
    %c0_29 = arith.constant 0 : index
    %c0_30 = arith.constant 0 : index
    %38 = vector.load %arg12[%c0_28, %c0_29, %c0_30] : memref<1x4x128xf32, #tpu.memory_space<vmem>>, vector<1x4x128xf32>
    %39 = vector.shape_cast %38 : vector<1x4x128xf32> to vector<4x128xf32>
    %40 = vector.shape_cast %37 : vector<4x128xf32> to vector<1x4x128xf32>
    tpu.vector_store %arg12[%c0_28, %c0_29, %c0_30], %40 {strides = array<i32>} : memref<1x4x128xf32, #tpu.memory_space<vmem>>, vector<1x4x128xf32>,
    return
  }
  func.func @transform_0(%arg0: i32) -> (i32, i32) {
    %c0_i32 = arith.constant 0 : i32
    %c0_i32_0 = arith.constant 0 : i32
    return %arg0, %c0_i32 : i32, i32
  }
  func.func @transform_1(%arg0: i32) -> (i32, i32) {
    %c0_i32 = arith.constant 0 : i32
    %c0_i32_0 = arith.constant 0 : i32
    %c0_i32_1 = arith.constant 0 : i32
    return %c0_i32, %c0_i32_0 : i32, i32
  }
  func.func @transform_2(%arg0: i32) -> (i32, i32) {
    %c0_i32 = arith.constant 0 : i32
    %c0_i32_0 = arith.constant 0 : i32
    %c0_i32_1 = arith.constant 0 : i32
    return %c0_i32, %c0_i32_0 : i32, i32
  }
  func.func @transform_3(%arg0: i32) -> (i32, i32) {
    %c0_i32 = arith.constant 0 : i32
    %c0_i32_0 = arith.constant 0 : i32
    %c0_i32_1 = arith.constant 0 : i32
    return %c0_i32, %c0_i32_0 : i32, i32
  }
  func.func @transform_4(%arg0: i32) -> (i32, i32) {
    %c0_i32 = arith.constant 0 : i32
    %c0_i32_0 = arith.constant 0 : i32
    %c0_i32_1 = arith.constant 0 : i32
    return %c0_i32, %c0_i32_0 : i32, i32
  }
  func.func @transform_5(%arg0: i32) -> (i32, i32) {
    %c0_i32 = arith.constant 0 : i32
    %c0_i32_0 = arith.constant 0 : i32
    %c0_i32_1 = arith.constant 0 : i32
    return %c0_i32, %c0_i32_0 : i32, i32
  }
  func.func @transform_6(%arg0: i32) -> (i32, i32) {
    %c0_i32 = arith.constant 0 : i32
    %c0_i32_0 = arith.constant 0 : i32
    %c0_i32_1 = arith.constant 0 : i32
    return %c0_i32, %c0_i32_0 : i32, i32
  }
  func.func @transform_7(%arg0: i32) -> (i32, i32) {
    %c0_i32 = arith.constant 0 : i32
    %c0_i32_0 = arith.constant 0 : i32
    %c0_i32_1 = arith.constant 0 : i32
    return %c0_i32, %c0_i32_0 : i32, i32
  }
  func.func @transform_8(%arg0: i32) -> (i32, i32) {
    %c0_i32 = arith.constant 0 : i32
    %c0_i32_0 = arith.constant 0 : i32
    %c0_i32_1 = arith.constant 0 : i32
    return %c0_i32, %c0_i32_0 : i32, i32
  }
  func.func @transform_9(%arg0: i32) -> (i32, i32) {
    %c0_i32 = arith.constant 0 : i32
    %c0_i32_0 = arith.constant 0 : i32
    %c0_i32_1 = arith.constant 0 : i32
    return %c0_i32, %c0_i32_0 : i32, i32
  }
  func.func @transform_10(%arg0: i32) -> (i32, i32) {
    %c0_i32 = arith.constant 0 : i32
    %c0_i32_0 = arith.constant 0 : i32
    %c0_i32_1 = arith.constant 0 : i32
    return %c0_i32, %c0_i32_0 : i32, i32
  }
  func.func @transform_11(%arg0: i32) -> (i32, i32, i32) {
    %c0_i32 = arith.constant 0 : i32
    %c0_i32_0 = arith.constant 0 : i32
    %c0_i32_1 = arith.constant 0 : i32
    return %arg0, %c0_i32, %c0_i32_0 : i32, i32, i32
  }
}

</mosaic_0001>

<bundles_post_ra>
// kernel: tfnet_forward.2
= control target key start
LH: loop header
LB: loop body
LE: loop exit
PB: predicated region body
PF: predicated region fallthrough
CT: control target
= control target key end

     0   :  { %s5851_s18 = smov 0   ;;  %s7892_s0 = inlined_call_operand.vmem [shape: bf16[8,792,128], index: 0, kind: input, shape index: {}]   ;;  %s7893_s1 = inlined_call_operand.vmem [shape: bf16[128,128], index: 1, kind: input, shape index: {}]   ;;  %s7894_s2 = inlined_call_operand.vmem [shape: f32[1,128], index: 2, kind: input, shape index: {}]   ;;  %s7895_s3 = inlined_call_operand.vmem [shape: f32[1,64], index: 3, kind: input, shape index: {}]   ;;  %s7896_s4 = inlined_call_operand.vmem [shape: f32[1,64], index: 4, kind: input, shape index: {}]   ;;  %s7897_s5 = inlined_call_operand.vmem [shape: bf16[8,81,64], index: 5, kind: output, shape index: {}]  }
   0x1 LB: > { %s4650_s19 = sadd.s32 4294967295, %s5819_s18   ;;  %p4654_p0 = scmp.ge.s32.totalorder %s5819_s18, 1  ;;  %s5819_s18 = sphi %s5851_s18, %s15_s18  }
   0x2   : > { %p189_p1 = scmp.lt.s32.totalorder %s5819_s18, 3 }
   0x4   : > { %p190_p2 = pnand %p4654_p0, %p189_p1 }
   0x5   : > { %v5602_v0 = vld [vmem:[%s7893_s1] sm:$0xff] (!%p190_p2)   ;;  %s4655_s22 = sshll.u32 (!%p190_p2), %s4650_s19, 2  ;;  %v5603_v1 = vld [vmem:[%s7893_s1 + $0x8] sm:$0xff] (!%p190_p2)   ;;  %v5604_v2 = vld [vmem:[%s7893_s1 + $0x10] sm:$0xff] (!%p190_p2)   ;;  %vm4536_vm0 = vcmask (!%p190_p2), 519168   ;;  %vm4547_vm1 = vcmask (!%p190_p2), 516096  }
   0x6   : > { %193 = sbr.rel (%p190_p2) target bundleno = 670 (0x29e), region = 40  ;;  %p220_p3 = scmp.lt.s32.totalorder (!%p190_p2), %s4655_s22, 7  ;;  %5164 = vmatprep.subr.bf16.mxu0 (!%p190_p2), %v5602_v0  ;;  %5576 = vmatprep.subr.bf16.mxu1 (!%p190_p2), %v5602_v0  ;;  %v5605_v3 = vld [vmem:[%s7893_s1 + $0x18] sm:$0xff] (!%p190_p2)   ;;  %v5606_v6 = vld [vmem:[%s7893_s1 + $0x20] sm:$0xff] (!%p190_p2)   ;;  %v5607_v7 = vld [vmem:[%s7893_s1 + $0x28] sm:$0xff] (!%p190_p2)  }
   0x7   : > { %5165 = vmatpush3.bf16.msra.mxu0 (!%p190_p2), %v5602_v0  ;;  %5584 = vmatpush3.bf16.msra.mxu1 (!%p190_p2), %v5602_v0  ;;  %v5608_v8 = vld [vmem:[%s7893_s1 + $0x30] sm:$0xff] (!%p190_p2)   ;;  %v5609_v9 = vld [vmem:[%s7893_s1 + $0x38] sm:$0xff] (!%p190_p2)   ;;  %vm4548_vm2 = vsmask.f32 (!%p190_p2), 256 }
   0x8   : > { %5166 = vmatprep.subr.bf16.mxu0 (!%p190_p2), %v5603_v1  ;;  %5577 = vmatprep.subr.bf16.mxu1 (!%p190_p2), %v5603_v1  ;;  %vm6923_vm3 = vmand (!%p190_p2), %vm4547_vm1, %vm4548_vm2 }
   0xb   : > { %5167 = vmatpush3.bf16.msra.mxu0 (!%p190_p2), %v5603_v1  ;;  %5585 = vmatpush3.bf16.msra.mxu1 (!%p190_p2), %v5603_v1 }
   0xc   : > { %5168 = vmatprep.subr.bf16.mxu0 (!%p190_p2), %v5604_v2  ;;  %5578 = vmatprep.subr.bf16.mxu1 (!%p190_p2), %v5604_v2 }
   0xd   : > { %s7901_s22 = smov (!%p220_p3, %s4655_s22), 7 }
   0xe   : > { %s5592_s27 = smul.u32 396, %s7901_s22 }
   0xf   : > { %5169 = vmatpush3.bf16.msra.mxu0 %v5604_v2  ;;  %5586 = vmatpush3.bf16.msra.mxu1 %v5604_v2  ;;  %s5593_s24 = smul.u32 44, %s7901_s22 }
  0x10   : > { %s5877_s7 = scalar_lea.vmem %s7892_s0, %s5592_s27  ;;  %5170 = vmatprep.subr.bf16.mxu0 %v5605_v3  ;;  %5579 = vmatprep.subr.bf16.mxu1 %v5605_v3 }
  0x11   : > { %v5610_v4 = vld [vmem:[%s5877_s7] sm:$0xff]   ;;  %v5612_v10 = vld [vmem:[%s5877_s7 + $0x8] sm:$0xff]   ;;  %v5614_v12 = vld [vmem:[%s5877_s7 + $0x10] sm:$0xff]   ;;  %s6841_s28 = scalar_lea.vmem %s7897_s5, %s5593_s24 }
  0x12   : > { %v5611_v5 = vld [vmem:[%s5877_s7 + $0x320] sm:$0xff]   ;;  %5180 = vmatprep.mubr.bf16.mxu0 %v5610_v4  ;;  %v5613_v11 = vld [vmem:[%s5877_s7 + $0x328] sm:$0xff]   ;;  %v5615_v13 = vld [vmem:[%s5877_s7 + $0x330] sm:$0xff]  }
  0x13   : > { %5380 = vmatprep.mubr.bf16.mxu1 %v5611_v5  ;;  %5171 = vmatpush3.bf16.msra.mxu0 %v5605_v3  ;;  %v5616_v14 = vld [vmem:[%s5877_s7 + $0x18] sm:$0xff]   ;;  %v5618_v16 = vld [vmem:[%s5877_s7 + $0x20] sm:$0xff]   ;;  %v5620_v18 = vld [vmem:[%s5877_s7 + $0x28] sm:$0xff]  }
  0x14   : > { %5587 = vmatpush3.bf16.msra.mxu1 %v5605_v3  ;;  %5172 = vmatprep.subr.bf16.mxu0 %v5606_v6  ;;  %v5617_v15 = vld [vmem:[%s5877_s7 + $0x338] sm:$0xff]   ;;  %v5619_v17 = vld [vmem:[%s5877_s7 + $0x340] sm:$0xff]   ;;  %v5621_v19 = vld [vmem:[%s5877_s7 + $0x348] sm:$0xff]  }
  0x15   : > { %5580 = vmatprep.subr.bf16.mxu1 %v5606_v6  ;;  %v5622_v20 = vld [vmem:[%s5877_s7 + $0x30] sm:$0xff]   ;;  %v5624_v22 = vld [vmem:[%s5877_s7 + $0x38] sm:$0xff]   ;;  %v5626_v24 = vld [vmem:[%s5877_s7 + $0x40] sm:$0xff]  }
  0x16   : > { %v5623_v21 = vld [vmem:[%s5877_s7 + $0x350] sm:$0xff]   ;;  %v5625_v23 = vld [vmem:[%s5877_s7 + $0x358] sm:$0xff]   ;;  %v5627_v25 = vld [vmem:[%s5877_s7 + $0x360] sm:$0xff]  }
  0x17   : > { %5173 = vmatpush3.bf16.msra.mxu0 %v5606_v6  ;;  %v5628_v26 = vld [vmem:[%s5877_s7 + $0x48] sm:$0xff]   ;;  %v5630_v28 = vld [vmem:[%s5877_s7 + $0x50] sm:$0xff]   ;;  %v5632_v30 = vld [vmem:[%s5877_s7 + $0x58] sm:$0xff]  }
  0x18   : > { %5588 = vmatpush3.bf16.msra.mxu1 %v5606_v6  ;;  %5174 = vmatprep.subr.bf16.mxu0 %v5607_v7  ;;  %v5629_v27 = vld [vmem:[%s5877_s7 + $0x368] sm:$0xff]   ;;  %v5631_v29 = vld [vmem:[%s5877_s7 + $0x370] sm:$0xff]   ;;  %v5633_v31 = vld [vmem:[%s5877_s7 + $0x378] sm:$0xff]  }
  0x19   : > { %5581 = vmatprep.subr.bf16.mxu1 %v5607_v7  ;;  %v5634_v32 = vld [vmem:[%s5877_s7 + $0x60] sm:$0xff]   ;;  %v5636_v34 = vld [vmem:[%s5877_s7 + $0x68] sm:$0xff]   ;;  %v5638_v36 = vld [vmem:[%s5877_s7 + $0x70] sm:$0xff]  }
  0x1a   : > { %v5635_v33 = vld [vmem:[%s5877_s7 + $0x380] sm:$0xff]   ;;  %v5637_v35 = vld [vmem:[%s5877_s7 + $0x388] sm:$0xff]   ;;  %v5639_v37 = vld [vmem:[%s5877_s7 + $0x390] sm:$0xff]  }
  0x1b   : > { %5175 = vmatpush3.bf16.msra.mxu0 %v5607_v7  ;;  %v5640_v38 = vld [vmem:[%s5877_s7 + $0x78] sm:$0xff]   ;;  %v5642_v40 = vld [vmem:[%s5877_s7 + $0x80] sm:$0xff]   ;;  %v5644_v42 = vld [vmem:[%s5877_s7 + $0x88] sm:$0xff]  }
  0x1c   : > { %5589 = vmatpush3.bf16.msra.mxu1 %v5607_v7  ;;  %5176 = vmatprep.subr.bf16.mxu0 %v5608_v8  ;;  %v5641_v39 = vld [vmem:[%s5877_s7 + $0x398] sm:$0xff]   ;;  %v5643_v41 = vld [vmem:[%s5877_s7 + $0x3a0] sm:$0xff]   ;;  %v5645_v43 = vld [vmem:[%s5877_s7 + $0x3a8] sm:$0xff]  }
  0x1d   : > { %5582 = vmatprep.subr.bf16.mxu1 %v5608_v8  ;;  %v5646_v44 = vld [vmem:[%s5877_s7 + $0x90] sm:$0xff]   ;;  %v5648_v46 = vld [vmem:[%s5877_s7 + $0x98] sm:$0xff]   ;;  %v5650_v48 = vld [vmem:[%s5877_s7 + $0xa0] sm:$0xff]  }
  0x1e   : > { %v5647_v45 = vld [vmem:[%s5877_s7 + $0x3b0] sm:$0xff]   ;;  %v5649_v47 = vld [vmem:[%s5877_s7 + $0x3b8] sm:$0xff]   ;;  %v5651_v49 = vld [vmem:[%s5877_s7 + $0x3c0] sm:$0xff]  }
  0x1f   : > { %5177 = vmatpush3.bf16.msra.mxu0 %v5608_v8  ;;  %v5652_v50 = vld [vmem:[%s5877_s7 + $0xa8] sm:$0xff]   ;;  %v5654_v52 = vld [vmem:[%s5877_s7 + $0xb0] sm:$0xff]   ;;  %v5656_v54 = vld [vmem:[%s5877_s7 + $0xb8] sm:$0xff]  }
  0x20   : > { %5590 = vmatpush3.bf16.msra.mxu1 %v5608_v8  ;;  %5178 = vmatprep.subr.bf16.mxu0 %v5609_v9  ;;  %v5653_v51 = vld [vmem:[%s5877_s7 + $0x3c8] sm:$0xff]   ;;  %v5655_v53 = vld [vmem:[%s5877_s7 + $0x3d0] sm:$0xff]   ;;  %v5657_v55 = vld [vmem:[%s5877_s7 + $0x3d8] sm:$0xff]  }
  0x21   : > { %5583 = vmatprep.subr.bf16.mxu1 %v5609_v9  ;;  %v5658_v56 = vld [vmem:[%s5877_s7 + $0xc0] sm:$0xff]   ;;  %v5660_v58 = vld [vmem:[%s5877_s7 + $0xc8] sm:$0xff]   ;;  %v5662_v60 = vld [vmem:[%s5877_s7 + $0xd0] sm:$0xff]  }
  0x22   : > { %v5659_v57 = vld [vmem:[%s5877_s7 + $0x3e0] sm:$0xff]   ;;  %v5661_v59 = vld [vmem:[%s5877_s7 + $0x3e8] sm:$0xff]   ;;  %v5663_v61 = vld [vmem:[%s5877_s7 + $0x3f0] sm:$0xff]  }
  0x23   : > { %5179 = vmatpush3.bf16.msra.mxu0 %v5609_v9  ;;  %v5664_v62 = vld [vmem:[%s5877_s7 + $0xd8] sm:$0xff]   ;;  %v5666_v0 = vld [vmem:[%s5877_s7 + $0xe0] sm:$0xff]   ;;  %v5668_v2 = vld [vmem:[%s5877_s7 + $0xe8] sm:$0xff]  }
  0x24   : > { %5591 = vmatpush3.bf16.msra.mxu1 %v5609_v9  ;;  %v5665_v63 = vld [vmem:[%s5877_s7 + $0x3f8] sm:$0xff]   ;;  %v5667_v1 = vld [vmem:[%s5877_s7 + $0x400] sm:$0xff]   ;;  %v5669_v3 = vld [vmem:[%s5877_s7 + $0x408] sm:$0xff]  }
  0x25   : > { %v5670_v4 = vld [vmem:[%s5877_s7 + $0xf0] sm:$0xff]   ;;  %v5672_v6 = vld [vmem:[%s5877_s7 + $0xf8] sm:$0xff]   ;;  %v5674_v8 = vld [vmem:[%s5877_s7 + $0x100] sm:$0xff]  }
  0x26   : > { %5181 = vmatmul.mubr.bf16.vlgmr.msra.gmra.mrb[0].mxu0 %v5612_v10  ;;  %v5671_v5 = vld [vmem:[%s5877_s7 + $0x410] sm:$0xff]   ;;  %v5673_v7 = vld [vmem:[%s5877_s7 + $0x418] sm:$0xff]   ;;  %v5675_v9 = vld [vmem:[%s5877_s7 + $0x420] sm:$0xff]  }
  0x27   : > { %5381 = vmatmul.mubr.bf16.vlgmr.msra.gmra.mrb[0].mxu1 %v5613_v11  ;;  %5184 = vmatprep.mubr.bf16.mxu0 %v5614_v12  ;;  %v5676_v10 = vld [vmem:[%s5877_s7 + $0x108] sm:$0xff]   ;;  %v5678_v12 = vld [vmem:[%s5877_s7 + $0x110] sm:$0xff]  }
  0x28   : > { %5384 = vmatprep.mubr.bf16.mxu1 %v5615_v13  ;;  %v5677_v11 = vld [vmem:[%s5877_s7 + $0x428] sm:$0xff]   ;;  %v5679_v13 = vld [vmem:[%s5877_s7 + $0x430] sm:$0xff]  }
  0x2e   : > { %5185 = vmatmul.mubr.bf16.gmra.mrb[4].mxu0 %v5616_v14  ;;  %v5680_v14 = vld [vmem:[%s5877_s7 + $0x118] sm:$0xff]  }
  0x2f   : > { %5385 = vmatmul.mubr.bf16.gmra.mrb[4].mxu1 %v5617_v15  ;;  %5188 = vmatprep.mubr.bf16.mxu0 %v5618_v16  ;;  %v5681_v15 = vld [vmem:[%s5877_s7 + $0x438] sm:$0xff]   ;;  %v5682_v16 = vld [vmem:[%s5877_s7 + $0x120] sm:$0xff]  }
  0x30   : > { %5388 = vmatprep.mubr.bf16.mxu1 %v5619_v17  ;;  %v5683_v17 = vld [vmem:[%s5877_s7 + $0x440] sm:$0xff]  }
  0x36   : > { %5189 = vmatmul.mubr.bf16.gmra.mrb[8].mxu0 %v5620_v18  ;;  %v5684_v18 = vld [vmem:[%s5877_s7 + $0x128] sm:$0xff]  }
  0x37   : > { %5389 = vmatmul.mubr.bf16.gmra.mrb[8].mxu1 %v5621_v19  ;;  %5192 = vmatprep.mubr.bf16.mxu0 %v5622_v20  ;;  %v5685_v19 = vld [vmem:[%s5877_s7 + $0x448] sm:$0xff]   ;;  %v5686_v20 = vld [vmem:[%s5877_s7 + $0x130] sm:$0xff]  }
  0x38   : > { %5392 = vmatprep.mubr.bf16.mxu1 %v5623_v21  ;;  %v5687_v21 = vld [vmem:[%s5877_s7 + $0x450] sm:$0xff]  }
  0x3e   : > { %5193 = vmatmul.mubr.bf16.gmra.mrb[12].mxu0 %v5624_v22  ;;  %v5688_v22 = vld [vmem:[%s5877_s7 + $0x138] sm:$0xff]  }
  0x3f   : > { %5393 = vmatmul.mubr.bf16.gmra.mrb[12].mxu1 %v5625_v23  ;;  %5196 = vmatprep.mubr.bf16.mxu0 %v5626_v24  ;;  %v5689_v23 = vld [vmem:[%s5877_s7 + $0x458] sm:$0xff]   ;;  %v5690_v24 = vld [vmem:[%s5877_s7 + $0x140] sm:$0xff]  }
  0x40   : > { %5396 = vmatprep.mubr.bf16.mxu1 %v5627_v25  ;;  %v5691_v25 = vld [vmem:[%s5877_s7 + $0x460] sm:$0xff]  }
  0x46   : > { %5197 = vmatmul.mubr.bf16.gmra.mrb[16].mxu0 %v5628_v26  ;;  %v5692_v26 = vld [vmem:[%s5877_s7 + $0x148] sm:$0xff]  }
  0x47   : > { %5397 = vmatmul.mubr.bf16.gmra.mrb[16].mxu1 %v5629_v27  ;;  %5200 = vmatprep.mubr.bf16.mxu0 %v5630_v28  ;;  %v5693_v27 = vld [vmem:[%s5877_s7 + $0x468] sm:$0xff]   ;;  %v5694_v28 = vld [vmem:[%s5877_s7 + $0x150] sm:$0xff]  }
  0x48   : > { %5400 = vmatprep.mubr.bf16.mxu1 %v5631_v29  ;;  %v5695_v29 = vld [vmem:[%s5877_s7 + $0x470] sm:$0xff]  }
  0x4e   : > { %5201 = vmatmul.mubr.bf16.gmra.mrb[20].mxu0 %v5632_v30  ;;  %v5696_v30 = vld [vmem:[%s5877_s7 + $0x158] sm:$0xff]  }
  0x4f   : > { %5401 = vmatmul.mubr.bf16.gmra.mrb[20].mxu1 %v5633_v31  ;;  %5204 = vmatprep.mubr.bf16.mxu0 %v5634_v32  ;;  %v5697_v31 = vld [vmem:[%s5877_s7 + $0x478] sm:$0xff]   ;;  %v5698_v32 = vld [vmem:[%s5877_s7 + $0x160] sm:$0xff]  }
  0x50   : > { %5404 = vmatprep.mubr.bf16.mxu1 %v5635_v33  ;;  %v5699_v33 = vld [vmem:[%s5877_s7 + $0x480] sm:$0xff]  }
  0x56   : > { %5205 = vmatmul.mubr.bf16.gmra.mrb[24].mxu0 %v5636_v34  ;;  %v5700_v34 = vld [vmem:[%s5877_s7 + $0x168] sm:$0xff]  }
  0x57   : > { %5405 = vmatmul.mubr.bf16.gmra.mrb[24].mxu1 %v5637_v35  ;;  %5208 = vmatprep.mubr.bf16.mxu0 %v5638_v36  ;;  %v5701_v35 = vld [vmem:[%s5877_s7 + $0x488] sm:$0xff]   ;;  %v5702_v36 = vld [vmem:[%s5877_s7 + $0x170] sm:$0xff]  }
  0x58   : > { %5408 = vmatprep.mubr.bf16.mxu1 %v5639_v37  ;;  %v5703_v37 = vld [vmem:[%s5877_s7 + $0x490] sm:$0xff]  }
  0x5e   : > { %5209 = vmatmul.mubr.bf16.gmra.mrb[28].mxu0 %v5640_v38  ;;  %v5704_v38 = vld [vmem:[%s5877_s7 + $0x178] sm:$0xff]  }
  0x5f   : > { %5409 = vmatmul.mubr.bf16.gmra.mrb[28].mxu1 %v5641_v39  ;;  %5212 = vmatprep.mubr.bf16.mxu0 %v5642_v40  ;;  %v5705_v39 = vld [vmem:[%s5877_s7 + $0x498] sm:$0xff]   ;;  %v5706_v40 = vld [vmem:[%s5877_s7 + $0x180] sm:$0xff]  }
  0x60   : > { %5412 = vmatprep.mubr.bf16.mxu1 %v5643_v41  ;;  %v5707_v41 = vld [vmem:[%s5877_s7 + $0x4a0] sm:$0xff]  }
  0x66   : > { %5213 = vmatmul.mubr.bf16.gmra.mrb[32].mxu0 %v5644_v42  ;;  %v5708_v42 = vld [vmem:[%s5877_s7 + $0x188] sm:$0xff]  }
  0x67   : > { %5413 = vmatmul.mubr.bf16.gmra.mrb[32].mxu1 %v5645_v43  ;;  %5216 = vmatprep.mubr.bf16.mxu0 %v5646_v44  ;;  %v5709_v43 = vld [vmem:[%s5877_s7 + $0x4a8] sm:$0xff]   ;;  %v5710_v44 = vld [vmem:[%s5877_s7 + $0x190] sm:$0xff]  }
  0x68   : > { %5416 = vmatprep.mubr.bf16.mxu1 %v5647_v45  ;;  %v5711_v45 = vld [vmem:[%s5877_s7 + $0x4b0] sm:$0xff]  }
  0x6e   : > { %5217 = vmatmul.mubr.bf16.gmra.mrb[36].mxu0 %v5648_v46  ;;  %v5712_v46 = vld [vmem:[%s5877_s7 + $0x198] sm:$0xff]  }
  0x6f   : > { %5417 = vmatmul.mubr.bf16.gmra.mrb[36].mxu1 %v5649_v47  ;;  %5220 = vmatprep.mubr.bf16.mxu0 %v5650_v48  ;;  %v5713_v47 = vld [vmem:[%s5877_s7 + $0x4b8] sm:$0xff]   ;;  %v5714_v48 = vld [vmem:[%s5877_s7 + $0x1a0] sm:$0xff]  }
  0x70   : > { %5420 = vmatprep.mubr.bf16.mxu1 %v5651_v49  ;;  %v5715_v49 = vld [vmem:[%s5877_s7 + $0x4c0] sm:$0xff]  }
  0x76   : > { %5221 = vmatmul.mubr.bf16.gmra.mrb[40].mxu0 %v5652_v50  ;;  %v5716_v50 = vld [vmem:[%s5877_s7 + $0x1a8] sm:$0xff]  }
  0x77   : > { %5421 = vmatmul.mubr.bf16.gmra.mrb[40].mxu1 %v5653_v51  ;;  %5224 = vmatprep.mubr.bf16.mxu0 %v5654_v52  ;;  %v5717_v51 = vld [vmem:[%s5877_s7 + $0x4c8] sm:$0xff]   ;;  %v5718_v52 = vld [vmem:[%s5877_s7 + $0x1b0] sm:$0xff]  }
  0x78   : > { %5424 = vmatprep.mubr.bf16.mxu1 %v5655_v53  ;;  %v5719_v53 = vld [vmem:[%s5877_s7 + $0x4d0] sm:$0xff]  }
  0x7e   : > { %5225 = vmatmul.mubr.bf16.gmra.mrb[44].mxu0 %v5656_v54 }
  0x7f   : > { %5425 = vmatmul.mubr.bf16.gmra.mrb[44].mxu1 %v5657_v55  ;;  %5228 = vmatprep.mubr.bf16.mxu0 %v5658_v56 }
  0x80   : > { %5428 = vmatprep.mubr.bf16.mxu1 %v5659_v57  ;;  %v5720_v57 = vld [vmem:[%s5877_s7 + $0x1b8] sm:$0xff]  }
  0x86   : > { %5229 = vmatmul.mubr.bf16.gmra.mrb[48].mxu0 %v5660_v58  ;;  %v5721_v58 = vld [vmem:[%s5877_s7 + $0x4d8] sm:$0xff]  }
  0x87   : > { %5429 = vmatmul.mubr.bf16.gmra.mrb[48].mxu1 %v5661_v59  ;;  %5232 = vmatprep.mubr.bf16.mxu0 %v5662_v60 }
  0x88   : > { %5432 = vmatprep.mubr.bf16.mxu1 %v5663_v61  ;;  %v5722_v61 = vld [vmem:[%s5877_s7 + $0x1c0] sm:$0xff]  }
  0x8e   : > { %5233 = vmatmul.mubr.bf16.gmra.mrb[52].mxu0 %v5664_v62  ;;  %v5723_v62 = vld [vmem:[%s5877_s7 + $0x4e0] sm:$0xff]  }
  0x8f   : > { %5433 = vmatmul.mubr.bf16.gmra.mrb[52].mxu1 %v5665_v63  ;;  %5236 = vmatprep.mubr.bf16.mxu0 %v5666_v0 }
  0x90   : > { %5436 = vmatprep.mubr.bf16.mxu1 %v5667_v1 }
  0x96   : > { %5237 = vmatmul.mubr.bf16.gmra.mrb[56].mxu0 %v5668_v2 }
  0x97   : > { %5437 = vmatmul.mubr.bf16.gmra.mrb[56].mxu1 %v5669_v3  ;;  %5240 = vmatprep.mubr.bf16.mxu0 %v5670_v4 }
  0x98   : > { %5440 = vmatprep.mubr.bf16.mxu1 %v5671_v5  ;;  %v5724_v5 = vld [vmem:[%s5877_s7 + $0x1c8] sm:$0xff]  }
  0x9e   : > { %5241 = vmatmul.mubr.bf16.gmra.mrb[60].mxu0 %v5672_v6  ;;  %v5725_v6 = vld [vmem:[%s5877_s7 + $0x4e8] sm:$0xff]  }
  0x9f   : > { %5441 = vmatmul.mubr.bf16.gmra.mrb[60].mxu1 %v5673_v7  ;;  %5244 = vmatprep.mubr.bf16.mxu0 %v5674_v8  ;;  %v6010_v8 = vld [vmem:[%s7894_s2] ss:$0 sm:$0xff] }
  0xa0   : > { %5444 = vmatprep.mubr.bf16.mxu1 %v5675_v9 }
  0xa6   : > { %5245 = vmatmul.mubr.bf16.gmra.mrb[64].mxu0 %v5676_v10 }
  0xa7   : > { %5445 = vmatmul.mubr.bf16.gmra.mrb[64].mxu1 %v5677_v11  ;;  %5248 = vmatprep.mubr.bf16.mxu0 %v5678_v12  ;;  %v5726_v11 = vld [vmem:[%s5877_s7 + $0x1d0] sm:$0xff]  }
  0xa8   : > { %5448 = vmatprep.mubr.bf16.mxu1 %v5679_v13  ;;  %v5727_v12 = vld [vmem:[%s5877_s7 + $0x4f0] sm:$0xff]  }
  0xae   : > { %5249 = vmatmul.mubr.bf16.gmra.mrb[68].mxu0 %v5680_v14 }
  0xaf   : > { %5449 = vmatmul.mubr.bf16.gmra.mrb[68].mxu1 %v5681_v15  ;;  %5252 = vmatprep.mubr.bf16.mxu0 %v5682_v16 }
  0xb0   : > { %5452 = vmatprep.mubr.bf16.mxu1 %v5683_v17 }
  0xb6   : > { %5253 = vmatmul.mubr.bf16.gmra.mrb[72].mxu0 %v5684_v18 }
  0xb7   : > { %5453 = vmatmul.mubr.bf16.gmra.mrb[72].mxu1 %v5685_v19  ;;  %5256 = vmatprep.mubr.bf16.mxu0 %v5686_v20 }
  0xb8   : > { %5456 = vmatprep.mubr.bf16.mxu1 %v5687_v21 }
  0xbe   : > { %5257 = vmatmul.mubr.bf16.gmra.mrb[76].mxu0 %v5688_v22 }
  0xbf   : > { %5457 = vmatmul.mubr.bf16.gmra.mrb[76].mxu1 %v5689_v23  ;;  %5260 = vmatprep.mubr.bf16.mxu0 %v5690_v24  ;;  %v5728_v24 = vld [vmem:[%s5877_s7 + $0x1d8] sm:$0xff]  }
  0xc0   : > { %5460 = vmatprep.mubr.bf16.mxu1 %v5691_v25 }
  0xc6   : > { %5261 = vmatmul.mubr.bf16.gmra.mrb[80].mxu0 %v5692_v26  ;;  %v5729_v26 = vld [vmem:[%s5877_s7 + $0x4f8] sm:$0xff]  }
  0xc7   : > { %5461 = vmatmul.mubr.bf16.gmra.mrb[80].mxu1 %v5693_v27  ;;  %5264 = vmatprep.mubr.bf16.mxu0 %v5694_v28 }
  0xc8   : > { %5464 = vmatprep.mubr.bf16.mxu1 %v5695_v29 }
  0xce   : > { %5265 = vmatmul.mubr.bf16.gmra.mrb[84].mxu0 %v5696_v30 }
  0xcf   : > { %5465 = vmatmul.mubr.bf16.gmra.mrb[84].mxu1 %v5697_v31  ;;  %5268 = vmatprep.mubr.bf16.mxu0 %v5698_v32 }
  0xd0   : > { %5468 = vmatprep.mubr.bf16.mxu1 %v5699_v33  ;;  %v5730_v33 = vld [vmem:[%s5877_s7 + $0x1e0] sm:$0xff]  }
  0xd6   : > { %5269 = vmatmul.mubr.bf16.gmra.mrb[88].mxu0 %v5700_v34  ;;  %v5731_v34 = vld [vmem:[%s5877_s7 + $0x500] sm:$0xff]  }
  0xd7   : > { %5469 = vmatmul.mubr.bf16.gmra.mrb[88].mxu1 %v5701_v35  ;;  %5272 = vmatprep.mubr.bf16.mxu0 %v5702_v36 }
  0xd8   : > { %5472 = vmatprep.mubr.bf16.mxu1 %v5703_v37 }
  0xde   : > { %5273 = vmatmul.mubr.bf16.gmra.mrb[92].mxu0 %v5704_v38 }
  0xdf   : > { %5473 = vmatmul.mubr.bf16.gmra.mrb[92].mxu1 %v5705_v39  ;;  %5276 = vmatprep.mubr.bf16.mxu0 %v5706_v40 }
  0xe0   : > { %5476 = vmatprep.mubr.bf16.mxu1 %v5707_v41 }
  0xe6   : > { %5277 = vmatmul.mubr.bf16.gmra.mrb[96].mxu0 %v5708_v42 }
  0xe7   : > { %5477 = vmatmul.mubr.bf16.gmra.mrb[96].mxu1 %v5709_v43  ;;  %5280 = vmatprep.mubr.bf16.mxu0 %v5710_v44 }
  0xe8   : > { %5480 = vmatprep.mubr.bf16.mxu1 %v5711_v45 }
  0xee   : > { %5281 = vmatmul.mubr.bf16.gmra.mrb[100].mxu0 %v5712_v46 }
  0xef   : > { %5481 = vmatmul.mubr.bf16.gmra.mrb[100].mxu1 %v5713_v47  ;;  %5284 = vmatprep.mubr.bf16.mxu0 %v5714_v48 }
  0xf0   : > { %5484 = vmatprep.mubr.bf16.mxu1 %v5715_v49 }
  0xf6   : > { %5285 = vmatmul.mubr.bf16.gmra.mrb[104].mxu0 %v5716_v50 }
  0xf7   : > { %5485 = vmatmul.mubr.bf16.gmra.mrb[104].mxu1 %v5717_v51  ;;  %5288 = vmatprep.mubr.bf16.mxu0 %v5718_v52 }
  0xf8   : > { %5488 = vmatprep.mubr.bf16.mxu1 %v5719_v53 }
  0xf9   : > { %v5182_v54 = vpop.f32.mrb[0].mxu0 }
  0xfa   : > { %v5382_v55 = vpop.f32.mrb[0].mxu1  ;;  %v1923_v56 = vpop.f32.mrb[1].mxu0  ;;  %v6015_v15 = vadd.f32 %v5182_v54, %v6010_v8 }
  0xfb   : > { %v2723_v59 = vpop.f32.mrb[1].mxu1  ;;  %v5183_v60 = vpop.f32.mrb[2].mxu0  ;;  %v1924_v17 = vadd.f32 %v6010_v8, %v1923_v56  ;;  %v6020_v18 = vadd.f32 %v5382_v55, %v6010_v8 }
  0xfc   : > { %v5383_v63 = vpop.f32.mrb[2].mxu1  ;;  %v1926_v0 = vpop.f32.mrb[3].mxu0  ;;  %v2724_v16 = vadd.f32 %v6010_v8, %v2723_v59  ;;  %v3508_v21 = vmax.f32 %v6015_v15, 0.0  ;;  %v6028_v22 = vadd.f32 %v5183_v60, %v6010_v8 }
  0xfd   : > { %v2726_v1 = vpop.f32.mrb[3].mxu1  ;;  %v6033_v27 = vadd.f32 %v6010_v8, %v1926_v0  ;;  %v6036_v29 = vadd.f32 %v5383_v63, %v6010_v8  ;;  %v3506_v41 = vmax.f32 %v1924_v17, 0.0  ;;  %v3708_v43 = vmax.f32 %v6020_v18, 0.0  ;;  %v5737_v18 = vld [vmem:[%s5877_s7 + $0x518] sm:$0xff]  }
  0xfe   : > { %5289 = vmatmul.mubr.bf16.gmra.mrb[108].mxu0 %v5720_v57  ;;  %v3706_v28 = vmax.f32 %v2724_v16, 0.0  ;;  %v6039_v30 = vadd.f32 %v6010_v8, %v2726_v1  ;;  %v3509_v49 = vmax.f32 %v6028_v22, 0.0  ;;  %v5735_v16 = vld [vmem:[%s5877_s7 + $0x510] sm:$0xff]  }
  0xff   : > { %5489 = vmatmul.mubr.bf16.gmra.mrb[108].mxu1 %v5721_v58  ;;  %5292 = vmatprep.mubr.bf16.mxu0 %v5722_v61  ;;  %v3507_v50 = vmax.f32 %v6033_v27, 0.0  ;;  %v3709_v51 = vmax.f32 %v6036_v29, 0.0 }
 0x100   : > { %5492 = vmatprep.mubr.bf16.mxu1 %v5723_v62  ;;  %v3707_v52 = vmax.f32 %v6039_v30, 0.0 }
 0x101   : > { %v5186_v2 = vpop.f32.mrb[4].mxu0 }
 0x102   : > { %v5386_v3 = vpop.f32.mrb[4].mxu1  ;;  %v1939_v4 = vpop.f32.mrb[5].mxu0  ;;  %v6044_v35 = vadd.f32 %v5186_v2, %v6010_v8 }
 0x103   : > { %v2739_v7 = vpop.f32.mrb[5].mxu1  ;;  %v5187_v9 = vpop.f32.mrb[6].mxu0  ;;  %v6047_v36 = vadd.f32 %v5386_v3, %v6010_v8  ;;  %v6056_v42 = vadd.f32 %v6010_v8, %v1939_v4 }
 0x104   : > { %v5387_v10 = vpop.f32.mrb[6].mxu1  ;;  %v1942_v13 = vpop.f32.mrb[7].mxu0  ;;  %v6060_v44 = vadd.f32 %v6010_v8, %v2739_v7  ;;  %v6063_v45 = vadd.f32 %v5187_v9, %v6010_v8  ;;  %v3512_v53 = vmax.f32 %v6044_v35, 0.0 }
 0x105   : > { %v2742_v14 = vpop.f32.mrb[7].mxu1  ;;  %v6066_v47 = vadd.f32 %v5387_v10, %v6010_v8  ;;  %v3712_v54 = vmax.f32 %v6047_v36, 0.0  ;;  %v3510_v57 = vmax.f32 %v6056_v42, 0.0  ;;  %v6080_v58 = vadd.f32 %v6010_v8, %v1942_v13 }
 0x106   : > { %5293 = vmatmul.mubr.bf16.gmra.mrb[112].mxu0 %v5724_v5  ;;  %v3710_v59 = vmax.f32 %v6060_v44, 0.0  ;;  %v6084_v60 = vadd.f32 %v6010_v8, %v2742_v14  ;;  %v3513_v63 = vmax.f32 %v6063_v45, 0.0  ;;  %v5732_v5 = vld [vmem:[%s5877_s7 + $0x1e8] sm:$0xff]   ;;  %v5734_v14 = vld [vmem:[%s5877_s7 + $0x1f0] sm:$0xff]  }
 0x107   : > { %5493 = vmatmul.mubr.bf16.gmra.mrb[112].mxu1 %v5725_v6  ;;  %5296 = vmatprep.mubr.bf16.mxu0 %v5726_v11  ;;  %v3713_v0 = vmax.f32 %v6066_v47, 0.0  ;;  %v5733_v6 = vld [vmem:[%s5877_s7 + $0x508] sm:$0xff]   ;;  %v3511_v44 = vmax.f32 %v6080_v58, 0.0 }
 0x108   : > { %5496 = vmatprep.mubr.bf16.mxu1 %v5727_v12 }
 0x109   : > { %v6022_v19 = vpop.f32.mrb[8].mxu0 }
 0x10a   : > { %v6024_v20 = vpop.f32.mrb[8].mxu1  ;;  %v1955_v23 = vpop.f32.mrb[9].mxu0 }
 0x10b   : > { %v2755_v25 = vpop.f32.mrb[9].mxu1  ;;  %v5191_v31 = vpop.f32.mrb[10].mxu0  ;;  %v6093_v7 = vadd.f32 %v6010_v8, %v1955_v23 }
 0x10c   : > { %v5391_v32 = vpop.f32.mrb[10].mxu1  ;;  %v1967_v37 = vadd.f32 %v5191_v31, %v6010_v8  ;;  %v6050_v38 = vpop.f32.mrb[11].mxu0  ;;  %v6096_v9 = vadd.f32 %v6010_v8, %v2755_v25 }
 0x10d   : > { %v2767_v39 = vadd.f32 %v5391_v32, %v6010_v8  ;;  %v6053_v40 = vpop.f32.mrb[11].mxu1 }
 0x10e   : > { %v3517_v46 = vmax.f32 %v1967_v37, 0.0  ;;  %5297 = vmatmul.mubr.bf16.gmra.mrb[116].mxu0 %v5728_v24 }
 0x10f   : > { %5497 = vmatmul.mubr.bf16.gmra.mrb[116].mxu1 %v5729_v26  ;;  %v3717_v48 = vmax.f32 %v2767_v39, 0.0  ;;  %5300 = vmatprep.mubr.bf16.mxu0 %v5730_v33 }
 0x110   : > { %5500 = vmatprep.mubr.bf16.mxu1 %v5731_v34  ;;  %v6074_v55 = vmax.f32 %v3506_v41, %v3517_v46  ;;  %v3711_v46 = vmax.f32 %v6084_v60, 0.0  ;;  %v3514_v60 = vmax.f32 %v6093_v7, 0.0 }
 0x111   : > { %v6076_v56 = vmax.f32 %v3706_v28, %v3717_v48  ;;  %v5194_v61 = vpop.f32.mrb[12].mxu0 }
 0x112   : > { %v5394_v62 = vpop.f32.mrb[12].mxu1  ;;  %v1980_v1 = vadd.f32 %v5194_v61, %v6010_v8  ;;  %v1971_v3 = vpop.f32.mrb[13].mxu0 }
 0x113   : > { %v2780_v2 = vadd.f32 %v5394_v62, %v6010_v8  ;;  %v2771_v4 = vpop.f32.mrb[13].mxu1  ;;  %v1972_v10 = vadd.f32 %v6010_v8, %v1971_v3  ;;  %v5195_v12 = vpop.f32.mrb[14].mxu0  ;;  %v5736_v62 = vld [vmem:[%s5877_s7 + $0x1f8] sm:$0xff]  }
 0x114   : > { %v2772_v11 = vadd.f32 %v6010_v8, %v2771_v4  ;;  %v5395_v13 = vpop.f32.mrb[14].mxu1  ;;  %v3520_v17 = vmax.f32 %v1980_v1, 0.0  ;;  %v1983_v24 = vadd.f32 %v5195_v12, %v6010_v8  ;;  %v1974_v27 = vpop.f32.mrb[15].mxu0  ;;  %v6148_v1 = vadd.f32 %v6010_v8, %v6053_v40 }
 0x115   : > { %v3720_v22 = vmax.f32 %v2780_v2, 0.0  ;;  %v2783_v26 = vadd.f32 %v5395_v13, %v6010_v8  ;;  %v2774_v23 = vpop.f32.mrb[15].mxu1  ;;  %v3518_v28 = vmax.f32 %v1972_v10, 0.0  ;;  %v1975_v25 = vadd.f32 %v6010_v8, %v1974_v27 }
 0x116   : > { %v3718_v29 = vmax.f32 %v2772_v11, 0.0  ;;  %v2775_v30 = vadd.f32 %v6010_v8, %v2774_v23  ;;  %v6106_v31 = vmax.f32 %v3509_v49, %v3520_v17  ;;  %v3521_v33 = vmax.f32 %v1983_v24, 0.0  ;;  %5301 = vmatmul.mubr.bf16.gmra.mrb[120].mxu0 %v5732_v5  ;;  %v5738_v5 = vld [vmem:[%s5877_s7 + $0x200] sm:$0xff]  }
 0x117   : > { %v6108_v32 = vmax.f32 %v3709_v51, %v3720_v22  ;;  %v3721_v34 = vmax.f32 %v2783_v26, 0.0  ;;  %5501 = vmatmul.mubr.bf16.gmra.mrb[120].mxu1 %v5733_v6  ;;  %v6110_v37 = vmax.f32 %v3507_v50, %v3518_v28  ;;  %v3519_v41 = vmax.f32 %v1975_v25, 0.0  ;;  %5304 = vmatprep.mubr.bf16.mxu0 %v5734_v14  ;;  %v5739_v6 = vld [vmem:[%s5877_s7 + $0x520] sm:$0xff]  }
 0x118   : > { %v6112_v39 = vmax.f32 %v3707_v52, %v3718_v29  ;;  %v3719_v42 = vmax.f32 %v2775_v30, 0.0  ;;  %5504 = vmatprep.mubr.bf16.mxu1 %v5735_v16  ;;  %v6116_v48 = vmax.f32 %v3510_v57, %v3521_v33  ;;  %v6122_v50 = vadd.f32 %v6022_v19, %v6010_v8 }
 0x119   : > { %v6118_v49 = vmax.f32 %v3710_v59, %v3721_v34  ;;  %v6126_v51 = vadd.f32 %v6024_v20, %v6010_v8  ;;  %v6130_v52 = vmax.f32 %v3508_v21, %v3519_v41  ;;  %v5198_v57 = vpop.f32.mrb[16].mxu0  ;;  %v6139_v19 = vadd.f32 %v6010_v8, %v6050_v38 }
 0x11a   : > { %v6134_v58 = vmax.f32 %v3708_v43, %v3719_v42  ;;  %v5398_v59 = vpop.f32.mrb[16].mxu1  ;;  %v1996_v20 = vadd.f32 %v5198_v57, %v6010_v8  ;;  %v1987_v21 = vpop.f32.mrb[17].mxu0  ;;  %v3714_v43 = vmax.f32 %v6096_v9, 0.0  ;;  %v3516_v34 = vmax.f32 %v6122_v50, 0.0  ;;  %v5741_v57 = vld [vmem:[%s5877_s7 + $0x528] sm:$0xff]  }
 0x11b   : > { %v2796_v15 = vadd.f32 %v5398_v59, %v6010_v8  ;;  %v2787_v61 = vpop.f32.mrb[17].mxu1  ;;  %v1988_v2 = vadd.f32 %v6010_v8, %v1987_v21  ;;  %v5199_v38 = vpop.f32.mrb[18].mxu0  ;;  %v3716_v41 = vmax.f32 %v6126_v51, 0.0  ;;  %v3515_v36 = vmax.f32 %v6139_v19, 0.0  ;;  %v5743_v51 = vld [vmem:[%s5877_s7 + $0x530] sm:$0xff]  }
 0x11c   : > { %v2788_v3 = vadd.f32 %v6010_v8, %v2787_v61  ;;  %v5399_v4 = vpop.f32.mrb[18].mxu1  ;;  %v3524_v7 = vmax.f32 %v1996_v20, 0.0  ;;  %v1999_v11 = vadd.f32 %v5199_v38, %v6010_v8  ;;  %v1990_v13 = vpop.f32.mrb[19].mxu0 }
 0x11d   : > { %v3724_v10 = vmax.f32 %v2796_v15, 0.0  ;;  %v2799_v12 = vadd.f32 %v5399_v4, %v6010_v8  ;;  %v2790_v9 = vpop.f32.mrb[19].mxu1  ;;  %v3522_v14 = vmax.f32 %v1988_v2, 0.0  ;;  %v1991_v40 = vadd.f32 %v6010_v8, %v1990_v13  ;;  %v5742_v15 = vld [vmem:[%s5877_s7 + $0x210] sm:$0xff]  }
 0x11e   : > { %v3722_v16 = vmax.f32 %v2788_v3, 0.0  ;;  %v2791_v17 = vadd.f32 %v6010_v8, %v2790_v9  ;;  %v6160_v22 = vmax.f32 %v3513_v63, %v3524_v7  ;;  %v3525_v26 = vmax.f32 %v1999_v11, 0.0  ;;  %5305 = vmatmul.mubr.bf16.gmra.mrb[124].mxu0 %v5736_v62 }
 0x11f   : > { %v6164_v24 = vmax.f32 %v3713_v0, %v3724_v10  ;;  %v3725_v27 = vmax.f32 %v2799_v12, 0.0  ;;  %5505 = vmatmul.mubr.bf16.gmra.mrb[124].mxu1 %v5737_v18  ;;  %v6166_v23 = vmax.f32 %v3511_v44, %v3522_v14  ;;  %v3523_v29 = vmax.f32 %v1991_v40, 0.0  ;;  %5308 = vmatprep.mubr.bf16.mxu0 %v5738_v5 }
 0x120   : > { %v6168_v28 = vmax.f32 %v3711_v46, %v3722_v16  ;;  %v3723_v25 = vmax.f32 %v2791_v17, 0.0  ;;  %5508 = vmatprep.mubr.bf16.mxu1 %v5739_v6  ;;  %v6170_v45 = vmax.f32 %v3514_v60, %v3525_v26 }
 0x121   : > { %v6172_v63 = vmax.f32 %v3714_v43, %v3725_v27  ;;  %v6176_v47 = vmax.f32 %v3512_v53, %v3523_v29  ;;  %v5202_v30 = vpop.f32.mrb[20].mxu0  ;;  %v5740_v53 = vld [vmem:[%s5877_s7 + $0x208] sm:$0xff]  }
 0x122   : > { %v6180_v0 = vmax.f32 %v3712_v54, %v3723_v25  ;;  %v5402_v33 = vpop.f32.mrb[20].mxu1  ;;  %v2012_v42 = vadd.f32 %v5202_v30, %v6010_v8  ;;  %v2003_v46 = vpop.f32.mrb[21].mxu0  ;;  %v3715_v54 = vmax.f32 %v6148_v1, 0.0  ;;  %v5744_v25 = vld [vmem:[%s5877_s7 + $0x218] sm:$0xff]  }
 0x123   : > { %v2812_v44 = vadd.f32 %v5402_v33, %v6010_v8  ;;  %v2803_v35 = vpop.f32.mrb[21].mxu1  ;;  %v2004_v59 = vadd.f32 %v6010_v8, %v2003_v46  ;;  %v5203_v20 = vpop.f32.mrb[22].mxu0 }
 0x124   : > { %v2804_v60 = vadd.f32 %v6010_v8, %v2803_v35  ;;  %v5403_v50 = vpop.f32.mrb[22].mxu1  ;;  %v3528_v21 = vmax.f32 %v2012_v42, 0.0  ;;  %v2015_v62 = vadd.f32 %v5203_v20, %v6010_v8  ;;  %v2006_v43 = vpop.f32.mrb[23].mxu0 }
 0x125   : > { %v3728_v61 = vmax.f32 %v2812_v44, 0.0  ;;  %v2815_v18 = vadd.f32 %v5403_v50, %v6010_v8  ;;  %v2806_v2 = vpop.f32.mrb[23].mxu1  ;;  %v3526_v3 = vmax.f32 %v2004_v59, 0.0  ;;  %v2007_v1 = vadd.f32 %v6010_v8, %v2006_v43  ;;  %v5747_v44 = vld [vmem:[%s5877_s7 + $0x540] sm:$0xff]  }
 0x126   : > { %v3726_v19 = vmax.f32 %v2804_v60, 0.0  ;;  %v2807_v38 = vadd.f32 %v6010_v8, %v2806_v2  ;;  %v6199_v4 = vmax.f32 %v6074_v55, %v3528_v21  ;;  %v3529_v6 = vmax.f32 %v2015_v62, 0.0  ;;  %5309 = vmatmul.mubr.bf16.gmra.mrb[128].mxu0 %v5740_v53 }
 0x127   : > { %v6202_v5 = vmax.f32 %v6076_v56, %v3728_v61  ;;  %v3729_v7 = vmax.f32 %v2815_v18, 0.0  ;;  %5509 = vmatmul.mubr.bf16.gmra.mrb[128].mxu1 %v5741_v57  ;;  %v6204_v10 = vmax.f32 %v3515_v36, %v3526_v3  ;;  %v3527_v12 = vmax.f32 %v2007_v1, 0.0  ;;  %5312 = vmatprep.mubr.bf16.mxu0 %v5742_v15 }
 0x128   : > { %v6206_v11 = vmax.f32 %v3726_v19, %v3715_v54  ;;  %v3727_v13 = vmax.f32 %v2807_v38, 0.0  ;;  %5512 = vmatprep.mubr.bf16.mxu1 %v5743_v51  ;;  %v6209_v55 = vmax.f32 %v6110_v37, %v3529_v6  ;;  %v5745_v37 = vld [vmem:[%s5877_s7 + $0x538] sm:$0xff]   ;;  %v5748_v6 = vld [vmem:[%s5877_s7 + $0x228] sm:$0xff]  }
 0x129   : > { %v6212_v56 = vmax.f32 %v6112_v39, %v3729_v7  ;;  %v6214_v9 = vmax.f32 %v3516_v34, %v3527_v12  ;;  %v5206_v16 = vpop.f32.mrb[24].mxu0  ;;  %v5746_v34 = vld [vmem:[%s5877_s7 + $0x220] sm:$0xff]   ;;  %v5749_v7 = vld [vmem:[%s5877_s7 + $0x548] sm:$0xff]  }
 0x12a   : > { %v6216_v14 = vmax.f32 %v3727_v13, %v3716_v41  ;;  %v5406_v40 = vpop.f32.mrb[24].mxu1  ;;  %v2028_v17 = vadd.f32 %v5206_v16, %v6010_v8  ;;  %v2019_v27 = vpop.f32.mrb[25].mxu0  ;;  %v5750_v16 = vld [vmem:[%s5877_s7 + $0x230] sm:$0xff]  }
 0x12b   : > { %v2828_v26 = vadd.f32 %v5406_v40, %v6010_v8  ;;  %v2819_v29 = vpop.f32.mrb[25].mxu1  ;;  %v2020_v30 = vadd.f32 %v6010_v8, %v2019_v27  ;;  %v5207_v33 = vpop.f32.mrb[26].mxu0  ;;  %v5751_v40 = vld [vmem:[%s5877_s7 + $0x550] sm:$0xff]  }
 0x12c   : > { %v2820_v39 = vadd.f32 %v6010_v8, %v2819_v29  ;;  %v5407_v42 = vpop.f32.mrb[26].mxu1  ;;  %v3532_v41 = vmax.f32 %v2028_v17, 0.0  ;;  %v2031_v35 = vadd.f32 %v5207_v33, %v6010_v8  ;;  %v2022_v57 = vpop.f32.mrb[27].mxu0 }
 0x12d   : > { %v3732_v46 = vmax.f32 %v2828_v26, 0.0  ;;  %v2831_v53 = vadd.f32 %v5407_v42, %v6010_v8  ;;  %v2822_v36 = vpop.f32.mrb[27].mxu1  ;;  %v3530_v54 = vmax.f32 %v2020_v30, 0.0  ;;  %v2023_v60 = vadd.f32 %v6010_v8, %v2022_v57 }
 0x12e   : > { %v3730_v59 = vmax.f32 %v2820_v39, 0.0  ;;  %v2823_v20 = vadd.f32 %v6010_v8, %v2822_v36  ;;  %v6231_v50 = vmax.f32 %v6116_v48, %v3532_v41  ;;  %v3533_v51 = vmax.f32 %v2031_v35, 0.0  ;;  %5313 = vmatmul.mubr.bf16.gmra.mrb[132].mxu0 %v5744_v25 }
 0x12f   : > { %v6234_v15 = vmax.f32 %v6118_v49, %v3732_v46  ;;  %v3733_v21 = vmax.f32 %v2831_v53, 0.0  ;;  %5513 = vmatmul.mubr.bf16.gmra.mrb[132].mxu1 %v5745_v37  ;;  %v6237_v61 = vmax.f32 %v6130_v52, %v3530_v54  ;;  %v3531_v18 = vmax.f32 %v2023_v60, 0.0  ;;  %5316 = vmatprep.mubr.bf16.mxu0 %v5746_v34 }
 0x130   : > { %v6240_v62 = vmax.f32 %v6134_v58, %v3730_v59  ;;  %v3731_v43 = vmax.f32 %v2823_v20, 0.0  ;;  %5516 = vmatprep.mubr.bf16.mxu1 %v5747_v44  ;;  %v6243_v48 = vmax.f32 %v6166_v23, %v3533_v51  ;;  %v5752_v51 = vld [vmem:[%s5877_s7 + $0x238] sm:$0xff]  }
 0x131   : > { %v6246_v49 = vmax.f32 %v6168_v28, %v3733_v21  ;;  %v6249_v52 = vmax.f32 %v6106_v31, %v3531_v18  ;;  %v5210_v58 = vpop.f32.mrb[28].mxu0  ;;  %v5753_v21 = vld [vmem:[%s5877_s7 + $0x558] sm:$0xff]  }
 0x132   : > { %v6252_v2 = vmax.f32 %v6108_v32, %v3731_v43  ;;  %v5410_v3 = vpop.f32.mrb[28].mxu1  ;;  %v2044_v19 = vadd.f32 %v5210_v58, %v6010_v8  ;;  %v2035_v38 = vpop.f32.mrb[29].mxu0  ;;  %v5754_v58 = vld [vmem:[%s5877_s7 + $0x240] sm:$0xff]  }
 0x133   : > { %v2844_v1 = vadd.f32 %v5410_v3, %v6010_v8  ;;  %v2835_v23 = vpop.f32.mrb[29].mxu1  ;;  %v2036_v28 = vadd.f32 %v6010_v8, %v2035_v38  ;;  %v5211_v13 = vpop.f32.mrb[30].mxu0  ;;  %v5755_v3 = vld [vmem:[%s5877_s7 + $0x560] sm:$0xff]  }
 0x134   : > { %v2836_v12 = vadd.f32 %v6010_v8, %v2835_v23  ;;  %v5411_v31 = vpop.f32.mrb[30].mxu1  ;;  %v3536_v32 = vmax.f32 %v2044_v19, 0.0  ;;  %v2047_v26 = vadd.f32 %v5211_v13, %v6010_v8  ;;  %v2038_v29 = vpop.f32.mrb[31].mxu0 }
 0x135   : > { %v3736_v17 = vmax.f32 %v2844_v1, 0.0  ;;  %v2847_v27 = vadd.f32 %v5411_v31, %v6010_v8  ;;  %v2838_v25 = vpop.f32.mrb[31].mxu1  ;;  %v3534_v37 = vmax.f32 %v2036_v28, 0.0  ;;  %v2039_v39 = vadd.f32 %v6010_v8, %v2038_v29 }
 0x136   : > { %v3734_v30 = vmax.f32 %v2836_v12, 0.0  ;;  %v2839_v33 = vadd.f32 %v6010_v8, %v2838_v25  ;;  %v6267_v42 = vmax.f32 %v6170_v45, %v3536_v32  ;;  %v3537_v44 = vmax.f32 %v2047_v26, 0.0  ;;  %5317 = vmatmul.mubr.bf16.gmra.mrb[136].mxu0 %v5748_v6 }
 0x137   : > { %v6270_v34 = vmax.f32 %v6172_v63, %v3736_v17  ;;  %v3737_v41 = vmax.f32 %v2847_v27, 0.0  ;;  %5517 = vmatmul.mubr.bf16.gmra.mrb[136].mxu1 %v5749_v7  ;;  %v6273_v46 = vmax.f32 %v6176_v47, %v3534_v37  ;;  %v3535_v53 = vmax.f32 %v2039_v39, 0.0  ;;  %5320 = vmatprep.mubr.bf16.mxu0 %v5750_v16 }
 0x138   : > { %v6276_v35 = vmax.f32 %v6180_v0, %v3734_v30  ;;  %v3735_v57 = vmax.f32 %v2839_v33, 0.0  ;;  %5520 = vmatprep.mubr.bf16.mxu1 %v5751_v40  ;;  %v6279_v45 = vmax.f32 %v6204_v10, %v3537_v44  ;;  %v5756_v44 = vld [vmem:[%s5877_s7 + $0x248] sm:$0xff]  }
 0x139   : > { %v6282_v63 = vmax.f32 %v6206_v11, %v3737_v41  ;;  %v6285_v47 = vmax.f32 %v6160_v22, %v3535_v53  ;;  %v5214_v0 = vpop.f32.mrb[32].mxu0  ;;  %v5757_v41 = vld [vmem:[%s5877_s7 + $0x568] sm:$0xff]  }
 0x13a   : > { %v6288_v36 = vmax.f32 %v6164_v24, %v3735_v57  ;;  %v5414_v54 = vpop.f32.mrb[32].mxu1  ;;  %v2060_v59 = vadd.f32 %v5214_v0, %v6010_v8  ;;  %v2051_v20 = vpop.f32.mrb[33].mxu0  ;;  %v5758_v0 = vld [vmem:[%s5877_s7 + $0x250] sm:$0xff]  }
 0x13b   : > { %v2860_v60 = vadd.f32 %v5414_v54, %v6010_v8  ;;  %v2851_v10 = vpop.f32.mrb[33].mxu1  ;;  %v2052_v11 = vadd.f32 %v6010_v8, %v2051_v20  ;;  %v5215_v43 = vpop.f32.mrb[34].mxu0  ;;  %v5759_v54 = vld [vmem:[%s5877_s7 + $0x570] sm:$0xff]  }
 0x13c   : > { %v2852_v18 = vadd.f32 %v6010_v8, %v2851_v10  ;;  %v5415_v22 = vpop.f32.mrb[34].mxu1  ;;  %v3540_v24 = vmax.f32 %v2060_v59, 0.0  ;;  %v2063_v1 = vadd.f32 %v5215_v43, %v6010_v8  ;;  %v2054_v23 = vpop.f32.mrb[35].mxu0 }
 0x13d   : > { %v3740_v19 = vmax.f32 %v2860_v60, 0.0  ;;  %v2863_v38 = vadd.f32 %v5415_v22, %v6010_v8  ;;  %v2854_v6 = vpop.f32.mrb[35].mxu1  ;;  %v3538_v7 = vmax.f32 %v2052_v11, 0.0  ;;  %v2055_v12 = vadd.f32 %v6010_v8, %v2054_v23 }
 0x13e   : > { %v3738_v28 = vmax.f32 %v2852_v18, 0.0  ;;  %v2855_v13 = vadd.f32 %v6010_v8, %v2854_v6  ;;  %v6303_v31 = vmax.f32 %v6209_v55, %v3540_v24  ;;  %v3541_v40 = vmax.f32 %v2063_v1, 0.0  ;;  %5321 = vmatmul.mubr.bf16.gmra.mrb[140].mxu0 %v5752_v51 }
 0x13f   : > { %v6306_v16 = vmax.f32 %v6212_v56, %v3740_v19  ;;  %v3741_v32 = vmax.f32 %v2863_v38, 0.0  ;;  %5521 = vmatmul.mubr.bf16.gmra.mrb[140].mxu1 %v5753_v21  ;;  %v6309_v17 = vmax.f32 %v6214_v9, %v3538_v7  ;;  %v3539_v27 = vmax.f32 %v2055_v12, 0.0  ;;  %5324 = vmatprep.mubr.bf16.mxu0 %v5754_v58 }
 0x140   : > { %v6312_v26 = vmax.f32 %v6216_v14, %v3738_v28  ;;  %v3739_v29 = vmax.f32 %v2855_v13, 0.0  ;;  %5524 = vmatprep.mubr.bf16.mxu1 %v5755_v3  ;;  %v6315_v55 = vmax.f32 %v6237_v61, %v3541_v40  ;;  %v5760_v40 = vld [vmem:[%s5877_s7 + $0x258] sm:$0xff]  }
 0x141   : > { %v6318_v56 = vmax.f32 %v6240_v62, %v3741_v32  ;;  %v6321_v9 = vmax.f32 %v6199_v4, %v3539_v27  ;;  %v5218_v14 = vpop.f32.mrb[36].mxu0  ;;  %v5761_v32 = vld [vmem:[%s5877_s7 + $0x578] sm:$0xff]  }
 0x142   : > { %v6324_v25 = vmax.f32 %v6202_v5, %v3739_v29  ;;  %v5418_v37 = vpop.f32.mrb[36].mxu1  ;;  %v2076_v30 = vadd.f32 %v5218_v14, %v6010_v8  ;;  %v2067_v33 = vpop.f32.mrb[37].mxu0  ;;  %v5762_v14 = vld [vmem:[%s5877_s7 + $0x260] sm:$0xff]  }
 0x143   : > { %v2876_v39 = vadd.f32 %v5418_v37, %v6010_v8  ;;  %v2867_v61 = vpop.f32.mrb[37].mxu1  ;;  %v2068_v62 = vadd.f32 %v6010_v8, %v2067_v33  ;;  %v5219_v57 = vpop.f32.mrb[38].mxu0  ;;  %v5763_v37 = vld [vmem:[%s5877_s7 + $0x580] sm:$0xff]  }
 0x144   : > { %v2868_v53 = vadd.f32 %v6010_v8, %v2867_v61  ;;  %v5419_v4 = vpop.f32.mrb[38].mxu1  ;;  %v3544_v5 = vmax.f32 %v2076_v30, 0.0  ;;  %v2079_v60 = vadd.f32 %v5219_v57, %v6010_v8  ;;  %v2070_v10 = vpop.f32.mrb[39].mxu0 }
 0x145   : > { %v3744_v59 = vmax.f32 %v2876_v39, 0.0  ;;  %v2879_v20 = vadd.f32 %v5419_v4, %v6010_v8  ;;  %v2870_v51 = vpop.f32.mrb[39].mxu1  ;;  %v3542_v21 = vmax.f32 %v2068_v62, 0.0  ;;  %v2071_v18 = vadd.f32 %v6010_v8, %v2070_v10 }
 0x146   : > { %v3742_v11 = vmax.f32 %v2868_v53, 0.0  ;;  %v2871_v43 = vadd.f32 %v6010_v8, %v2870_v51  ;;  %v6339_v22 = vmax.f32 %v6243_v48, %v3544_v5  ;;  %v3545_v3 = vmax.f32 %v2079_v60, 0.0  ;;  %5325 = vmatmul.mubr.bf16.gmra.mrb[144].mxu0 %v5756_v44 }
 0x147   : > { %v6342_v58 = vmax.f32 %v6246_v49, %v3744_v59  ;;  %v3745_v24 = vmax.f32 %v2879_v20, 0.0  ;;  %5525 = vmatmul.mubr.bf16.gmra.mrb[144].mxu1 %v5757_v41  ;;  %v6345_v19 = vmax.f32 %v6249_v52, %v3542_v21  ;;  %v3543_v38 = vmax.f32 %v2071_v18, 0.0  ;;  %5328 = vmatprep.mubr.bf16.mxu0 %v5758_v0 }
 0x148   : > { %v6348_v1 = vmax.f32 %v6252_v2, %v3742_v11  ;;  %v3743_v23 = vmax.f32 %v2871_v43, 0.0  ;;  %5528 = vmatprep.mubr.bf16.mxu1 %v5759_v54  ;;  %v6351_v48 = vmax.f32 %v6273_v46, %v3545_v3  ;;  %v5764_v3 = vld [vmem:[%s5877_s7 + $0x268] sm:$0xff]  }
 0x149   : > { %v6354_v49 = vmax.f32 %v6276_v35, %v3745_v24  ;;  %v6357_v52 = vmax.f32 %v6231_v50, %v3543_v38  ;;  %v5222_v2 = vpop.f32.mrb[40].mxu0  ;;  %v5765_v24 = vld [vmem:[%s5877_s7 + $0x588] sm:$0xff]  }
 0x14a   : > { %v6360_v6 = vmax.f32 %v6234_v15, %v3743_v23  ;;  %v5422_v7 = vpop.f32.mrb[40].mxu1  ;;  %v2092_v28 = vadd.f32 %v5222_v2, %v6010_v8  ;;  %v2083_v13 = vpop.f32.mrb[41].mxu0  ;;  %v5766_v2 = vld [vmem:[%s5877_s7 + $0x270] sm:$0xff]  }
 0x14b   : > { %v2892_v12 = vadd.f32 %v5422_v7, %v6010_v8  ;;  %v2883_v46 = vpop.f32.mrb[41].mxu1  ;;  %v2084_v35 = vadd.f32 %v6010_v8, %v2083_v13  ;;  %v5223_v29 = vpop.f32.mrb[42].mxu0  ;;  %v5767_v7 = vld [vmem:[%s5877_s7 + $0x590] sm:$0xff]  }
 0x14c   : > { %v2884_v27 = vadd.f32 %v6010_v8, %v2883_v46  ;;  %v5423_v50 = vpop.f32.mrb[42].mxu1  ;;  %v3548_v15 = vmax.f32 %v2092_v28, 0.0  ;;  %v2095_v39 = vadd.f32 %v5223_v29, %v6010_v8  ;;  %v2086_v61 = vpop.f32.mrb[43].mxu0 }
 0x14d   : > { %v3748_v30 = vmax.f32 %v2892_v12, 0.0  ;;  %v2895_v33 = vadd.f32 %v5423_v50, %v6010_v8  ;;  %v2886_v44 = vpop.f32.mrb[43].mxu1  ;;  %v3546_v41 = vmax.f32 %v2084_v35, 0.0  ;;  %v2087_v53 = vadd.f32 %v6010_v8, %v2086_v61 }
 0x14e   : > { %v3746_v62 = vmax.f32 %v2884_v27, 0.0  ;;  %v2887_v57 = vadd.f32 %v6010_v8, %v2886_v44  ;;  %v6375_v4 = vmax.f32 %v6279_v45, %v3548_v15  ;;  %v3549_v54 = vmax.f32 %v2095_v39, 0.0  ;;  %5329 = vmatmul.mubr.bf16.gmra.mrb[148].mxu0 %v5760_v40 }
 0x14f   : > { %v6378_v0 = vmax.f32 %v6282_v63, %v3748_v30  ;;  %v3749_v5 = vmax.f32 %v2895_v33, 0.0  ;;  %5529 = vmatmul.mubr.bf16.gmra.mrb[148].mxu1 %v5761_v32  ;;  %v6381_v59 = vmax.f32 %v6285_v47, %v3546_v41  ;;  %v3547_v20 = vmax.f32 %v2087_v53, 0.0  ;;  %5332 = vmatprep.mubr.bf16.mxu0 %v5762_v14 }
 0x150   : > { %v6384_v60 = vmax.f32 %v6288_v36, %v3746_v62  ;;  %v3747_v10 = vmax.f32 %v2887_v57, 0.0  ;;  %5532 = vmatprep.mubr.bf16.mxu1 %v5763_v37  ;;  %v6387_v45 = vmax.f32 %v6309_v17, %v3549_v54  ;;  %v5768_v54 = vld [vmem:[%s5877_s7 + $0x278] sm:$0xff]  }
 0x151   : > { %v6390_v63 = vmax.f32 %v6312_v26, %v3749_v5  ;;  %v6393_v47 = vmax.f32 %v6267_v42, %v3547_v20  ;;  %v5226_v36 = vpop.f32.mrb[44].mxu0  ;;  %v5769_v5 = vld [vmem:[%s5877_s7 + $0x598] sm:$0xff]  }
 0x152   : > { %v6396_v51 = vmax.f32 %v6270_v34, %v3747_v10  ;;  %v5426_v21 = vpop.f32.mrb[44].mxu1  ;;  %v2108_v11 = vadd.f32 %v5226_v36, %v6010_v8  ;;  %v2099_v43 = vpop.f32.mrb[45].mxu0  ;;  %v5770_v36 = vld [vmem:[%s5877_s7 + $0x280] sm:$0xff]  }
 0x153   : > { %v2908_v18 = vadd.f32 %v5426_v21, %v6010_v8  ;;  %v2899_v17 = vpop.f32.mrb[45].mxu1  ;;  %v2100_v26 = vadd.f32 %v6010_v8, %v2099_v43  ;;  %v5227_v23 = vpop.f32.mrb[46].mxu0  ;;  %v5771_v21 = vld [vmem:[%s5877_s7 + $0x5a0] sm:$0xff]  }
 0x154   : > { %v2900_v38 = vadd.f32 %v6010_v8, %v2899_v17  ;;  %v5427_v42 = vpop.f32.mrb[46].mxu1  ;;  %v3552_v34 = vmax.f32 %v2108_v11, 0.0  ;;  %v2111_v12 = vadd.f32 %v5227_v23, %v6010_v8  ;;  %v2102_v46 = vpop.f32.mrb[47].mxu0 }
 0x155   : > { %v3752_v28 = vmax.f32 %v2908_v18, 0.0  ;;  %v2911_v13 = vadd.f32 %v5427_v42, %v6010_v8  ;;  %v2902_v40 = vpop.f32.mrb[47].mxu1  ;;  %v3550_v32 = vmax.f32 %v2100_v26, 0.0  ;;  %v2103_v27 = vadd.f32 %v6010_v8, %v2102_v46 }
 0x156   : > { %v3750_v35 = vmax.f32 %v2900_v38, 0.0  ;;  %v2903_v29 = vadd.f32 %v6010_v8, %v2902_v40  ;;  %v6411_v50 = vmax.f32 %v6315_v55, %v3552_v34  ;;  %v3553_v37 = vmax.f32 %v2111_v12, 0.0  ;;  %5333 = vmatmul.mubr.bf16.gmra.mrb[152].mxu0 %v5764_v3 }
 0x157   : > { %v6414_v14 = vmax.f32 %v6318_v56, %v3752_v28  ;;  %v3753_v15 = vmax.f32 %v2911_v13, 0.0  ;;  %5533 = vmatmul.mubr.bf16.gmra.mrb[152].mxu1 %v5765_v24  ;;  %v6417_v30 = vmax.f32 %v6321_v9, %v3550_v32  ;;  %v3551_v33 = vmax.f32 %v2103_v27, 0.0  ;;  %5336 = vmatprep.mubr.bf16.mxu0 %v5766_v2 }
 0x158   : > { %v6420_v39 = vmax.f32 %v6324_v25, %v3750_v35  ;;  %v3751_v61 = vmax.f32 %v2903_v29, 0.0  ;;  %5536 = vmatprep.mubr.bf16.mxu1 %v5767_v7  ;;  %v6423_v55 = vmax.f32 %v6345_v19, %v3553_v37  ;;  %v5772_v37 = vld [vmem:[%s5877_s7 + $0x288] sm:$0xff]  }
 0x159   : > { %v6426_v56 = vmax.f32 %v6348_v1, %v3753_v15  ;;  %v6429_v9 = vmax.f32 %v6303_v31, %v3551_v33  ;;  %v5230_v25 = vpop.f32.mrb[48].mxu0  ;;  %v5773_v15 = vld [vmem:[%s5877_s7 + $0x5a8] sm:$0xff]  }
 0x15a   : > { %v6432_v44 = vmax.f32 %v6306_v16, %v3751_v61  ;;  %v5430_v41 = vpop.f32.mrb[48].mxu1  ;;  %v2124_v62 = vadd.f32 %v5230_v25, %v6010_v8  ;;  %v2115_v57 = vpop.f32.mrb[49].mxu0  ;;  %v5774_v25 = vld [vmem:[%s5877_s7 + $0x290] sm:$0xff]  }
 0x15b   : > { %v2924_v53 = vadd.f32 %v5430_v41, %v6010_v8  ;;  %v2915_v19 = vpop.f32.mrb[49].mxu1  ;;  %v2116_v1 = vadd.f32 %v6010_v8, %v2115_v57  ;;  %v5231_v10 = vpop.f32.mrb[50].mxu0  ;;  %v5775_v41 = vld [vmem:[%s5877_s7 + $0x5b0] sm:$0xff]  }
 0x15c   : > { %v2916_v20 = vadd.f32 %v6010_v8, %v2915_v19  ;;  %v5431_v31 = vpop.f32.mrb[50].mxu1  ;;  %v3556_v16 = vmax.f32 %v2124_v62, 0.0  ;;  %v2127_v18 = vadd.f32 %v5231_v10, %v6010_v8  ;;  %v2118_v17 = vpop.f32.mrb[51].mxu0 }
 0x15d   : > { %v3756_v11 = vmax.f32 %v2924_v53, 0.0  ;;  %v2927_v43 = vadd.f32 %v5431_v31, %v6010_v8  ;;  %v2918_v3 = vpop.f32.mrb[51].mxu1  ;;  %v3554_v24 = vmax.f32 %v2116_v1, 0.0  ;;  %v2119_v38 = vadd.f32 %v6010_v8, %v2118_v17 }
 0x15e   : > { %v3754_v26 = vmax.f32 %v2916_v20, 0.0  ;;  %v2919_v23 = vadd.f32 %v6010_v8, %v2918_v3  ;;  %v6447_v42 = vmax.f32 %v6351_v48, %v3556_v16  ;;  %v3557_v7 = vmax.f32 %v2127_v18, 0.0  ;;  %5337 = vmatmul.mubr.bf16.gmra.mrb[156].mxu0 %v5768_v54 }
 0x15f   : > { %v6450_v2 = vmax.f32 %v6354_v49, %v3756_v11  ;;  %v3757_v34 = vmax.f32 %v2927_v43, 0.0  ;;  %5537 = vmatmul.mubr.bf16.gmra.mrb[156].mxu1 %v5769_v5  ;;  %v6453_v28 = vmax.f32 %v6357_v52, %v3554_v24  ;;  %v3555_v13 = vmax.f32 %v2119_v38, 0.0  ;;  %5340 = vmatprep.mubr.bf16.mxu0 %v5770_v36  ;;  %v6509_v24 = vld [vmem:[%s7894_s2] ss:$0 sm:$0xff] }
 0x160   : > { %v6456_v12 = vmax.f32 %v6360_v6, %v3754_v26  ;;  %v3755_v46 = vmax.f32 %v2919_v23, 0.0  ;;  %5540 = vmatprep.mubr.bf16.mxu1 %v5771_v21  ;;  %v6459_v48 = vmax.f32 %v6381_v59, %v3557_v7  ;;  %v5776_v23 = vld [vmem:[%s5877_s7 + $0x298] sm:$0xff]  }
 0x161   : > { %v6462_v49 = vmax.f32 %v6384_v60, %v3757_v34  ;;  %v6465_v52 = vmax.f32 %v6339_v22, %v3555_v13  ;;  %v5234_v6 = vpop.f32.mrb[52].mxu0 }
 0x162   : > { %v6468_v40 = vmax.f32 %v6342_v58, %v3755_v46  ;;  %v5434_v32 = vpop.f32.mrb[52].mxu1  ;;  %v2140_v35 = vadd.f32 %v5234_v6, %v6010_v8  ;;  %v2131_v29 = vpop.f32.mrb[53].mxu0  ;;  %v5778_v46 = vld [vmem:[%s5877_s7 + $0x2a0] sm:$0xff]  }
 0x163   : > { %v2940_v27 = vadd.f32 %v5434_v32, %v6010_v8  ;;  %v2931_v59 = vpop.f32.mrb[53].mxu1  ;;  %v2132_v60 = vadd.f32 %v6010_v8, %v2131_v29  ;;  %v5235_v61 = vpop.f32.mrb[54].mxu0  ;;  %v5779_v6 = vld [vmem:[%s5877_s7 + $0x5c0] sm:$0xff]  }
 0x164   : > { %v2932_v33 = vadd.f32 %v6010_v8, %v2931_v59  ;;  %v5435_v22 = vpop.f32.mrb[54].mxu1  ;;  %v3560_v58 = vmax.f32 %v2140_v35, 0.0  ;;  %v2143_v53 = vadd.f32 %v5235_v61, %v6010_v8  ;;  %v2134_v19 = vpop.f32.mrb[55].mxu0 }
 0x165   : > { %v3760_v62 = vmax.f32 %v2940_v27, 0.0  ;;  %v2943_v57 = vadd.f32 %v5435_v22, %v6010_v8  ;;  %v2934_v54 = vpop.f32.mrb[55].mxu1  ;;  %v3558_v5 = vmax.f32 %v2132_v60, 0.0  ;;  %v2135_v20 = vadd.f32 %v6010_v8, %v2134_v19 }
 0x166   : > { %v3758_v1 = vmax.f32 %v2932_v33, 0.0  ;;  %v2935_v10 = vadd.f32 %v6010_v8, %v2934_v54  ;;  %v6483_v31 = vmax.f32 %v6387_v45, %v3560_v58  ;;  %v3561_v21 = vmax.f32 %v2143_v53, 0.0  ;;  %5341 = vmatmul.mubr.bf16.gmra.mrb[160].mxu0 %v5772_v37 }
 0x167   : > { %v6486_v36 = vmax.f32 %v6390_v63, %v3760_v62  ;;  %v3761_v16 = vmax.f32 %v2943_v57, 0.0  ;;  %5541 = vmatmul.mubr.bf16.gmra.mrb[160].mxu1 %v5773_v15  ;;  %v6489_v11 = vmax.f32 %v6393_v47, %v3558_v5  ;;  %v3559_v43 = vmax.f32 %v2135_v20, 0.0  ;;  %5344 = vmatprep.mubr.bf16.mxu0 %v5774_v25 }
 0x168   : > { %v6492_v18 = vmax.f32 %v6396_v51, %v3758_v1  ;;  %v3759_v8 = vmax.f32 %v2935_v10, 0.0  ;;  %5544 = vmatprep.mubr.bf16.mxu1 %v5775_v41  ;;  %v6495_v45 = vmax.f32 %v6417_v30, %v3561_v21  ;;  %v5780_v21 = vld [vmem:[%s5877_s7 + $0x2a8] sm:$0xff]  }
 0x169   : > { %v6498_v63 = vmax.f32 %v6420_v39, %v3761_v16  ;;  %v6501_v17 = vmax.f32 %v6375_v4, %v3559_v43  ;;  %v5238_v51 = vpop.f32.mrb[56].mxu0  ;;  %v5777_v4 = vld [vmem:[%s5877_s7 + $0x5b8] sm:$0xff]   ;;  %v5781_v16 = vld [vmem:[%s5877_s7 + $0x5c8] sm:$0xff]  }
 0x16a   : > { %v6504_v47 = vmax.f32 %v6378_v0, %v3759_v8  ;;  %v5438_v3 = vpop.f32.mrb[56].mxu1  ;;  %v2156_v30 = vadd.f32 %v6509_v24, %v5238_v51  ;;  %v2147_v26 = vpop.f32.mrb[57].mxu0  ;;  %v5782_v51 = vld [vmem:[%s5877_s7 + $0x2b0] sm:$0xff]  }
 0x16b   : > { %v2956_v39 = vadd.f32 %v6509_v24, %v5438_v3  ;;  %v2947_v38 = vpop.f32.mrb[57].mxu1  ;;  %v2148_v7 = vadd.f32 %v6509_v24, %v2147_v26  ;;  %v5239_v34 = vpop.f32.mrb[58].mxu0  ;;  %v5783_v3 = vld [vmem:[%s5877_s7 + $0x5d0] sm:$0xff]  }
 0x16c   : > { %v2948_v0 = vadd.f32 %v6509_v24, %v2947_v38  ;;  %v5439_v13 = vpop.f32.mrb[58].mxu1  ;;  %v3564_v32 = vmax.f32 %v2156_v30, 0.0  ;;  %v2159_v27 = vadd.f32 %v6509_v24, %v5239_v34  ;;  %v2150_v59 = vpop.f32.mrb[59].mxu0 }
 0x16d   : > { %v3764_v35 = vmax.f32 %v2956_v39, 0.0  ;;  %v2959_v29 = vadd.f32 %v6509_v24, %v5439_v13  ;;  %v2950_v37 = vpop.f32.mrb[59].mxu1  ;;  %v3562_v15 = vmax.f32 %v2148_v7, 0.0  ;;  %v2151_v33 = vadd.f32 %v6509_v24, %v2150_v59 }
 0x16e   : > { %v3762_v60 = vmax.f32 %v2948_v0, 0.0  ;;  %v2951_v61 = vadd.f32 %v6509_v24, %v2950_v37  ;;  %v6524_v22 = vmax.f32 %v6423_v55, %v3564_v32  ;;  %v3565_v41 = vmax.f32 %v2159_v27, 0.0  ;;  %5345 = vmatmul.mubr.bf16.gmra.mrb[164].mxu0 %v5776_v23 }
 0x16f   : > { %v6527_v25 = vmax.f32 %v6426_v56, %v3764_v35  ;;  %v3765_v58 = vmax.f32 %v2959_v29, 0.0  ;;  %5545 = vmatmul.mubr.bf16.gmra.mrb[164].mxu1 %v5777_v4  ;;  %v6530_v62 = vmax.f32 %v6429_v9, %v3562_v15  ;;  %v3563_v57 = vmax.f32 %v2151_v33, 0.0  ;;  %5348 = vmatprep.mubr.bf16.mxu0 %v5778_v46 }
 0x170   : > { %v6533_v53 = vmax.f32 %v6432_v44, %v3762_v60  ;;  %v3763_v19 = vmax.f32 %v2951_v61, 0.0  ;;  %5548 = vmatprep.mubr.bf16.mxu1 %v5779_v6  ;;  %v6536_v55 = vmax.f32 %v6453_v28, %v3565_v41  ;;  %v5784_v41 = vld [vmem:[%s5877_s7 + $0x2b8] sm:$0xff]  }
 0x171   : > { %v6539_v56 = vmax.f32 %v6456_v12, %v3765_v58  ;;  %v6542_v9 = vmax.f32 %v6411_v50, %v3563_v57  ;;  %v5242_v44 = vpop.f32.mrb[60].mxu0  ;;  %v5785_v58 = vld [vmem:[%s5877_s7 + $0x5d8] sm:$0xff]  }
 0x172   : > { %v6545_v54 = vmax.f32 %v6414_v14, %v3763_v19  ;;  %v5442_v5 = vpop.f32.mrb[60].mxu1  ;;  %v2172_v1 = vadd.f32 %v6509_v24, %v5242_v44  ;;  %v2163_v10 = vpop.f32.mrb[61].mxu0  ;;  %v5786_v44 = vld [vmem:[%s5877_s7 + $0x2c0] sm:$0xff]  }
 0x173   : > { %v2972_v20 = vadd.f32 %v6509_v24, %v5442_v5  ;;  %v2963_v28 = vpop.f32.mrb[61].mxu1  ;;  %v2164_v12 = vadd.f32 %v6509_v24, %v2163_v10  ;;  %v5243_v8 = vpop.f32.mrb[62].mxu0  ;;  %v5787_v5 = vld [vmem:[%s5877_s7 + $0x5e0] sm:$0xff]  }
 0x174   : > { %v2964_v43 = vadd.f32 %v6509_v24, %v2963_v28  ;;  %v5443_v50 = vpop.f32.mrb[62].mxu1  ;;  %v3568_v14 = vmax.f32 %v2172_v1, 0.0  ;;  %v2175_v39 = vadd.f32 %v6509_v24, %v5243_v8  ;;  %v2166_v38 = vpop.f32.mrb[63].mxu0 }
 0x175   : > { %v3768_v30 = vmax.f32 %v2972_v20, 0.0  ;;  %v2975_v26 = vadd.f32 %v6509_v24, %v5443_v50  ;;  %v2966_v23 = vpop.f32.mrb[63].mxu1  ;;  %v3566_v4 = vmax.f32 %v2164_v12, 0.0  ;;  %v2167_v0 = vadd.f32 %v6509_v24, %v2166_v38 }
 0x176   : > { %v3766_v7 = vmax.f32 %v2964_v43, 0.0  ;;  %v2967_v34 = vadd.f32 %v6509_v24, %v2966_v23  ;;  %v6560_v13 = vmax.f32 %v6459_v48, %v3568_v14  ;;  %v3569_v6 = vmax.f32 %v2175_v39, 0.0  ;;  %5349 = vmatmul.mubr.bf16.gmra.mrb[168].mxu0 %v5780_v21 }
 0x177   : > { %v6563_v46 = vmax.f32 %v6462_v49, %v3768_v30  ;;  %v3769_v32 = vmax.f32 %v2975_v26, 0.0  ;;  %5549 = vmatmul.mubr.bf16.gmra.mrb[168].mxu1 %v5781_v16  ;;  %v6566_v35 = vmax.f32 %v6465_v52, %v3566_v4  ;;  %v3567_v29 = vmax.f32 %v2167_v0, 0.0  ;;  %5352 = vmatprep.mubr.bf16.mxu0 %v5782_v51 }
 0x178   : > { %v6569_v27 = vmax.f32 %v6468_v40, %v3766_v7  ;;  %v3767_v59 = vmax.f32 %v2967_v34, 0.0  ;;  %5552 = vmatprep.mubr.bf16.mxu1 %v5783_v3  ;;  %v6572_v48 = vmax.f32 %v6489_v11, %v3569_v6  ;;  %v5788_v6 = vld [vmem:[%s5877_s7 + $0x2c8] sm:$0xff]  }
 0x179   : > { %v6575_v49 = vmax.f32 %v6492_v18, %v3769_v32  ;;  %v6578_v52 = vmax.f32 %v6447_v42, %v3567_v29  ;;  %v5246_v40 = vpop.f32.mrb[64].mxu0  ;;  %v5789_v32 = vld [vmem:[%s5877_s7 + $0x5e8] sm:$0xff]  }
 0x17a   : > { %v6581_v37 = vmax.f32 %v6450_v2, %v3767_v59  ;;  %v5446_v15 = vpop.f32.mrb[64].mxu1  ;;  %v2188_v60 = vadd.f32 %v6509_v24, %v5246_v40  ;;  %v2179_v61 = vpop.f32.mrb[65].mxu0  ;;  %v5790_v40 = vld [vmem:[%s5877_s7 + $0x2d0] sm:$0xff]  }
 0x17b   : > { %v2988_v33 = vadd.f32 %v6509_v24, %v5446_v15  ;;  %v2979_v11 = vpop.f32.mrb[65].mxu1  ;;  %v2180_v18 = vadd.f32 %v6509_v24, %v2179_v61  ;;  %v5247_v19 = vpop.f32.mrb[66].mxu0  ;;  %v5791_v15 = vld [vmem:[%s5877_s7 + $0x5f0] sm:$0xff]  }
 0x17c   : > { %v2980_v57 = vadd.f32 %v6509_v24, %v2979_v11  ;;  %v5447_v42 = vpop.f32.mrb[66].mxu1  ;;  %v3572_v2 = vmax.f32 %v2188_v60, 0.0  ;;  %v2191_v20 = vadd.f32 %v6509_v24, %v5247_v19  ;;  %v2182_v28 = vpop.f32.mrb[67].mxu0 }
 0x17d   : > { %v3772_v1 = vmax.f32 %v2988_v33, 0.0  ;;  %v2991_v10 = vadd.f32 %v6509_v24, %v5447_v42  ;;  %v2982_v21 = vpop.f32.mrb[67].mxu1  ;;  %v3570_v16 = vmax.f32 %v2180_v18, 0.0  ;;  %v2183_v43 = vadd.f32 %v6509_v24, %v2182_v28 }
 0x17e   : > { %v3770_v12 = vmax.f32 %v2980_v57, 0.0  ;;  %v2983_v8 = vadd.f32 %v6509_v24, %v2982_v21  ;;  %v6596_v50 = vmax.f32 %v6495_v45, %v3572_v2  ;;  %v3573_v3 = vmax.f32 %v2191_v20, 0.0  ;;  %5353 = vmatmul.mubr.bf16.gmra.mrb[172].mxu0 %v5784_v41 }
 0x17f   : > { %v6599_v51 = vmax.f32 %v6498_v63, %v3772_v1  ;;  %v3773_v14 = vmax.f32 %v2991_v10, 0.0  ;;  %5553 = vmatmul.mubr.bf16.gmra.mrb[172].mxu1 %v5785_v58  ;;  %v6602_v30 = vmax.f32 %v6501_v17, %v3570_v16  ;;  %v3571_v26 = vmax.f32 %v2183_v43, 0.0  ;;  %5356 = vmatprep.mubr.bf16.mxu0 %v5786_v44 }
 0x180   : > { %v6605_v39 = vmax.f32 %v6504_v47, %v3770_v12  ;;  %v3771_v38 = vmax.f32 %v2983_v8, 0.0  ;;  %5556 = vmatprep.mubr.bf16.mxu1 %v5787_v5  ;;  %v6608_v45 = vmax.f32 %v6530_v62, %v3573_v3  ;;  %v5792_v3 = vld [vmem:[%s5877_s7 + $0x2d8] sm:$0xff]  }
 0x181   : > { %v6611_v63 = vmax.f32 %v6533_v53, %v3773_v14  ;;  %v6614_v17 = vmax.f32 %v6483_v31, %v3571_v26  ;;  %v5250_v47 = vpop.f32.mrb[68].mxu0  ;;  %v5793_v14 = vld [vmem:[%s5877_s7 + $0x5f8] sm:$0xff]  }
 0x182   : > { %v6617_v23 = vmax.f32 %v6486_v36, %v3771_v38  ;;  %v5450_v4 = vpop.f32.mrb[68].mxu1  ;;  %v2204_v7 = vadd.f32 %v6509_v24, %v5250_v47  ;;  %v2195_v34 = vpop.f32.mrb[69].mxu0  ;;  %v5794_v47 = vld [vmem:[%s5877_s7 + $0x2e0] sm:$0xff]  }
 0x183   : > { %v3004_v0 = vadd.f32 %v6509_v24, %v5450_v4  ;;  %v2995_v62 = vpop.f32.mrb[69].mxu1  ;;  %v2196_v53 = vadd.f32 %v6509_v24, %v2195_v34  ;;  %v5251_v59 = vpop.f32.mrb[70].mxu0  ;;  %v5795_v4 = vld [vmem:[%s5877_s7 + $0x600] sm:$0xff]  }
 0x184   : > { %v2996_v29 = vadd.f32 %v6509_v24, %v2995_v62  ;;  %v5451_v31 = vpop.f32.mrb[70].mxu1  ;;  %v3576_v36 = vmax.f32 %v2204_v7, 0.0  ;;  %v2207_v33 = vadd.f32 %v6509_v24, %v5251_v59  ;;  %v2198_v11 = vpop.f32.mrb[71].mxu0 }
 0x185   : > { %v3776_v60 = vmax.f32 %v3004_v0, 0.0  ;;  %v3007_v61 = vadd.f32 %v6509_v24, %v5451_v31  ;;  %v2998_v41 = vpop.f32.mrb[71].mxu1  ;;  %v3574_v58 = vmax.f32 %v2196_v53, 0.0  ;;  %v2199_v57 = vadd.f32 %v6509_v24, %v2198_v11 }
 0x186   : > { %v3774_v18 = vmax.f32 %v2996_v29, 0.0  ;;  %v2999_v19 = vadd.f32 %v6509_v24, %v2998_v41  ;;  %v6632_v42 = vmax.f32 %v6536_v55, %v3576_v36  ;;  %v3577_v5 = vmax.f32 %v2207_v33, 0.0  ;;  %5357 = vmatmul.mubr.bf16.gmra.mrb[176].mxu0 %v5788_v6 }
 0x187   : > { %v6635_v44 = vmax.f32 %v6539_v56, %v3776_v60  ;;  %v3777_v2 = vmax.f32 %v3007_v61, 0.0  ;;  %5557 = vmatmul.mubr.bf16.gmra.mrb[176].mxu1 %v5789_v32  ;;  %v6638_v1 = vmax.f32 %v6542_v9, %v3574_v58  ;;  %v3575_v10 = vmax.f32 %v2199_v57, 0.0  ;;  %5360 = vmatprep.mubr.bf16.mxu0 %v5790_v40 }
 0x188   : > { %v6641_v20 = vmax.f32 %v6545_v54, %v3774_v18  ;;  %v3775_v28 = vmax.f32 %v2999_v19, 0.0  ;;  %5560 = vmatprep.mubr.bf16.mxu1 %v5791_v15  ;;  %v6644_v55 = vmax.f32 %v6566_v35, %v3577_v5  ;;  %v5796_v5 = vld [vmem:[%s5877_s7 + $0x2e8] sm:$0xff]  }
 0x189   : > { %v6647_v56 = vmax.f32 %v6569_v27, %v3777_v2  ;;  %v6650_v9 = vmax.f32 %v6524_v22, %v3575_v10  ;;  %v5254_v54 = vpop.f32.mrb[72].mxu0  ;;  %v5797_v2 = vld [vmem:[%s5877_s7 + $0x608] sm:$0xff]  }
 0x18a   : > { %v6653_v21 = vmax.f32 %v6527_v25, %v3775_v28  ;;  %v5454_v16 = vpop.f32.mrb[72].mxu1  ;;  %v2220_v12 = vadd.f32 %v6509_v24, %v5254_v54  ;;  %v2211_v8 = vpop.f32.mrb[73].mxu0  ;;  %v5798_v54 = vld [vmem:[%s5877_s7 + $0x2f0] sm:$0xff]  }
 0x18b   : > { %v3020_v43 = vadd.f32 %v6509_v24, %v5454_v16  ;;  %v3011_v35 = vpop.f32.mrb[73].mxu1  ;;  %v2212_v27 = vadd.f32 %v6509_v24, %v2211_v8  ;;  %v5255_v38 = vpop.f32.mrb[74].mxu0  ;;  %v5799_v16 = vld [vmem:[%s5877_s7 + $0x610] sm:$0xff]  }
 0x18c   : > { %v3012_v26 = vadd.f32 %v6509_v24, %v3011_v35  ;;  %v5455_v22 = vpop.f32.mrb[74].mxu1  ;;  %v3580_v25 = vmax.f32 %v2220_v12, 0.0  ;;  %v2223_v0 = vadd.f32 %v6509_v24, %v5255_v38  ;;  %v2214_v62 = vpop.f32.mrb[75].mxu0 }
 0x18d   : > { %v3780_v7 = vmax.f32 %v3020_v43, 0.0  ;;  %v3023_v34 = vadd.f32 %v6509_v24, %v5455_v22  ;;  %v3014_v6 = vpop.f32.mrb[75].mxu1  ;;  %v3578_v32 = vmax.f32 %v2212_v27, 0.0  ;;  %v2215_v29 = vadd.f32 %v6509_v24, %v2214_v62 }
 0x18e   : > { %v3778_v53 = vmax.f32 %v3012_v26, 0.0  ;;  %v3015_v59 = vadd.f32 %v6509_v24, %v3014_v6  ;;  %v6668_v31 = vmax.f32 %v6572_v48, %v3580_v25  ;;  %v3581_v15 = vmax.f32 %v2223_v0, 0.0  ;;  %5361 = vmatmul.mubr.bf16.gmra.mrb[180].mxu0 %v5792_v3 }
 0x18f   : > { %v6671_v40 = vmax.f32 %v6575_v49, %v3780_v7  ;;  %v3781_v36 = vmax.f32 %v3023_v34, 0.0  ;;  %5561 = vmatmul.mubr.bf16.gmra.mrb[180].mxu1 %v5793_v14  ;;  %v6674_v60 = vmax.f32 %v6578_v52, %v3578_v32  ;;  %v3579_v61 = vmax.f32 %v2215_v29, 0.0  ;;  %5364 = vmatprep.mubr.bf16.mxu0 %v5794_v47 }
 0x190   : > { %v6677_v33 = vmax.f32 %v6581_v37, %v3778_v53  ;;  %v3779_v11 = vmax.f32 %v3015_v59, 0.0  ;;  %5564 = vmatprep.mubr.bf16.mxu1 %v5795_v4  ;;  %v6680_v48 = vmax.f32 %v6602_v30, %v3581_v15  ;;  %v5800_v15 = vld [vmem:[%s5877_s7 + $0x2f8] sm:$0xff]  }
 0x191   : > { %v6683_v49 = vmax.f32 %v6605_v39, %v3781_v36  ;;  %v6686_v52 = vmax.f32 %v6560_v13, %v3579_v61  ;;  %v5258_v37 = vpop.f32.mrb[76].mxu0  ;;  %v5801_v36 = vld [vmem:[%s5877_s7 + $0x618] sm:$0xff]  }
 0x192   : > { %v6689_v41 = vmax.f32 %v6563_v46, %v3779_v11  ;;  %v5458_v58 = vpop.f32.mrb[76].mxu1  ;;  %v2236_v18 = vadd.f32 %v6509_v24, %v5258_v37  ;;  %v2227_v19 = vpop.f32.mrb[77].mxu0  ;;  %v5802_v37 = vld [vmem:[%s5877_s7 + $0x300] sm:$0xff]  }
 0x193   : > { %v3036_v57 = vadd.f32 %v6509_v24, %v5458_v58  ;;  %v3027_v30 = vpop.f32.mrb[77].mxu1  ;;  %v2228_v39 = vadd.f32 %v6509_v24, %v2227_v19  ;;  %v5259_v28 = vpop.f32.mrb[78].mxu0  ;;  %v5803_v58 = vld [vmem:[%s5877_s7 + $0x620] sm:$0xff]  }
 0x194   : > { %v3028_v10 = vadd.f32 %v6509_v24, %v3027_v30  ;;  %v5459_v13 = vpop.f32.mrb[78].mxu1  ;;  %v3584_v46 = vmax.f32 %v2236_v18, 0.0  ;;  %v2239_v43 = vadd.f32 %v6509_v24, %v5259_v28  ;;  %v2230_v35 = vpop.f32.mrb[79].mxu0 }
 0x195   : > { %v3784_v12 = vmax.f32 %v3036_v57, 0.0  ;;  %v3039_v8 = vadd.f32 %v6509_v24, %v5459_v13  ;;  %v3030_v3 = vpop.f32.mrb[79].mxu1  ;;  %v3582_v14 = vmax.f32 %v2228_v39, 0.0  ;;  %v2231_v26 = vadd.f32 %v6509_v24, %v2230_v35 }
 0x196   : > { %v3782_v27 = vmax.f32 %v3028_v10, 0.0  ;;  %v3031_v38 = vadd.f32 %v6509_v24, %v3030_v3  ;;  %v6704_v22 = vmax.f32 %v6608_v45, %v3584_v46  ;;  %v3585_v4 = vmax.f32 %v2239_v43, 0.0  ;;  %5365 = vmatmul.mubr.bf16.gmra.mrb[184].mxu0 %v5796_v5 }
 0x197   : > { %v6707_v47 = vmax.f32 %v6611_v63, %v3784_v12  ;;  %v3785_v25 = vmax.f32 %v3039_v8, 0.0  ;;  %5565 = vmatmul.mubr.bf16.gmra.mrb[184].mxu1 %v5797_v2  ;;  %v6710_v7 = vmax.f32 %v6614_v17, %v3582_v14  ;;  %v3583_v34 = vmax.f32 %v2231_v26, 0.0  ;;  %5368 = vmatprep.mubr.bf16.mxu0 %v5798_v54 }
 0x198   : > { %v6713_v0 = vmax.f32 %v6617_v23, %v3782_v27  ;;  %v3783_v62 = vmax.f32 %v3031_v38, 0.0  ;;  %5568 = vmatprep.mubr.bf16.mxu1 %v5799_v16  ;;  %v6716_v45 = vmax.f32 %v6638_v1, %v3585_v4 }
 0x199   : > { %v6719_v63 = vmax.f32 %v6641_v20, %v3785_v25  ;;  %v6722_v17 = vmax.f32 %v6596_v50, %v3583_v34  ;;  %v5262_v23 = vpop.f32.mrb[80].mxu0  ;;  %v5805_v25 = vld [vmem:[%s5877_s7 + $0x628] sm:$0xff]  }
 0x19a   : > { %v6725_v6 = vmax.f32 %v6599_v51, %v3783_v62  ;;  %v5462_v32 = vpop.f32.mrb[80].mxu1  ;;  %v2252_v53 = vadd.f32 %v6509_v24, %v5262_v23  ;;  %v2243_v59 = vpop.f32.mrb[81].mxu0  ;;  %v5806_v23 = vld [vmem:[%s5877_s7 + $0x310] sm:$0xff]  }
 0x19b   : > { %v3052_v29 = vadd.f32 %v6509_v24, %v5462_v32  ;;  %v3043_v1 = vpop.f32.mrb[81].mxu1  ;;  %v2244_v20 = vadd.f32 %v6509_v24, %v2243_v59  ;;  %v5263_v11 = vpop.f32.mrb[82].mxu0 }
 0x19c   : > { %v3044_v61 = vadd.f32 %v6509_v24, %v3043_v1  ;;  %v5463_v50 = vpop.f32.mrb[82].mxu1  ;;  %v3588_v51 = vmax.f32 %v2252_v53, 0.0  ;;  %v2255_v57 = vadd.f32 %v6509_v24, %v5263_v11  ;;  %v2246_v30 = vpop.f32.mrb[83].mxu0 }
 0x19d   : > { %v3788_v18 = vmax.f32 %v3052_v29, 0.0  ;;  %v3055_v19 = vadd.f32 %v6509_v24, %v5463_v50  ;;  %v3046_v5 = vpop.f32.mrb[83].mxu1  ;;  %v3586_v2 = vmax.f32 %v2244_v20, 0.0  ;;  %v2247_v10 = vadd.f32 %v6509_v24, %v2246_v30 }
 0x19e   : > { %v3786_v39 = vmax.f32 %v3044_v61, 0.0  ;;  %v3047_v28 = vadd.f32 %v6509_v24, %v3046_v5  ;;  %v6740_v13 = vmax.f32 %v6644_v55, %v3588_v51  ;;  %v3589_v16 = vmax.f32 %v2255_v57, 0.0  ;;  %5369 = vmatmul.mubr.bf16.gmra.mrb[188].mxu0 %v5800_v15 }
 0x19f   : > { %v6743_v54 = vmax.f32 %v6647_v56, %v3788_v18  ;;  %v3789_v46 = vmax.f32 %v3055_v19, 0.0  ;;  %5569 = vmatmul.mubr.bf16.gmra.mrb[188].mxu1 %v5801_v36  ;;  %v6746_v12 = vmax.f32 %v6650_v9, %v3586_v2  ;;  %v3587_v8 = vmax.f32 %v2247_v10, 0.0  ;;  %5372 = vmatprep.mubr.bf16.mxu0 %v5802_v37 }
 0x1a0   : > { %v6749_v43 = vmax.f32 %v6653_v21, %v3786_v39  ;;  %v3787_v35 = vmax.f32 %v3047_v28, 0.0  ;;  %5572 = vmatprep.mubr.bf16.mxu1 %v5803_v58  ;;  %v6752_v55 = vmax.f32 %v6674_v60, %v3589_v16  ;;  %v5804_v60 = vld [vmem:[%s5877_s7 + $0x308] sm:$0xff]   ;;  %v5807_v16 = vld [vmem:[%s5877_s7 + $0x318] sm:$0xff]  }
 0x1a1   : > { %v6755_v56 = vmax.f32 %v6677_v33, %v3789_v46  ;;  %v6758_v3 = vmax.f32 %v6632_v42, %v3587_v8  ;;  %v5266_v21 = vpop.f32.mrb[84].mxu0 }
 0x1a2   : > { %v6761_v9 = vmax.f32 %v6635_v44, %v3787_v35  ;;  %v5466_v14 = vpop.f32.mrb[84].mxu1  ;;  %v2268_v27 = vadd.f32 %v6509_v24, %v5266_v21  ;;  %v2259_v38 = vpop.f32.mrb[85].mxu0 }
 0x1a3   : > { %v3068_v26 = vadd.f32 %v6509_v24, %v5466_v14  ;;  %v3059_v4 = vpop.f32.mrb[85].mxu1  ;;  %v2260_v34 = vadd.f32 %v6509_v24, %v2259_v38  ;;  %v5267_v62 = vpop.f32.mrb[86].mxu0 }
 0x1a4   : > { %v3060_v33 = vadd.f32 %v6509_v24, %v3059_v4  ;;  %v5467_v42 = vpop.f32.mrb[86].mxu1  ;;  %v3592_v32 = vmax.f32 %v2268_v27, 0.0  ;;  %v2271_v53 = vadd.f32 %v6509_v24, %v5267_v62  ;;  %v2262_v59 = vpop.f32.mrb[87].mxu0 }
 0x1a5   : > { %v3792_v44 = vmax.f32 %v3068_v26, 0.0  ;;  %v3071_v29 = vadd.f32 %v6509_v24, %v5467_v42  ;;  %v3062_v1 = vpop.f32.mrb[87].mxu1  ;;  %v3590_v15 = vmax.f32 %v2260_v34, 0.0  ;;  %v2263_v20 = vadd.f32 %v6509_v24, %v2262_v59  ;;  %v6808_v26 = vld [vmem:[%s7895_s3] ss:$0 sm:$0xff] }
 0x1a6   : > { %v3790_v36 = vmax.f32 %v3060_v33, 0.0  ;;  %v3063_v61 = vadd.f32 %v6509_v24, %v3062_v1  ;;  %v6775_v11 = vmax.f32 %v6680_v48, %v3592_v32  ;;  %v3593_v37 = vmax.f32 %v2271_v53, 0.0  ;;  %5373 = vmatmul.mubr.bf16.gmra.mrb[192].mxu0 %v5804_v60 }
 0x1a7   : > { %v6778_v50 = vmax.f32 %v6683_v49, %v3792_v44  ;;  %v3793_v58 = vmax.f32 %v3071_v29, 0.0  ;;  %5573 = vmatmul.mubr.bf16.gmra.mrb[192].mxu1 %v5805_v25  ;;  %v6781_v51 = vmax.f32 %v6686_v52, %v3590_v15  ;;  %v3591_v57 = vmax.f32 %v2263_v20, 0.0  ;;  %5376 = vmatprep.mubr.bf16.mxu0 %v5806_v23  ;;  %v6820_v23 = vld [vmem:[%s7896_s4] ss:$0 sm:$0xff] }
 0x1a8   : > { %v6784_v18 = vmax.f32 %v6689_v41, %v3790_v36  ;;  %v3791_v19 = vmax.f32 %v3063_v61, 0.0  ;;  %v6787_v48 = vmax.f32 %v6710_v7, %v3593_v37 }
 0x1a9   : > { %v6790_v49 = vmax.f32 %v6713_v0, %v3793_v58  ;;  %v6793_v30 = vmax.f32 %v6668_v31, %v3591_v57  ;;  %v5270_v52 = vpop.f32.mrb[88].mxu0 }
 0x1aa   : > { %v6796_v5 = vmax.f32 %v6671_v40, %v3791_v19  ;;  %v5470_v2 = vpop.f32.mrb[88].mxu1  ;;  %v2284_v41 = vadd.f32 %v6509_v24, %v5270_v52  ;;  %v2275_v10 = vpop.f32.mrb[89].mxu0 }
 0x1ab   : > { %v3084_v39 = vadd.f32 %v6509_v24, %v5470_v2  ;;  %v3075_v28 = vpop.f32.mrb[89].mxu1  ;;  %v2276_v7 = vadd.f32 %v6509_v24, %v2275_v10  ;;  %v5271_v46 = vpop.f32.mrb[90].mxu0 }
 0x1ac   : > { %v3076_v0 = vadd.f32 %v6509_v24, %v3075_v28  ;;  %v5471_v8 = vpop.f32.mrb[90].mxu1  ;;  %v3596_v31 = vmax.f32 %v2284_v41, 0.0  ;;  %v2287_v40 = vadd.f32 %v6509_v24, %v5271_v46  ;;  %v2278_v14 = vpop.f32.mrb[91].mxu0 }
 0x1ad   : > { %v3796_v35 = vmax.f32 %v3084_v39, 0.0  ;;  %v3087_v21 = vadd.f32 %v6509_v24, %v5471_v8  ;;  %v3078_v27 = vpop.f32.mrb[91].mxu1  ;;  %v3594_v38 = vmax.f32 %v2276_v7, 0.0  ;;  %v2279_v60 = vadd.f32 %v6509_v24, %v2278_v14 }
 0x1ae   : > { %v3794_v4 = vmax.f32 %v3076_v0, 0.0  ;;  %v3079_v25 = vadd.f32 %v6509_v24, %v3078_v27  ;;  %v4212_v34 = vmax.f32 %v6716_v45, %v3596_v31  ;;  %v3597_v62 = vmax.f32 %v2287_v40, 0.0  ;;  %5377 = vmatmul.mubr.bf16.gmra.mrb[196].mxu0 %v5807_v16 }
 0x1af   : > { %v6814_v33 = vmax.f32 %v6719_v63, %v3796_v35  ;;  %v3797_v42 = vmax.f32 %v3087_v21, 0.0  ;;  %v4210_v32 = vmax.f32 %v6722_v17, %v3594_v38  ;;  %v3595_v53 = vmax.f32 %v2279_v60, 0.0 }
 0x1b0   : > { %v6824_v44 = vmax.f32 %v6725_v6, %v3794_v4  ;;  %v3795_v29 = vmax.f32 %v3079_v25, 0.0  ;;  %v4263_v45 = vmul.f32 %v6808_v26, %v4212_v34  ;;  %v4213_v63 = vmax.f32 %v6746_v12, %v3597_v62 }
 0x1b1   : > { %v6829_v59 = vmax.f32 %v6749_v43, %v3797_v42  ;;  %v4261_v1 = vmul.f32 %v6808_v26, %v4210_v32  ;;  %v4211_v15 = vmax.f32 %v6704_v22, %v3595_v53  ;;  %v5274_v17 = vpop.f32.mrb[92].mxu0 }
 0x1b2   : > { %v6834_v36 = vmax.f32 %v6707_v47, %v3795_v29  ;;  %v5474_v20 = vpop.f32.mrb[92].mxu1  ;;  %v4314_v6 = vadd.f32 %v6820_v23, %v4263_v45  ;;  %v4264_v61 = vmul.f32 %v6808_v26, %v4213_v63  ;;  %v2291_v37 = vpop.f32.mrb[93].mxu0  ;;  %v2300_v28 = vadd.f32 %v6509_v24, %v5274_v17 }
 0x1b3   : > { %v3091_v58 = vpop.f32.mrb[93].mxu1  ;;  %v4312_v22 = vadd.f32 %v6820_v23, %v4261_v1  ;;  %v4262_v47 = vmul.f32 %v6808_v26, %v4211_v15  ;;  %v5275_v12 = vpop.f32.mrb[94].mxu0  ;;  %v3100_v16 = vadd.f32 %v6509_v24, %v5474_v20  ;;  %v2292_v0 = vadd.f32 %v6509_v24, %v2291_v37 }
 0x1b4   : > { %v5475_v43 = vpop.f32.mrb[94].mxu1  ;;  %v4916_v57 = vpack.c.bf16 %v4314_v6, %v4314_v6  ;;  %v4315_v19 = vadd.f32 %v6820_v23, %v4264_v61  ;;  %v2294_v52 = vpop.f32.mrb[95].mxu0  ;;  %v3092_v46 = vadd.f32 %v6509_v24, %v3091_v58  ;;  %v3600_v8 = vmax.f32 %v2300_v28, 0.0 }
 0x1b5   : > { %v3094_v2 = vpop.f32.mrb[95].mxu1  ;;  %v4914_v41 = vpack.c.bf16 %v4312_v22, %v4312_v22  ;;  %v4313_v39 = vadd.f32 %v6820_v23, %v4262_v47  ;;  %v3800_v31 = vmax.f32 %v3100_v16, 0.0  ;;  %v2303_v35 = vadd.f32 %v6509_v24, %v5275_v12 }
 0x1b6   : > { %4539 = vst.msk [vmem:[%s6841_s28 + $0x8] sm:$0xf] %vm4536_vm0, %v4916_v57  ;;  %v4917_v10 = vpack.c.bf16 %v4315_v19, %v4315_v19  ;;  %v3103_v40 = vadd.f32 %v6509_v24, %v5475_v43  ;;  %v3598_v21 = vmax.f32 %v2292_v0, 0.0  ;;  %v3798_v14 = vmax.f32 %v3092_v46, 0.0 }
 0x1b7   : > { %4537 = vst.msk [vmem:[%s6841_s28] sm:$0xf] %vm4536_vm0, %v4914_v41  ;;  %v4915_v7 = vpack.c.bf16 %v4313_v39, %v4313_v39  ;;  %v2295_v27 = vadd.f32 %v6509_v24, %v2294_v52  ;;  %v3095_v38 = vadd.f32 %v6509_v24, %v3094_v2  ;;  %v4216_v25 = vmax.f32 %v6752_v55, %v3600_v8 }
 0x1b8   : > { %4540 = vst.msk [vmem:[%s6841_s28 + $0xc] sm:$0xf] %vm4536_vm0, %v4917_v10  ;;  %v6867_v34 = vmax.f32 %v6755_v56, %v3800_v31  ;;  %v3601_v62 = vmax.f32 %v2303_v35, 0.0  ;;  %v3801_v42 = vmax.f32 %v3103_v40, 0.0  ;;  %v4214_v29 = vmax.f32 %v6758_v3, %v3598_v21 }
 0x1b9   : > { %4538 = vst.msk [vmem:[%s6841_s28 + $0x4] sm:$0xf] %vm4536_vm0, %v4915_v7  ;;  %v5278_v4 = vpop.f32.mrb[96].mxu0  ;;  %v6871_v45 = vmax.f32 %v6761_v9, %v3798_v14  ;;  %v3599_v63 = vmax.f32 %v2295_v27, 0.0  ;;  %v3799_v1 = vmax.f32 %v3095_v38, 0.0  ;;  %v4267_v20 = vmul.f32 %v6808_v26, %v4216_v25 }
 0x1ba   : > { %v6863_v60 = vpop.f32.mrb[96].mxu1  ;;  %v2307_v32 = vpop.f32.mrb[97].mxu0  ;;  %v4217_v55 = vmax.f32 %v6781_v51, %v3601_v62  ;;  %v6878_v56 = vmax.f32 %v6784_v18, %v3801_v42  ;;  %v4265_v3 = vmul.f32 %v6808_v26, %v4214_v29  ;;  %v2316_v52 = vadd.f32 %v6509_v24, %v5278_v4 }
 0x1bb   : > { %v3107_v53 = vpop.f32.mrb[97].mxu1  ;;  %v5279_v15 = vpop.f32.mrb[98].mxu0  ;;  %v4215_v9 = vmax.f32 %v6740_v13, %v3599_v63  ;;  %v6885_v37 = vmax.f32 %v6743_v54, %v3799_v1  ;;  %v4318_v58 = vadd.f32 %v6820_v23, %v4267_v20  ;;  %v2308_v10 = vadd.f32 %v6509_v24, %v2307_v32  ;;  %v4550_v63 = vld [vmem:[%s6841_s28 + $0x28] sm:$0x1] }
 0x1bc   : > { %v6873_v17 = vpop.f32.mrb[98].mxu1  ;;  %v2310_v6 = vpop.f32.mrb[99].mxu0  ;;  %v4268_v22 = vmul.f32 %v6808_v26, %v4217_v55  ;;  %v4316_v51 = vadd.f32 %v6820_v23, %v4265_v3  ;;  %v3108_v28 = vadd.f32 %v6509_v24, %v3107_v53  ;;  %v3604_v0 = vmax.f32 %v2316_v52, 0.0 }
 0x1bd   : > { %v6880_v61 = vpop.f32.mrb[99].mxu1  ;;  %v4266_v18 = vmul.f32 %v6808_v26, %v4215_v9  ;;  %v4920_v47 = vpack.c.bf16 %v4318_v58, %v4318_v58  ;;  %v2311_v46 = vadd.f32 %v6509_v24, %v2310_v6  ;;  %v3602_v35 = vmax.f32 %v2308_v10, 0.0 }
 0x1be   : > { %v4319_v12 = vadd.f32 %v6820_v23, %v4268_v22  ;;  %v4918_v43 = vpack.c.bf16 %v4316_v51, %v4316_v51  ;;  %v3802_v40 = vmax.f32 %v3108_v28, 0.0  ;;  %v4220_v21 = vmax.f32 %v6787_v48, %v3604_v0 }
 0x1bf   : > { %v4317_v57 = vadd.f32 %v6820_v23, %v4266_v18  ;;  %4543 = vst.msk [vmem:[%s6841_s28 + $0x18] sm:$0xf] %vm4536_vm0, %v4920_v47  ;;  %v3603_v14 = vmax.f32 %v2311_v46, 0.0  ;;  %v4218_v27 = vmax.f32 %v6793_v30, %v3602_v35  ;;  %v2319_v6 = vadd.f32 %v6509_v24, %v5279_v15 }
 0x1c0   : > { %v4921_v54 = vpack.c.bf16 %v4319_v12, %v4319_v12  ;;  %4541 = vst.msk [vmem:[%s6841_s28 + $0x10] sm:$0xf] %vm4536_vm0, %v4918_v43  ;;  %v6912_v38 = vmax.f32 %v6796_v5, %v3802_v40  ;;  %v4271_v4 = vmul.f32 %v6808_v26, %v4220_v21  ;;  %v3119_v12 = vadd.f32 %v6509_v24, %v6873_v17 }
 0x1c1   : > { %v5282_v13 = vpop.f32.mrb[100].mxu0  ;;  %v4919_v39 = vpack.c.bf16 %v4317_v57, %v4317_v57  ;;  %v4219_v25 = vmax.f32 %v6775_v11, %v3603_v14  ;;  %v4269_v62 = vmul.f32 %v6808_v26, %v4218_v27  ;;  %v6930_v11 = vadd.f32 %v6509_v24, %v6863_v60 }
 0x1c2   : > { %v5482_v19 = vpop.f32.mrb[100].mxu1  ;;  %v2323_v2 = vpop.f32.mrb[101].mxu0  ;;  %4544 = vst.msk [vmem:[%s6841_s28 + $0x1c] sm:$0xf] %vm4536_vm0, %v4921_v54  ;;  %v4322_v48 = vadd.f32 %v6820_v23, %v4271_v4  ;;  %v6938_v9 = vadd.f32 %v6509_v24, %v5282_v13  ;;  %v3111_v43 = vadd.f32 %v6509_v24, %v6880_v61  ;;  %v3605_v52 = vmax.f32 %v2319_v6, 0.0 }
 0x1c3   : > { %v3123_v41 = vpop.f32.mrb[101].mxu1  ;;  %v5283_v16 = vpop.f32.mrb[102].mxu0  ;;  %4542 = vst.msk [vmem:[%s6841_s28 + $0x14] sm:$0xf] %vm4536_vm0, %v4919_v39  ;;  %v4270_v53 = vmul.f32 %v6808_v26, %v4219_v25  ;;  %v4320_v1 = vadd.f32 %v6820_v23, %v4269_v62  ;;  %v2324_v51 = vadd.f32 %v6509_v24, %v2323_v2  ;;  %v6959_v57 = vadd.f32 %v6509_v24, %v5482_v19 }
 0x1c4   : > { %v6900_v7 = vpop.f32.mrb[102].mxu1  ;;  %v2326_v8 = vpop.f32.mrb[103].mxu0  ;;  %v4924_v26 = vpack.c.bf16 %v4322_v48, %v4322_v48  ;;  %v6944_v18 = vadd.f32 %v6509_v24, %v5283_v16  ;;  %v3124_v13 = vadd.f32 %v6509_v24, %v3123_v41  ;;  %v3804_v54 = vmax.f32 %v6930_v11, 0.0 }
 0x1c5   : > { %v6905_v31 = vpop.f32.mrb[103].mxu1  ;;  %v4321_v3 = vadd.f32 %v6820_v23, %v4270_v53  ;;  %v4922_v60 = vpack.c.bf16 %v4320_v1, %v4320_v1  ;;  %v6947_v47 = vadd.f32 %v6509_v24, %v2326_v8  ;;  %v3608_v2 = vmax.f32 %v6938_v9, 0.0 }
 0x1c6   : > { %v4551_v15 = vsel %vm6923_vm3, %v4924_v26, %v4550_v63  ;;  %v3606_v39 = vmax.f32 %v2324_v51, 0.0  ;;  %v3609_v17 = vmax.f32 %v6944_v18, 0.0  ;;  %v3805_v16 = vmax.f32 %v3119_v12, 0.0  ;;  %v6992_v26 = vld [vmem:[%s7894_s2] ss:$0 sm:$0xff] }
 0x1c7   : > { %v4923_v23 = vpack.c.bf16 %v4321_v3, %v4321_v3  ;;  %4552 = vst [vmem:[%s6841_s28 + $0x28] sm:$0x1] %v4551_v15  ;;  %4545 = vst.msk [vmem:[%s6841_s28 + $0x20] sm:$0xf] %vm4536_vm0, %v4922_v60  ;;  %v3607_v61 = vmax.f32 %v6947_v47, 0.0  ;;  %v3803_v0 = vmax.f32 %v3111_v43, 0.0  ;;  %v3135_v11 = vadd.f32 %v6509_v24, %v6900_v7 }
 0x1c8   : > { %v3808_v40 = vmax.f32 %v6959_v57, 0.0  ;;  %v3806_v21 = vmax.f32 %v3124_v13, 0.0  ;;  %v3127_v1 = vadd.f32 %v6509_v24, %v6905_v31 }
 0x1c9   : > { %v5286_v42 = vpop.f32.mrb[104].mxu0  ;;  %4546 = vst.msk [vmem:[%s6841_s28 + $0x24] sm:$0xf] %vm4536_vm0, %v4923_v23 }
 0x1ca   : > { %v6917_v32 = vpop.f32.mrb[104].mxu1  ;;  %v2339_v29 = vpop.f32.mrb[105].mxu0  ;;  %v6969_v10 = vadd.f32 %v6509_v24, %v5286_v42 }
 0x1cb   : > { %v6921_v30 = vpop.f32.mrb[105].mxu1  ;;  %v5287_v20 = vpop.f32.mrb[106].mxu0  ;;  %v6972_v41 = vadd.f32 %v6509_v24, %v2339_v29 }
 0x1cc   : > { %v6933_v55 = vpop.f32.mrb[106].mxu1  ;;  %v2342_v58 = vpop.f32.mrb[107].mxu0  ;;  %v6977_v14 = vadd.f32 %v6509_v24, %v5287_v20  ;;  %v3140_v7 = vadd.f32 %v6992_v26, %v6921_v30 }
 0x1cd   : > { %v6940_v22 = vpop.f32.mrb[107].mxu1  ;;  %v3610_v23 = vmax.f32 %v6972_v41, 0.0  ;;  %v7003_v31 = vadd.f32 %v6992_v26, %v2342_v58  ;;  %v7017_v30 = vadd.f32 %v6992_v26, %v6933_v55 }
 0x1d1   : > { %v5290_v28 = vpop.f32.mrb[108].mxu0 }
 0x1d2   : > { %v5490_v19 = vpop.f32.mrb[108].mxu1  ;;  %v2364_v46 = vadd.f32 %v6509_v24, %v5290_v28  ;;  %v2355_v8 = vpop.f32.mrb[109].mxu0  ;;  %v3809_v28 = vmax.f32 %v3135_v11, 0.0 }
 0x1d3   : > { %v3155_v35 = vpop.f32.mrb[109].mxu1  ;;  %v3164_v27 = vadd.f32 %v6509_v24, %v5490_v19  ;;  %v5291_v4 = vpop.f32.mrb[110].mxu0  ;;  %v7013_v19 = vadd.f32 %v6992_v26, %v6917_v32 }
 0x1d4   : > { %v5491_v25 = vpop.f32.mrb[110].mxu1  ;;  %v3616_v62 = vmax.f32 %v2364_v46, 0.0  ;;  %v3156_v42 = vadd.f32 %v6509_v24, %v3155_v35  ;;  %v2367_v48 = vadd.f32 %v6509_v24, %v5291_v4  ;;  %v6983_v29 = vpop.f32.mrb[111].mxu0  ;;  %v3807_v46 = vmax.f32 %v3127_v1, 0.0 }
 0x1d5   : > { %v3167_v53 = vadd.f32 %v6509_v24, %v5491_v25  ;;  %v3158_v63 = vpop.f32.mrb[111].mxu1  ;;  %v3816_v20 = vmax.f32 %v3164_v27, 0.0  ;;  %v3810_v27 = vmax.f32 %v3140_v7, 0.0  ;;  %v7028_v4 = vadd.f32 %v6992_v26, %v2355_v8 }
 0x1d6   : > { %v3159_v6 = vadd.f32 %v6992_v26, %v3158_v63  ;;  %v6995_v3 = vmax.f32 %v3605_v52, %v3616_v62  ;;  %v3814_v60 = vmax.f32 %v3156_v42, 0.0  ;;  %v3617_v51 = vmax.f32 %v2367_v48, 0.0 }
 0x1d7   : > { %v3817_v15 = vmax.f32 %v3167_v53, 0.0  ;;  %v7000_v12 = vmax.f32 %v3805_v16, %v3816_v20  ;;  %v3614_v9 = vmax.f32 %v7028_v4, 0.0 }
 0x1d8   : > { %v3815_v24 = vmax.f32 %v3159_v6, 0.0  ;;  %v7005_v43 = vmax.f32 %v3803_v0, %v3814_v60  ;;  %v7007_v13 = vmax.f32 %v3606_v39, %v3617_v51  ;;  %v7023_v39 = vadd.f32 %v6992_v26, %v6940_v22 }
 0x1d9   : > { %v7009_v52 = vmax.f32 %v3806_v21, %v3817_v15  ;;  %v5294_v41 = vpop.f32.mrb[112].mxu0 }
 0x1da   : > { %v7019_v16 = vmax.f32 %v3804_v54, %v3815_v24  ;;  %v5494_v58 = vpop.f32.mrb[112].mxu1  ;;  %v2380_v0 = vadd.f32 %v6992_v26, %v5294_v41  ;;  %v2371_v21 = vpop.f32.mrb[113].mxu0 }
 0x1db   : > { %v3180_v35 = vadd.f32 %v6992_v26, %v5494_v58  ;;  %v3171_v32 = vpop.f32.mrb[113].mxu1  ;;  %v2372_v55 = vadd.f32 %v6992_v26, %v2371_v21  ;;  %v5295_v25 = vpop.f32.mrb[114].mxu0  ;;  %v3613_v21 = vmax.f32 %v6977_v14, 0.0  ;;  %v3813_v14 = vmax.f32 %v7017_v30, 0.0 }
 0x1dc   : > { %v3172_v54 = vadd.f32 %v6992_v26, %v3171_v32  ;;  %v5495_v62 = vpop.f32.mrb[114].mxu1  ;;  %v3620_v42 = vmax.f32 %v2380_v0, 0.0  ;;  %v2383_v22 = vadd.f32 %v6992_v26, %v5295_v25  ;;  %v2374_v63 = vpop.f32.mrb[115].mxu0 }
 0x1dd   : > { %v3820_v48 = vmax.f32 %v3180_v35, 0.0  ;;  %v3183_v53 = vadd.f32 %v6992_v26, %v5495_v62  ;;  %v3174_v11 = vpop.f32.mrb[115].mxu1  ;;  %v3618_v1 = vmax.f32 %v2372_v55, 0.0  ;;  %v2375_v6 = vadd.f32 %v6992_v26, %v2374_v63 }
 0x1de   : > { %v3818_v20 = vmax.f32 %v3172_v54, 0.0  ;;  %v3175_v8 = vadd.f32 %v6992_v26, %v3174_v11  ;;  %v7038_v60 = vmax.f32 %v3609_v17, %v3620_v42  ;;  %v3621_v15 = vmax.f32 %v2383_v22, 0.0 }
 0x1df   : > { %v7040_v51 = vmax.f32 %v3809_v28, %v3820_v48  ;;  %v3821_v7 = vmax.f32 %v3183_v53, 0.0  ;;  %v7044_v24 = vmax.f32 %v3607_v61, %v3618_v1  ;;  %v3619_v58 = vmax.f32 %v2375_v6, 0.0 }
 0x1e0   : > { %v7046_v41 = vmax.f32 %v3807_v46, %v3818_v20  ;;  %v3819_v0 = vmax.f32 %v3175_v8, 0.0  ;;  %v3612_v35 = vmax.f32 %v6969_v10, 0.0  ;;  %v7050_v32 = vmax.f32 %v3610_v23, %v3621_v15 }
 0x1e1   : > { %v7052_v18 = vmax.f32 %v3810_v27, %v3821_v7  ;;  %v3611_v17 = vmax.f32 %v7003_v31, 0.0  ;;  %v3812_v28 = vmax.f32 %v7013_v19, 0.0  ;;  %v7058_v47 = vmax.f32 %v3608_v2, %v3619_v58  ;;  %v5298_v46 = vpop.f32.mrb[116].mxu0 }
 0x1e2   : > { %v7062_v61 = vmax.f32 %v3808_v40, %v3819_v0  ;;  %v5498_v10 = vpop.f32.mrb[116].mxu1  ;;  %v3811_v23 = vmax.f32 %v7023_v39, 0.0  ;;  %v2396_v27 = vadd.f32 %v6992_v26, %v5298_v46  ;;  %v2387_v55 = vpop.f32.mrb[117].mxu0  ;;  %v2359_v2 = vadd.f32 %v6992_v26, %v6983_v29 }
 0x1e3   : > { %v3196_v31 = vadd.f32 %v6992_v26, %v5498_v10  ;;  %v3187_v19 = vpop.f32.mrb[117].mxu1  ;;  %v2388_v57 = vadd.f32 %v6992_v26, %v2387_v55  ;;  %v5299_v54 = vpop.f32.mrb[118].mxu0 }
 0x1e4   : > { %v3188_v40 = vadd.f32 %v6992_v26, %v3187_v19  ;;  %v5499_v25 = vpop.f32.mrb[118].mxu1  ;;  %v3624_v30 = vmax.f32 %v2396_v27, 0.0  ;;  %v2399_v39 = vadd.f32 %v6992_v26, %v5299_v54  ;;  %v2390_v48 = vpop.f32.mrb[119].mxu0  ;;  %v3615_v19 = vmax.f32 %v2359_v2, 0.0 }
 0x1e5   : > { %v3824_v62 = vmax.f32 %v3196_v31, 0.0  ;;  %v3199_v42 = vadd.f32 %v6992_v26, %v5499_v25  ;;  %v3190_v22 = vpop.f32.mrb[119].mxu1  ;;  %v3622_v53 = vmax.f32 %v2388_v57, 0.0  ;;  %v2391_v4 = vadd.f32 %v6992_v26, %v2390_v48 }
 0x1e6   : > { %v3822_v63 = vmax.f32 %v3188_v40, 0.0  ;;  %v3191_v29 = vadd.f32 %v6992_v26, %v3190_v22  ;;  %v7077_v11 = vmax.f32 %v3613_v21, %v3624_v30  ;;  %v3625_v20 = vmax.f32 %v2399_v39, 0.0 }
 0x1e7   : > { %v7079_v1 = vmax.f32 %v3813_v14, %v3824_v62  ;;  %v3825_v6 = vmax.f32 %v3199_v42, 0.0  ;;  %v7081_v8 = vmax.f32 %v3611_v17, %v3622_v53  ;;  %v3623_v7 = vmax.f32 %v2391_v4, 0.0 }
 0x1e8   : > { %v7083_v15 = vmax.f32 %v3811_v23, %v3822_v63  ;;  %v3823_v58 = vmax.f32 %v3191_v29, 0.0  ;;  %v7085_v0 = vmax.f32 %v3614_v9, %v3625_v20 }
 0x1e9   : > { %v7088_v46 = vmax.f32 %v7005_v43, %v3825_v6  ;;  %v7090_v10 = vmax.f32 %v3612_v35, %v3623_v7  ;;  %v5302_v21 = vpop.f32.mrb[120].mxu0 }
 0x1ea   : > { %v7092_v27 = vmax.f32 %v3812_v28, %v3823_v58  ;;  %v5502_v14 = vpop.f32.mrb[120].mxu1  ;;  %v2412_v31 = vadd.f32 %v6992_v26, %v5302_v21  ;;  %v2403_v55 = vpop.f32.mrb[121].mxu0 }
 0x1eb   : > { %v3212_v17 = vadd.f32 %v6992_v26, %v5502_v14  ;;  %v3203_v23 = vpop.f32.mrb[121].mxu1  ;;  %v2404_v57 = vadd.f32 %v6992_v26, %v2403_v55  ;;  %v5303_v40 = vpop.f32.mrb[122].mxu0 }
 0x1ec   : > { %v3204_v9 = vadd.f32 %v6992_v26, %v3203_v23  ;;  %v5503_v43 = vpop.f32.mrb[122].mxu1  ;;  %v3628_v54 = vmax.f32 %v2412_v31, 0.0  ;;  %v2415_v28 = vadd.f32 %v6992_v26, %v5303_v40  ;;  %v2406_v30 = vpop.f32.mrb[123].mxu0 }
 0x1ed   : > { %v3828_v35 = vmax.f32 %v3212_v17, 0.0  ;;  %v3215_v25 = vadd.f32 %v6992_v26, %v5503_v43  ;;  %v3206_v62 = vpop.f32.mrb[123].mxu1  ;;  %v3626_v39 = vmax.f32 %v2404_v57, 0.0  ;;  %v2407_v48 = vadd.f32 %v6992_v26, %v2406_v30 }
 0x1ee   : > { %v3826_v42 = vmax.f32 %v3204_v9, 0.0  ;;  %v3207_v2 = vadd.f32 %v6992_v26, %v3206_v62  ;;  %v7103_v22 = vmax.f32 %v7007_v13, %v3628_v54  ;;  %v3629_v63 = vmax.f32 %v2415_v28, 0.0 }
 0x1ef   : > { %v7106_v53 = vmax.f32 %v7009_v52, %v3828_v35  ;;  %v3829_v4 = vmax.f32 %v3215_v25, 0.0  ;;  %v7108_v29 = vmax.f32 %v3615_v19, %v3626_v39  ;;  %v3627_v6 = vmax.f32 %v2407_v48, 0.0 }
 0x1f0   : > { %v7111_v20 = vmax.f32 %v7019_v16, %v3826_v42  ;;  %v3827_v7 = vmax.f32 %v3207_v2, 0.0  ;;  %v7114_v58 = vmax.f32 %v7044_v24, %v3629_v63 }
 0x1f1   : > { %v7117_v21 = vmax.f32 %v7046_v41, %v3829_v4  ;;  %v7120_v13 = vmax.f32 %v6995_v3, %v3627_v6  ;;  %v5306_v14 = vpop.f32.mrb[124].mxu0 }
 0x1f2   : > { %v7123_v52 = vmax.f32 %v7000_v12, %v3827_v7  ;;  %v5506_v31 = vpop.f32.mrb[124].mxu1  ;;  %v2428_v17 = vadd.f32 %v6992_v26, %v5306_v14  ;;  %v2419_v55 = vpop.f32.mrb[125].mxu0 }
 0x1f3   : > { %v3228_v16 = vadd.f32 %v6992_v26, %v5506_v31  ;;  %v3219_v23 = vpop.f32.mrb[125].mxu1  ;;  %v2420_v24 = vadd.f32 %v6992_v26, %v2419_v55  ;;  %v5307_v41 = vpop.f32.mrb[126].mxu0 }
 0x1f4   : > { %v3220_v19 = vadd.f32 %v6992_v26, %v3219_v23  ;;  %v5507_v57 = vpop.f32.mrb[126].mxu1  ;;  %v3632_v9 = vmax.f32 %v2428_v17, 0.0  ;;  %v2431_v40 = vadd.f32 %v6992_v26, %v5307_v41  ;;  %v2422_v43 = vpop.f32.mrb[127].mxu0 }
 0x1f5   : > { %v3832_v3 = vmax.f32 %v3228_v16, 0.0  ;;  %v3231_v12 = vadd.f32 %v6992_v26, %v5507_v57  ;;  %v3222_v54 = vpop.f32.mrb[127].mxu1  ;;  %v3630_v35 = vmax.f32 %v2420_v24, 0.0  ;;  %v2423_v25 = vadd.f32 %v6992_v26, %v2422_v43 }
 0x1f6   : > { %v3830_v28 = vmax.f32 %v3220_v19, 0.0  ;;  %v3223_v30 = vadd.f32 %v6992_v26, %v3222_v54  ;;  %v7134_v62 = vmax.f32 %v7050_v32, %v3632_v9  ;;  %v3633_v42 = vmax.f32 %v2431_v40, 0.0 }
 0x1f7   : > { %v7137_v39 = vmax.f32 %v7052_v18, %v3832_v3  ;;  %v3833_v48 = vmax.f32 %v3231_v12, 0.0  ;;  %v7140_v2 = vmax.f32 %v7058_v47, %v3630_v35  ;;  %v3631_v4 = vmax.f32 %v2423_v25, 0.0 }
 0x1f8   : > { %v7143_v63 = vmax.f32 %v7062_v61, %v3830_v28  ;;  %v3831_v6 = vmax.f32 %v3223_v30, 0.0  ;;  %v7146_v7 = vmax.f32 %v7081_v8, %v3633_v42 }
 0x1f9   : > { %v7149_v14 = vmax.f32 %v7083_v15, %v3833_v48  ;;  %v7152_v32 = vmax.f32 %v7038_v60, %v3631_v4  ;;  %v5310_v31 = vpop.f32.mrb[128].mxu0 }
 0x1fa   : > { %v7155_v18 = vmax.f32 %v7040_v51, %v3831_v6  ;;  %v5510_v47 = vpop.f32.mrb[128].mxu1  ;;  %v2444_v17 = vadd.f32 %v6992_v26, %v5310_v31  ;;  %v2435_v16 = vpop.f32.mrb[129].mxu0 }
 0x1fb   : > { %v3244_v61 = vadd.f32 %v6992_v26, %v5510_v47  ;;  %v3235_v55 = vpop.f32.mrb[129].mxu1  ;;  %v2436_v8 = vadd.f32 %v6992_v26, %v2435_v16  ;;  %v5311_v15 = vpop.f32.mrb[130].mxu0 }
 0x1fc   : > { %v3236_v23 = vadd.f32 %v6992_v26, %v3235_v55  ;;  %v5511_v24 = vpop.f32.mrb[130].mxu1  ;;  %v3636_v19 = vmax.f32 %v2444_v17, 0.0  ;;  %v2447_v41 = vadd.f32 %v6992_v26, %v5311_v15  ;;  %v2438_v57 = vpop.f32.mrb[131].mxu0 }
 0x1fd   : > { %v3836_v60 = vmax.f32 %v3244_v61, 0.0  ;;  %v3247_v51 = vadd.f32 %v6992_v26, %v5511_v24  ;;  %v3238_v9 = vpop.f32.mrb[131].mxu1  ;;  %v3634_v3 = vmax.f32 %v2436_v8, 0.0  ;;  %v2439_v12 = vadd.f32 %v6992_v26, %v2438_v57 }
 0x1fe   : > { %v3834_v40 = vmax.f32 %v3236_v23, 0.0  ;;  %v3239_v43 = vadd.f32 %v6992_v26, %v3238_v9  ;;  %v7166_v54 = vmax.f32 %v7085_v0, %v3636_v19  ;;  %v3637_v28 = vmax.f32 %v2447_v41, 0.0 }
 0x1ff   : > { %v7169_v35 = vmax.f32 %v7088_v46, %v3836_v60  ;;  %v3837_v25 = vmax.f32 %v3247_v51, 0.0  ;;  %v7172_v30 = vmax.f32 %v7090_v10, %v3634_v3  ;;  %v3635_v48 = vmax.f32 %v2439_v12, 0.0 }
 0x200   : > { %v7175_v42 = vmax.f32 %v7092_v27, %v3834_v40  ;;  %v3835_v4 = vmax.f32 %v3239_v43, 0.0  ;;  %v7178_v6 = vmax.f32 %v7108_v29, %v3637_v28 }
 0x201   : > { %v7181_v31 = vmax.f32 %v7111_v20, %v3837_v25  ;;  %v7184_v0 = vmax.f32 %v7077_v11, %v3635_v48  ;;  %v5314_v47 = vpop.f32.mrb[132].mxu0 }
 0x202   : > { %v7187_v46 = vmax.f32 %v7079_v1, %v3835_v4  ;;  %v5514_v10 = vpop.f32.mrb[132].mxu1  ;;  %v2460_v17 = vadd.f32 %v6992_v26, %v5314_v47  ;;  %v2451_v61 = vpop.f32.mrb[133].mxu0 }
 0x203   : > { %v3260_v27 = vadd.f32 %v6992_v26, %v5514_v10  ;;  %v3251_v16 = vpop.f32.mrb[133].mxu1  ;;  %v2452_v29 = vadd.f32 %v6992_v26, %v2451_v61  ;;  %v5315_v20 = vpop.f32.mrb[134].mxu0 }
 0x204   : > { %v3252_v55 = vadd.f32 %v6992_v26, %v3251_v16  ;;  %v5515_v8 = vpop.f32.mrb[134].mxu1  ;;  %v3640_v23 = vmax.f32 %v2460_v17, 0.0  ;;  %v2463_v15 = vadd.f32 %v6992_v26, %v5315_v20  ;;  %v2454_v24 = vpop.f32.mrb[135].mxu0 }
 0x205   : > { %v3840_v11 = vmax.f32 %v3260_v27, 0.0  ;;  %v3263_v1 = vadd.f32 %v6992_v26, %v5515_v8  ;;  %v3254_v19 = vpop.f32.mrb[135].mxu1  ;;  %v3638_v60 = vmax.f32 %v2452_v29, 0.0  ;;  %v2455_v51 = vadd.f32 %v6992_v26, %v2454_v24 }
 0x206   : > { %v3838_v41 = vmax.f32 %v3252_v55, 0.0  ;;  %v3255_v57 = vadd.f32 %v6992_v26, %v3254_v19  ;;  %v7198_v9 = vmax.f32 %v7114_v58, %v3640_v23  ;;  %v3641_v40 = vmax.f32 %v2463_v15, 0.0 }
 0x207   : > { %v7201_v3 = vmax.f32 %v7117_v21, %v3840_v11  ;;  %v3841_v12 = vmax.f32 %v3263_v1, 0.0  ;;  %v7204_v43 = vmax.f32 %v7120_v13, %v3638_v60  ;;  %v3639_v25 = vmax.f32 %v2455_v51, 0.0 }
 0x208   : > { %v7207_v28 = vmax.f32 %v7123_v52, %v3838_v41  ;;  %v3839_v48 = vmax.f32 %v3255_v57, 0.0  ;;  %v7210_v4 = vmax.f32 %v7140_v2, %v3641_v40 }
 0x209   : > { %v7213_v47 = vmax.f32 %v7143_v63, %v3841_v12  ;;  %v7216_v58 = vmax.f32 %v7103_v22, %v3639_v25  ;;  %v5318_v10 = vpop.f32.mrb[136].mxu0 }
 0x20a   : > { %v7219_v21 = vmax.f32 %v7106_v53, %v3839_v48  ;;  %v5518_v13 = vpop.f32.mrb[136].mxu1  ;;  %v2476_v17 = vadd.f32 %v6992_v26, %v5318_v10  ;;  %v2467_v27 = vpop.f32.mrb[137].mxu0 }
 0x20b   : > { %v3276_v52 = vadd.f32 %v6992_v26, %v5518_v13  ;;  %v3267_v61 = vpop.f32.mrb[137].mxu1  ;;  %v2468_v2 = vadd.f32 %v6992_v26, %v2467_v27  ;;  %v5319_v63 = vpop.f32.mrb[138].mxu0 }
 0x20c   : > { %v3268_v16 = vadd.f32 %v6992_v26, %v3267_v61  ;;  %v5519_v29 = vpop.f32.mrb[138].mxu1  ;;  %v3644_v55 = vmax.f32 %v2476_v17, 0.0  ;;  %v2479_v20 = vadd.f32 %v6992_v26, %v5319_v63  ;;  %v2470_v8 = vpop.f32.mrb[139].mxu0 }
 0x20d   : > { %v3844_v22 = vmax.f32 %v3276_v52, 0.0  ;;  %v3279_v53 = vadd.f32 %v6992_v26, %v5519_v29  ;;  %v3270_v23 = vpop.f32.mrb[139].mxu1  ;;  %v3642_v11 = vmax.f32 %v2468_v2, 0.0  ;;  %v2471_v1 = vadd.f32 %v6992_v26, %v2470_v8 }
 0x20e   : > { %v3842_v15 = vmax.f32 %v3268_v16, 0.0  ;;  %v3271_v24 = vadd.f32 %v6992_v26, %v3270_v23  ;;  %v7230_v19 = vmax.f32 %v7146_v7, %v3644_v55  ;;  %v3645_v41 = vmax.f32 %v2479_v20, 0.0 }
 0x20f   : > { %v7233_v60 = vmax.f32 %v7149_v14, %v3844_v22  ;;  %v3845_v51 = vmax.f32 %v3279_v53, 0.0  ;;  %v7236_v57 = vmax.f32 %v7152_v32, %v3642_v11  ;;  %v3643_v12 = vmax.f32 %v2471_v1, 0.0 }
 0x210   : > { %v7239_v40 = vmax.f32 %v7155_v18, %v3842_v15  ;;  %v3843_v25 = vmax.f32 %v3271_v24, 0.0  ;;  %v7242_v48 = vmax.f32 %v7172_v30, %v3645_v41 }
 0x211   : > { %v7245_v10 = vmax.f32 %v7175_v42, %v3845_v51  ;;  %v7248_v7 = vmax.f32 %v7134_v62, %v3643_v12  ;;  %v5322_v13 = vpop.f32.mrb[140].mxu0 }
 0x212   : > { %v7251_v14 = vmax.f32 %v7137_v39, %v3843_v25  ;;  %v5522_v32 = vpop.f32.mrb[140].mxu1  ;;  %v2492_v17 = vadd.f32 %v6992_v26, %v5322_v13  ;;  %v2483_v52 = vpop.f32.mrb[141].mxu0 }
 0x213   : > { %v3292_v18 = vadd.f32 %v6992_v26, %v5522_v32  ;;  %v3283_v27 = vpop.f32.mrb[141].mxu1  ;;  %v2484_v30 = vadd.f32 %v6992_v26, %v2483_v52  ;;  %v5323_v42 = vpop.f32.mrb[142].mxu0 }
 0x214   : > { %v3284_v61 = vadd.f32 %v6992_v26, %v3283_v27  ;;  %v5523_v2 = vpop.f32.mrb[142].mxu1  ;;  %v3648_v16 = vmax.f32 %v2492_v17, 0.0  ;;  %v2495_v63 = vadd.f32 %v6992_v26, %v5323_v42  ;;  %v2486_v29 = vpop.f32.mrb[143].mxu0 }
 0x215   : > { %v3848_v62 = vmax.f32 %v3292_v18, 0.0  ;;  %v3295_v39 = vadd.f32 %v6992_v26, %v5523_v2  ;;  %v3286_v55 = vpop.f32.mrb[143].mxu1  ;;  %v3646_v22 = vmax.f32 %v2484_v30, 0.0  ;;  %v2487_v53 = vadd.f32 %v6992_v26, %v2486_v29 }
 0x216   : > { %v3846_v20 = vmax.f32 %v3284_v61, 0.0  ;;  %v3287_v8 = vadd.f32 %v6992_v26, %v3286_v55  ;;  %v7262_v23 = vmax.f32 %v7178_v6, %v3648_v16  ;;  %v3649_v15 = vmax.f32 %v2495_v63, 0.0 }
 0x217   : > { %v7265_v11 = vmax.f32 %v7181_v31, %v3848_v62  ;;  %v3849_v1 = vmax.f32 %v3295_v39, 0.0  ;;  %v7268_v24 = vmax.f32 %v7184_v0, %v3646_v22  ;;  %v3647_v51 = vmax.f32 %v2487_v53, 0.0 }
 0x218   : > { %v7271_v41 = vmax.f32 %v7187_v46, %v3846_v20  ;;  %v3847_v12 = vmax.f32 %v3287_v8, 0.0  ;;  %v7274_v25 = vmax.f32 %v7204_v43, %v3649_v15 }
 0x219   : > { %v7277_v13 = vmax.f32 %v7207_v28, %v3849_v1  ;;  %v7280_v6 = vmax.f32 %v7166_v54, %v3647_v51  ;;  %v5326_v32 = vpop.f32.mrb[144].mxu0 }
 0x21a   : > { %v7283_v31 = vmax.f32 %v7169_v35, %v3847_v12  ;;  %v5526_v0 = vpop.f32.mrb[144].mxu1  ;;  %v2508_v17 = vadd.f32 %v6992_v26, %v5326_v32  ;;  %v2499_v18 = vpop.f32.mrb[145].mxu0 }
 0x21b   : > { %v3308_v46 = vadd.f32 %v6992_v26, %v5526_v0  ;;  %v3299_v52 = vpop.f32.mrb[145].mxu1  ;;  %v2500_v43 = vadd.f32 %v6992_v26, %v2499_v18  ;;  %v5327_v28 = vpop.f32.mrb[146].mxu0 }
 0x21c   : > { %v3300_v27 = vadd.f32 %v6992_v26, %v3299_v52  ;;  %v5527_v30 = vpop.f32.mrb[146].mxu1  ;;  %v3652_v61 = vmax.f32 %v2508_v17, 0.0  ;;  %v2511_v42 = vadd.f32 %v6992_v26, %v5327_v28  ;;  %v2502_v2 = vpop.f32.mrb[147].mxu0 }
 0x21d   : > { %v3852_v54 = vmax.f32 %v3308_v46, 0.0  ;;  %v3311_v35 = vadd.f32 %v6992_v26, %v5527_v30  ;;  %v3302_v16 = vpop.f32.mrb[147].mxu1  ;;  %v3650_v62 = vmax.f32 %v2500_v43, 0.0  ;;  %v2503_v39 = vadd.f32 %v6992_v26, %v2502_v2 }
 0x21e   : > { %v3850_v63 = vmax.f32 %v3300_v27, 0.0  ;;  %v3303_v29 = vadd.f32 %v6992_v26, %v3302_v16  ;;  %v7294_v55 = vmax.f32 %v7210_v4, %v3652_v61  ;;  %v3653_v20 = vmax.f32 %v2511_v42, 0.0 }
 0x21f   : > { %v7297_v22 = vmax.f32 %v7213_v47, %v3852_v54  ;;  %v3853_v53 = vmax.f32 %v3311_v35, 0.0  ;;  %v7300_v8 = vmax.f32 %v7216_v58, %v3650_v62  ;;  %v3651_v1 = vmax.f32 %v2503_v39, 0.0 }
 0x220   : > { %v7303_v15 = vmax.f32 %v7219_v21, %v3850_v63  ;;  %v3851_v51 = vmax.f32 %v3303_v29, 0.0  ;;  %v7306_v12 = vmax.f32 %v7236_v57, %v3653_v20 }
 0x221   : > { %v7309_v32 = vmax.f32 %v7239_v40, %v3853_v53  ;;  %v7312_v4 = vmax.f32 %v7198_v9, %v3651_v1  ;;  %v5330_v0 = vpop.f32.mrb[148].mxu0 }
 0x222   : > { %v7315_v47 = vmax.f32 %v7201_v3, %v3851_v51  ;;  %v5530_v58 = vpop.f32.mrb[148].mxu1  ;;  %v2524_v17 = vadd.f32 %v6992_v26, %v5330_v0  ;;  %v2515_v46 = vpop.f32.mrb[149].mxu0 }
 0x223   : > { %v3324_v21 = vadd.f32 %v6992_v26, %v5530_v58  ;;  %v3315_v18 = vpop.f32.mrb[149].mxu1  ;;  %v2516_v57 = vadd.f32 %v6992_v26, %v2515_v46  ;;  %v5331_v40 = vpop.f32.mrb[150].mxu0 }
 0x224   : > { %v3316_v52 = vadd.f32 %v6992_v26, %v3315_v18  ;;  %v5531_v43 = vpop.f32.mrb[150].mxu1  ;;  %v3656_v27 = vmax.f32 %v2524_v17, 0.0  ;;  %v2527_v28 = vadd.f32 %v6992_v26, %v5331_v40  ;;  %v2518_v30 = vpop.f32.mrb[151].mxu0 }
 0x225   : > { %v3856_v9 = vmax.f32 %v3324_v21, 0.0  ;;  %v3327_v3 = vadd.f32 %v6992_v26, %v5531_v43  ;;  %v3318_v61 = vpop.f32.mrb[151].mxu1  ;;  %v3654_v54 = vmax.f32 %v2516_v57, 0.0  ;;  %v2519_v35 = vadd.f32 %v6992_v26, %v2518_v30 }
 0x226   : > { %v3854_v42 = vmax.f32 %v3316_v52, 0.0  ;;  %v3319_v2 = vadd.f32 %v6992_v26, %v3318_v61  ;;  %v7326_v16 = vmax.f32 %v7242_v48, %v3656_v27  ;;  %v3657_v63 = vmax.f32 %v2527_v28, 0.0 }
 0x227   : > { %v7329_v62 = vmax.f32 %v7245_v10, %v3856_v9  ;;  %v3857_v39 = vmax.f32 %v3327_v3, 0.0  ;;  %v7332_v29 = vmax.f32 %v7248_v7, %v3654_v54  ;;  %v3655_v53 = vmax.f32 %v2519_v35, 0.0 }
 0x228   : > { %v7335_v20 = vmax.f32 %v7251_v14, %v3854_v42  ;;  %v3855_v1 = vmax.f32 %v3319_v2, 0.0  ;;  %v7338_v51 = vmax.f32 %v7268_v24, %v3657_v63 }
 0x229   : > { %v7341_v0 = vmax.f32 %v7271_v41, %v3857_v39  ;;  %v7344_v48 = vmax.f32 %v7230_v19, %v3655_v53  ;;  %v5334_v58 = vpop.f32.mrb[152].mxu0 }
 0x22a   : > { %v7347_v10 = vmax.f32 %v7233_v60, %v3855_v1  ;;  %v5534_v7 = vpop.f32.mrb[152].mxu1  ;;  %v2540_v17 = vadd.f32 %v6992_v26, %v5334_v58  ;;  %v2531_v21 = vpop.f32.mrb[153].mxu0 }
 0x22b   : > { %v3340_v14 = vadd.f32 %v6992_v26, %v5534_v7  ;;  %v3331_v46 = vpop.f32.mrb[153].mxu1  ;;  %v2532_v24 = vadd.f32 %v6992_v26, %v2531_v21  ;;  %v5335_v41 = vpop.f32.mrb[154].mxu0 }
 0x22c   : > { %v3332_v18 = vadd.f32 %v6992_v26, %v3331_v46  ;;  %v5535_v57 = vpop.f32.mrb[154].mxu1  ;;  %v3660_v52 = vmax.f32 %v2540_v17, 0.0  ;;  %v2543_v40 = vadd.f32 %v6992_v26, %v5335_v41  ;;  %v2534_v43 = vpop.f32.mrb[155].mxu0 }
 0x22d   : > { %v3860_v19 = vmax.f32 %v3340_v14, 0.0  ;;  %v3343_v60 = vadd.f32 %v6992_v26, %v5535_v57  ;;  %v3334_v27 = vpop.f32.mrb[155].mxu1  ;;  %v3658_v9 = vmax.f32 %v2532_v24, 0.0  ;;  %v2535_v3 = vadd.f32 %v6992_v26, %v2534_v43 }
 0x22e   : > { %v3858_v28 = vmax.f32 %v3332_v18, 0.0  ;;  %v3335_v30 = vadd.f32 %v6992_v26, %v3334_v27  ;;  %v7358_v61 = vmax.f32 %v7274_v25, %v3660_v52  ;;  %v3661_v42 = vmax.f32 %v2543_v40, 0.0 }
 0x22f   : > { %v7361_v54 = vmax.f32 %v7277_v13, %v3860_v19  ;;  %v3861_v35 = vmax.f32 %v3343_v60, 0.0  ;;  %v7364_v2 = vmax.f32 %v7280_v6, %v3658_v9  ;;  %v3659_v39 = vmax.f32 %v2535_v3, 0.0 }
 0x230   : > { %v7367_v63 = vmax.f32 %v7283_v31, %v3858_v28  ;;  %v3859_v53 = vmax.f32 %v3335_v30, 0.0  ;;  %v7370_v1 = vmax.f32 %v7300_v8, %v3661_v42 }
 0x231   : > { %v7373_v58 = vmax.f32 %v7303_v15, %v3861_v35  ;;  %v7376_v25 = vmax.f32 %v7262_v23, %v3659_v39  ;;  %v5338_v7 = vpop.f32.mrb[156].mxu0 }
 0x232   : > { %v7379_v13 = vmax.f32 %v7265_v11, %v3859_v53  ;;  %v5538_v6 = vpop.f32.mrb[156].mxu1  ;;  %v2556_v17 = vadd.f32 %v6992_v26, %v5338_v7  ;;  %v2547_v14 = vpop.f32.mrb[157].mxu0 }
 0x233   : > { %v3356_v31 = vadd.f32 %v6992_v26, %v5538_v6  ;;  %v3347_v21 = vpop.f32.mrb[157].mxu1  ;;  %v2548_v8 = vadd.f32 %v6992_v26, %v2547_v14  ;;  %v5339_v15 = vpop.f32.mrb[158].mxu0 }
 0x234   : > { %v3348_v46 = vadd.f32 %v6992_v26, %v3347_v21  ;;  %v5539_v24 = vpop.f32.mrb[158].mxu1  ;;  %v3664_v18 = vmax.f32 %v2556_v17, 0.0  ;;  %v2559_v41 = vadd.f32 %v6992_v26, %v5339_v15  ;;  %v2550_v57 = vpop.f32.mrb[159].mxu0 }
 0x235   : > { %v3864_v23 = vmax.f32 %v3356_v31, 0.0  ;;  %v3359_v11 = vadd.f32 %v6992_v26, %v5539_v24  ;;  %v3350_v52 = vpop.f32.mrb[159].mxu1  ;;  %v3662_v19 = vmax.f32 %v2548_v8, 0.0  ;;  %v2551_v60 = vadd.f32 %v6992_v26, %v2550_v57 }
 0x236   : > { %v3862_v40 = vmax.f32 %v3348_v46, 0.0  ;;  %v3351_v43 = vadd.f32 %v6992_v26, %v3350_v52  ;;  %v7390_v27 = vmax.f32 %v7306_v12, %v3664_v18  ;;  %v3665_v28 = vmax.f32 %v2559_v41, 0.0 }
 0x237   : > { %v7393_v9 = vmax.f32 %v7309_v32, %v3864_v23  ;;  %v3865_v3 = vmax.f32 %v3359_v11, 0.0  ;;  %v7396_v30 = vmax.f32 %v7312_v4, %v3662_v19  ;;  %v3663_v35 = vmax.f32 %v2551_v60, 0.0 }
 0x238   : > { %v7399_v42 = vmax.f32 %v7315_v47, %v3862_v40  ;;  %v3863_v39 = vmax.f32 %v3351_v43, 0.0  ;;  %v7402_v53 = vmax.f32 %v7332_v29, %v3665_v28 }
 0x239   : > { %v7405_v7 = vmax.f32 %v7335_v20, %v3865_v3  ;;  %v7408_v12 = vmax.f32 %v7294_v55, %v3663_v35  ;;  %v5342_v6 = vpop.f32.mrb[160].mxu0 }
 0x23a   : > { %v7411_v32 = vmax.f32 %v7297_v22, %v3863_v39  ;;  %v5542_v4 = vpop.f32.mrb[160].mxu1  ;;  %v2572_v17 = vadd.f32 %v6992_v26, %v5342_v6  ;;  %v2563_v31 = vpop.f32.mrb[161].mxu0 }
 0x23b   : > { %v3372_v47 = vadd.f32 %v6992_v26, %v5542_v4  ;;  %v3363_v14 = vpop.f32.mrb[161].mxu1  ;;  %v2564_v29 = vadd.f32 %v6992_v26, %v2563_v31  ;;  %v5343_v20 = vpop.f32.mrb[162].mxu0 }
 0x23c   : > { %v3364_v21 = vadd.f32 %v6992_v26, %v3363_v14  ;;  %v5543_v8 = vpop.f32.mrb[162].mxu1  ;;  %v3668_v46 = vmax.f32 %v2572_v17, 0.0  ;;  %v2575_v15 = vadd.f32 %v6992_v26, %v5343_v20  ;;  %v2566_v24 = vpop.f32.mrb[163].mxu0 }
 0x23d   : > { %v3868_v55 = vmax.f32 %v3372_v47, 0.0  ;;  %v3375_v22 = vadd.f32 %v6992_v26, %v5543_v8  ;;  %v3366_v18 = vpop.f32.mrb[163].mxu1  ;;  %v3666_v23 = vmax.f32 %v2564_v29, 0.0  ;;  %v2567_v11 = vadd.f32 %v6992_v26, %v2566_v24 }
 0x23e   : > { %v3866_v41 = vmax.f32 %v3364_v21, 0.0  ;;  %v3367_v57 = vadd.f32 %v6992_v26, %v3366_v18  ;;  %v7422_v52 = vmax.f32 %v7338_v51, %v3668_v46  ;;  %v3669_v40 = vmax.f32 %v2575_v15, 0.0 }
 0x23f   : > { %v7425_v19 = vmax.f32 %v7341_v0, %v3868_v55  ;;  %v3869_v60 = vmax.f32 %v3375_v22, 0.0  ;;  %v7428_v43 = vmax.f32 %v7344_v48, %v3666_v23  ;;  %v3667_v3 = vmax.f32 %v2567_v11, 0.0 }
 0x240   : > { %v7431_v28 = vmax.f32 %v7347_v10, %v3866_v41  ;;  %v3867_v35 = vmax.f32 %v3367_v57, 0.0  ;;  %v7434_v39 = vmax.f32 %v7364_v2, %v3669_v40 }
 0x241   : > { %v7437_v6 = vmax.f32 %v7367_v63, %v3869_v60  ;;  %v7440_v51 = vmax.f32 %v7326_v16, %v3667_v3  ;;  %v5346_v4 = vpop.f32.mrb[164].mxu0 }
 0x242   : > { %v7443_v0 = vmax.f32 %v7329_v62, %v3867_v35  ;;  %v5546_v48 = vpop.f32.mrb[164].mxu1  ;;  %v2588_v17 = vadd.f32 %v6992_v26, %v5346_v4  ;;  %v2579_v47 = vpop.f32.mrb[165].mxu0 }
 0x243   : > { %v3388_v10 = vadd.f32 %v6992_v26, %v5546_v48  ;;  %v3379_v31 = vpop.f32.mrb[165].mxu1  ;;  %v2580_v2 = vadd.f32 %v6992_v26, %v2579_v47  ;;  %v5347_v63 = vpop.f32.mrb[166].mxu0 }
 0x244   : > { %v3380_v14 = vadd.f32 %v6992_v26, %v3379_v31  ;;  %v5547_v29 = vpop.f32.mrb[166].mxu1  ;;  %v3672_v21 = vmax.f32 %v2588_v17, 0.0  ;;  %v2591_v20 = vadd.f32 %v6992_v26, %v5347_v63  ;;  %v2582_v8 = vpop.f32.mrb[167].mxu0 }
 0x245   : > { %v3872_v16 = vmax.f32 %v3388_v10, 0.0  ;;  %v3391_v62 = vadd.f32 %v6992_v26, %v5547_v29  ;;  %v3382_v46 = vpop.f32.mrb[167].mxu1  ;;  %v3670_v55 = vmax.f32 %v2580_v2, 0.0  ;;  %v2583_v22 = vadd.f32 %v6992_v26, %v2582_v8 }
 0x246   : > { %v3870_v15 = vmax.f32 %v3380_v14, 0.0  ;;  %v3383_v24 = vadd.f32 %v6992_v26, %v3382_v46  ;;  %v7454_v18 = vmax.f32 %v7370_v1, %v3672_v21  ;;  %v3673_v41 = vmax.f32 %v2591_v20, 0.0 }
 0x247   : > { %v7457_v23 = vmax.f32 %v7373_v58, %v3872_v16  ;;  %v3873_v11 = vmax.f32 %v3391_v62, 0.0  ;;  %v7460_v57 = vmax.f32 %v7376_v25, %v3670_v55  ;;  %v3671_v60 = vmax.f32 %v2583_v22, 0.0 }
 0x248   : > { %v7463_v40 = vmax.f32 %v7379_v13, %v3870_v15  ;;  %v3871_v3 = vmax.f32 %v3383_v24, 0.0  ;;  %v7466_v35 = vmax.f32 %v7396_v30, %v3673_v41 }
 0x249   : > { %v7469_v4 = vmax.f32 %v7399_v42, %v3873_v11  ;;  %v7472_v1 = vmax.f32 %v7358_v61, %v3671_v60  ;;  %v5350_v48 = vpop.f32.mrb[168].mxu0 }
 0x24a   : > { %v7475_v58 = vmax.f32 %v7361_v54, %v3871_v3  ;;  %v5550_v25 = vpop.f32.mrb[168].mxu1  ;;  %v2604_v17 = vadd.f32 %v6992_v26, %v5350_v48  ;;  %v2595_v10 = vpop.f32.mrb[169].mxu0 }
 0x24b   : > { %v3404_v13 = vadd.f32 %v6992_v26, %v5550_v25  ;;  %v3395_v47 = vpop.f32.mrb[169].mxu1  ;;  %v2596_v30 = vadd.f32 %v6992_v26, %v2595_v10  ;;  %v5351_v42 = vpop.f32.mrb[170].mxu0 }
 0x24c   : > { %v3396_v31 = vadd.f32 %v6992_v26, %v3395_v47  ;;  %v5551_v2 = vpop.f32.mrb[170].mxu1  ;;  %v3676_v14 = vmax.f32 %v2604_v17, 0.0  ;;  %v2607_v63 = vadd.f32 %v6992_v26, %v5351_v42  ;;  %v2598_v29 = vpop.f32.mrb[171].mxu0 }
 0x24d   : > { %v3876_v61 = vmax.f32 %v3404_v13, 0.0  ;;  %v3407_v54 = vadd.f32 %v6992_v26, %v5551_v2  ;;  %v3398_v21 = vpop.f32.mrb[171].mxu1  ;;  %v3674_v16 = vmax.f32 %v2596_v30, 0.0  ;;  %v2599_v62 = vadd.f32 %v6992_v26, %v2598_v29 }
 0x24e   : > { %v3874_v20 = vmax.f32 %v3396_v31, 0.0  ;;  %v3399_v8 = vadd.f32 %v6992_v26, %v3398_v21  ;;  %v7486_v46 = vmax.f32 %v7402_v53, %v3676_v14  ;;  %v3677_v15 = vmax.f32 %v2607_v63, 0.0 }
 0x24f   : > { %v7489_v55 = vmax.f32 %v7405_v7, %v3876_v61  ;;  %v3877_v22 = vmax.f32 %v3407_v54, 0.0  ;;  %v7492_v24 = vmax.f32 %v7408_v12, %v3674_v16  ;;  %v3675_v11 = vmax.f32 %v2599_v62, 0.0 }
 0x250   : > { %v7495_v41 = vmax.f32 %v7411_v32, %v3874_v20  ;;  %v3875_v60 = vmax.f32 %v3399_v8, 0.0  ;;  %v7498_v3 = vmax.f32 %v7428_v43, %v3677_v15  ;;  %v7512_v32 = vld [vmem:[%s7894_s2] ss:$0 sm:$0xff] }
 0x251   : > { %v7501_v26 = vmax.f32 %v7431_v28, %v3877_v22  ;;  %v7504_v53 = vmax.f32 %v7390_v27, %v3675_v11  ;;  %v5354_v48 = vpop.f32.mrb[172].mxu0 }
 0x252   : > { %v7507_v7 = vmax.f32 %v7393_v9, %v3875_v60  ;;  %v5554_v12 = vpop.f32.mrb[172].mxu1  ;;  %v2620_v25 = vadd.f32 %v7512_v32, %v5354_v48  ;;  %v2611_v17 = vpop.f32.mrb[173].mxu0 }
 0x253   : > { %v3420_v43 = vadd.f32 %v7512_v32, %v5554_v12  ;;  %v3411_v28 = vpop.f32.mrb[173].mxu1  ;;  %v2612_v13 = vadd.f32 %v7512_v32, %v2611_v17  ;;  %v5355_v10 = vpop.f32.mrb[174].mxu0 }
 0x254   : > { %v3412_v27 = vadd.f32 %v7512_v32, %v3411_v28  ;;  %v5555_v9 = vpop.f32.mrb[174].mxu1  ;;  %v3680_v47 = vmax.f32 %v2620_v25, 0.0  ;;  %v2623_v31 = vadd.f32 %v7512_v32, %v5355_v10  ;;  %v2614_v2 = vpop.f32.mrb[175].mxu0 }
 0x255   : > { %v3880_v30 = vmax.f32 %v3420_v43, 0.0  ;;  %v3423_v42 = vadd.f32 %v7512_v32, %v5555_v9  ;;  %v3414_v14 = vpop.f32.mrb[175].mxu1  ;;  %v3678_v61 = vmax.f32 %v2612_v13, 0.0  ;;  %v2615_v54 = vadd.f32 %v7512_v32, %v2614_v2 }
 0x256   : > { %v3878_v63 = vmax.f32 %v3412_v27, 0.0  ;;  %v3415_v29 = vadd.f32 %v7512_v32, %v3414_v14  ;;  %v7523_v21 = vmax.f32 %v7434_v39, %v3680_v47  ;;  %v3681_v20 = vmax.f32 %v2623_v31, 0.0 }
 0x257   : > { %v7526_v16 = vmax.f32 %v7437_v6, %v3880_v30  ;;  %v3881_v62 = vmax.f32 %v3423_v42, 0.0  ;;  %v7529_v8 = vmax.f32 %v7440_v51, %v3678_v61  ;;  %v3679_v22 = vmax.f32 %v2615_v54, 0.0 }
 0x258   : > { %v7532_v15 = vmax.f32 %v7443_v0, %v3878_v63  ;;  %v3879_v11 = vmax.f32 %v3415_v29, 0.0  ;;  %v7535_v60 = vmax.f32 %v7460_v57, %v3681_v20 }
 0x259   : > { %v7538_v48 = vmax.f32 %v7463_v40, %v3881_v62  ;;  %v7541_v39 = vmax.f32 %v7422_v52, %v3679_v22  ;;  %v5358_v12 = vpop.f32.mrb[176].mxu0 }
 0x25a   : > { %v7544_v6 = vmax.f32 %v7425_v19, %v3879_v11  ;;  %v5558_v51 = vpop.f32.mrb[176].mxu1  ;;  %v2636_v25 = vadd.f32 %v7512_v32, %v5358_v12  ;;  %v2627_v43 = vpop.f32.mrb[177].mxu0 }
 0x25b   : > { %v3436_v0 = vadd.f32 %v7512_v32, %v5558_v51  ;;  %v3427_v17 = vpop.f32.mrb[177].mxu1  ;;  %v2628_v57 = vadd.f32 %v7512_v32, %v2627_v43  ;;  %v5359_v40 = vpop.f32.mrb[178].mxu0 }
 0x25c   : > { %v3428_v28 = vadd.f32 %v7512_v32, %v3427_v17  ;;  %v5559_v13 = vpop.f32.mrb[178].mxu1  ;;  %v3684_v27 = vmax.f32 %v2636_v25, 0.0  ;;  %v2639_v10 = vadd.f32 %v7512_v32, %v5359_v40  ;;  %v2630_v9 = vpop.f32.mrb[179].mxu0 }
 0x25d   : > { %v3884_v52 = vmax.f32 %v3436_v0, 0.0  ;;  %v3439_v19 = vadd.f32 %v7512_v32, %v5559_v13  ;;  %v3430_v47 = vpop.f32.mrb[179].mxu1  ;;  %v3682_v30 = vmax.f32 %v2628_v57, 0.0  ;;  %v2631_v42 = vadd.f32 %v7512_v32, %v2630_v9 }
 0x25e   : > { %v3882_v31 = vmax.f32 %v3428_v28, 0.0  ;;  %v3431_v2 = vadd.f32 %v7512_v32, %v3430_v47  ;;  %v7555_v14 = vmax.f32 %v7466_v35, %v3684_v27  ;;  %v3685_v63 = vmax.f32 %v2639_v10, 0.0 }
 0x25f   : > { %v7558_v61 = vmax.f32 %v7469_v4, %v3884_v52  ;;  %v3885_v54 = vmax.f32 %v3439_v19, 0.0  ;;  %v7561_v29 = vmax.f32 %v7472_v1, %v3682_v30  ;;  %v3683_v62 = vmax.f32 %v2631_v42, 0.0 }
 0x260   : > { %v7564_v20 = vmax.f32 %v7475_v58, %v3882_v31  ;;  %v3883_v22 = vmax.f32 %v3431_v2, 0.0  ;;  %v7567_v11 = vmax.f32 %v7492_v24, %v3685_v63  ;;  %v7581_v58 = vld [vmem:[%s7895_s3] ss:$0 sm:$0xff] }
 0x261   : > { %v7570_v12 = vmax.f32 %v7495_v41, %v3885_v54  ;;  %v7573_v35 = vmax.f32 %v7454_v18, %v3683_v62  ;;  %v5362_v51 = vpop.f32.mrb[180].mxu0  ;;  %v4287_v24 = vmul.f32 %v7581_v58, %v6814_v33  ;;  %v4288_v43 = vmul.f32 %v7581_v58, %v6829_v59 }
 0x262   : > { %v7576_v4 = vmax.f32 %v7457_v23, %v3883_v22  ;;  %v5562_v1 = vpop.f32.mrb[180].mxu1  ;;  %v2652_v25 = vadd.f32 %v7512_v32, %v5362_v51  ;;  %v2643_v0 = vpop.f32.mrb[181].mxu0  ;;  %v4285_v23 = vmul.f32 %v7581_v58, %v6824_v44 }
 0x263   : > { %v3452_v41 = vadd.f32 %v7512_v32, %v5562_v1  ;;  %v3443_v18 = vpop.f32.mrb[181].mxu1  ;;  %v2644_v17 = vadd.f32 %v7512_v32, %v2643_v0  ;;  %v5363_v28 = vpop.f32.mrb[182].mxu0 }
 0x264   : > { %v3444_v57 = vadd.f32 %v7512_v32, %v3443_v18  ;;  %v5563_v40 = vpop.f32.mrb[182].mxu1  ;;  %v3688_v13 = vmax.f32 %v2652_v25, 0.0  ;;  %v2655_v27 = vadd.f32 %v7512_v32, %v5363_v28  ;;  %v2646_v10 = vpop.f32.mrb[183].mxu0 }
 0x265   : > { %v3888_v33 = vmax.f32 %v3452_v41, 0.0  ;;  %v3455_v52 = vadd.f32 %v7512_v32, %v5563_v40  ;;  %v3446_v19 = vpop.f32.mrb[183].mxu1  ;;  %v3686_v9 = vmax.f32 %v2644_v17, 0.0  ;;  %v2647_v44 = vadd.f32 %v7512_v32, %v2646_v10 }
 0x266   : > { %v3886_v47 = vmax.f32 %v3444_v57, 0.0  ;;  %v3447_v59 = vadd.f32 %v7512_v32, %v3446_v19  ;;  %v7598_v30 = vmax.f32 %v7498_v3, %v3688_v13  ;;  %v3689_v42 = vmax.f32 %v2655_v27, 0.0  ;;  %v7618_v3 = vld [vmem:[%s7896_s4] ss:$0 sm:$0xff] }
 0x267   : > { %v7601_v31 = vmax.f32 %v7501_v26, %v3888_v33  ;;  %v3889_v2 = vmax.f32 %v3455_v52, 0.0  ;;  %v7604_v63 = vmax.f32 %v7504_v53, %v3686_v9  ;;  %v3687_v62 = vmax.f32 %v2647_v44, 0.0 }
 0x268   : > { %v7607_v54 = vmax.f32 %v7507_v7, %v3886_v47  ;;  %v3887_v22 = vmax.f32 %v3447_v59, 0.0  ;;  %v7610_v51 = vmax.f32 %v7529_v8, %v3689_v42  ;;  %v7621_v26 = vadd.f32 %v7618_v3, %v4287_v24 }
 0x269   : > { %v7613_v1 = vmax.f32 %v7532_v15, %v3889_v2  ;;  %v7624_v53 = vmax.f32 %v7486_v46, %v3687_v62  ;;  %v5366_v25 = vpop.f32.mrb[184].mxu0  ;;  %v7630_v41 = vadd.f32 %v7618_v3, %v4285_v23  ;;  %v4286_v15 = vmul.f32 %v7581_v58, %v6834_v36 }
 0x26a   : > { %v7627_v7 = vmax.f32 %v7489_v55, %v3887_v22  ;;  %v5566_v8 = vpop.f32.mrb[184].mxu1  ;;  %v2668_v0 = vadd.f32 %v7512_v32, %v5366_v25  ;;  %v2659_v24 = vpop.f32.mrb[185].mxu0  ;;  %v7637_v46 = vadd.f32 %v7618_v3, %v4288_v43  ;;  %v4291_v55 = vmul.f32 %v7581_v58, %v6867_v34 }
 0x26b   : > { %v3468_v18 = vadd.f32 %v7512_v32, %v5566_v8  ;;  %v3459_v17 = vpop.f32.mrb[185].mxu1  ;;  %v2660_v57 = vadd.f32 %v7512_v32, %v2659_v24  ;;  %v5367_v28 = vpop.f32.mrb[186].mxu0  ;;  %v4940_v8 = vpack.c.bf16 %v7621_v26, %v7621_v26 }
 0x26c   : > { %v3460_v23 = vadd.f32 %v7512_v32, %v3459_v17  ;;  %v5567_v40 = vpop.f32.mrb[186].mxu1  ;;  %v3692_v13 = vmax.f32 %v2668_v0, 0.0  ;;  %v2671_v33 = vadd.f32 %v7512_v32, %v5367_v28  ;;  %v2662_v52 = vpop.f32.mrb[187].mxu0  ;;  %v7662_v0 = vadd.f32 %v7618_v3, %v4286_v15 }
 0x26d   : > { %v3892_v36 = vmax.f32 %v3468_v18, 0.0  ;;  %v3471_v27 = vadd.f32 %v7512_v32, %v5567_v40  ;;  %v3462_v10 = vpop.f32.mrb[187].mxu1  ;;  %v3690_v19 = vmax.f32 %v2660_v57, 0.0  ;;  %v2663_v9 = vadd.f32 %v7512_v32, %v2662_v52  ;;  %4570 = vst.msk [vmem:[%s6841_s28 + $0x68] sm:$0xf] %vm4536_vm0, %v4940_v8 }
 0x26e   : > { %v3890_v43 = vmax.f32 %v3460_v23, 0.0  ;;  %v3463_v34 = vadd.f32 %v7512_v32, %v3462_v10  ;;  %v7648_v47 = vmax.f32 %v7535_v60, %v3692_v13  ;;  %v3693_v59 = vmax.f32 %v2671_v33, 0.0 }
 0x26f   : > { %v7651_v44 = vmax.f32 %v7538_v48, %v3892_v36  ;;  %v3893_v42 = vmax.f32 %v3471_v27, 0.0  ;;  %v7654_v2 = vmax.f32 %v7541_v39, %v3690_v19  ;;  %v3691_v22 = vmax.f32 %v2663_v9, 0.0 }
 0x270   : > { %v7657_v62 = vmax.f32 %v7544_v6, %v3890_v43  ;;  %v3891_v25 = vmax.f32 %v3463_v34, 0.0  ;;  %v4221_v60 = vmax.f32 %v7561_v29, %v3693_v59  ;;  %v4938_v18 = vpack.c.bf16 %v7630_v41, %v7630_v41 }
 0x271   : > { %v4245_v48 = vmax.f32 %v7564_v20, %v3893_v42  ;;  %v4289_v39 = vmul.f32 %v7581_v58, %v6871_v45  ;;  %v7671_v6 = vmax.f32 %v7523_v21, %v3691_v22  ;;  %v5370_v17 = vpop.f32.mrb[188].mxu0  ;;  %v4941_v15 = vpack.c.bf16 %v7637_v46, %v7637_v46 }
 0x272   : > { %v7674_v24 = vmax.f32 %v7526_v16, %v3891_v25  ;;  %v5570_v57 = vpop.f32.mrb[188].mxu1  ;;  %v7679_v29 = vadd.f32 %v7618_v3, %v4291_v55  ;;  %v4272_v20 = vmul.f32 %v7581_v58, %v4221_v60  ;;  %v2684_v23 = vadd.f32 %v7512_v32, %v5370_v17  ;;  %v2675_v28 = vpop.f32.mrb[189].mxu0  ;;  %4568 = vst.msk [vmem:[%s6841_s28 + $0x60] sm:$0xf] %vm4536_vm0, %v4938_v18 }
 0x273   : > { %v3475_v45 = vpop.f32.mrb[189].mxu1  ;;  %v4290_v21 = vmul.f32 %v7581_v58, %v6885_v37  ;;  %v3484_v16 = vadd.f32 %v7512_v32, %v5570_v57  ;;  %v2676_v40 = vadd.f32 %v7512_v32, %v2675_v28  ;;  %v5371_v36 = vpop.f32.mrb[190].mxu0  ;;  %v4939_v55 = vpack.c.bf16 %v7662_v0, %v7662_v0  ;;  %4571 = vst.msk [vmem:[%s6841_s28 + $0x6c] sm:$0xf] %vm4536_vm0, %v4941_v15 }
 0x274   : > { %v3476_v13 = vadd.f32 %v7512_v32, %v3475_v45  ;;  %v5571_v33 = vpop.f32.mrb[190].mxu1  ;;  %v7692_v27 = vmul.f32 %v7581_v58, %v6878_v56  ;;  %v4323_v52 = vadd.f32 %v7618_v3, %v4272_v20  ;;  %v3696_v10 = vmax.f32 %v2684_v23, 0.0  ;;  %v2678_v37 = vpop.f32.mrb[191].mxu0 }
 0x275   : > { %v3478_v19 = vpop.f32.mrb[191].mxu1  ;;  %v7696_v43 = vadd.f32 %v7618_v3, %v4289_v39  ;;  %v3896_v9 = vmax.f32 %v3484_v16, 0.0  ;;  %v3694_v34 = vmax.f32 %v2676_v40, 0.0  ;;  %v4944_v42 = vpack.c.bf16 %v7679_v29, %v7679_v29  ;;  %4569 = vst.msk [vmem:[%s6841_s28 + $0x64] sm:$0xf] %vm4536_vm0, %v4939_v55 }
 0x276   : > { %v3894_v59 = vmax.f32 %v3476_v13, 0.0  ;;  %v4925_v22 = vpack.c.bf16 %v4323_v52, %v4323_v52  ;;  %v4224_v25 = vmax.f32 %v7567_v11, %v3696_v10  ;;  %v2687_v56 = vadd.f32 %v7512_v32, %v5371_v36 }
 0x277   : > { %v7703_v0 = vadd.f32 %v7618_v3, %v4290_v21  ;;  %v4248_v60 = vmax.f32 %v7570_v12, %v3896_v9  ;;  %v4222_v17 = vmax.f32 %v7573_v35, %v3694_v34  ;;  %v3487_v23 = vadd.f32 %v7512_v32, %v5571_v33  ;;  %4574 = vst.msk [vmem:[%s6841_s28 + $0x78] sm:$0xf] %vm4536_vm0, %v4944_v42 }
 0x278   : > { %v4246_v39 = vmax.f32 %v7576_v4, %v3894_v59  ;;  %4553 = vst.msk [vmem:[%s6841_s28 + $0x2c] sm:$0xf] %vm4536_vm0, %v4925_v22  ;;  %v4275_v57 = vmul.f32 %v7581_v58, %v4224_v25  ;;  %v3697_v20 = vmax.f32 %v2687_v56, 0.0  ;;  %v2679_v11 = vadd.f32 %v7512_v32, %v2678_v37 }
 0x279   : > { %v4296_v28 = vmul.f32 %v7581_v58, %v4245_v48  ;;  %v4273_v45 = vmul.f32 %v7581_v58, %v4222_v17  ;;  %v3479_v12 = vadd.f32 %v7512_v32, %v3478_v19  ;;  %v5374_v35 = vpop.f32.mrb[192].mxu0  ;;  %v3897_v13 = vmax.f32 %v3487_v23, 0.0 }
 0x27a   : > { %v4297_v21 = vmul.f32 %v7581_v58, %v4246_v39  ;;  %v5574_v16 = vpop.f32.mrb[192].mxu1  ;;  %v4326_v4 = vadd.f32 %v7618_v3, %v4275_v57  ;;  %v4225_v40 = vmax.f32 %v7604_v63, %v3697_v20  ;;  %v3695_v36 = vmax.f32 %v2679_v11, 0.0  ;;  %v2691_v52 = vpop.f32.mrb[193].mxu0 }
 0x27b   : > { %v3491_v33 = vpop.f32.mrb[193].mxu1  ;;  %v4942_v10 = vpack.c.bf16 %v7696_v43, %v7696_v43  ;;  %v4324_v48 = vadd.f32 %v7618_v3, %v4273_v45  ;;  %v3895_v9 = vmax.f32 %v3479_v12, 0.0  ;;  %v5375_v19 = vpop.f32.mrb[194].mxu0  ;;  %v4249_v22 = vmax.f32 %v7607_v54, %v3897_v13 }
 0x27c   : > { %v4348_v37 = vadd.f32 %v7618_v3, %v4297_v21  ;;  %v5575_v34 = vpop.f32.mrb[194].mxu1  ;;  %v4928_v59 = vpack.c.bf16 %v4326_v4, %v4326_v4  ;;  %v4276_v63 = vmul.f32 %v7581_v58, %v4225_v40  ;;  %v4223_v25 = vmax.f32 %v7555_v14, %v3695_v36  ;;  %v2694_v56 = vpop.f32.mrb[195].mxu0 }
 0x27d   : > { %v3494_v17 = vpop.f32.mrb[195].mxu1  ;;  %v4943_v39 = vpack.c.bf16 %v7703_v0, %v7703_v0  ;;  %v4926_v57 = vpack.c.bf16 %v4324_v48, %v4324_v48  ;;  %v4247_v23 = vmax.f32 %v7558_v61, %v3895_v9  ;;  %v4347_v11 = vadd.f32 %v7618_v3, %v4296_v28  ;;  %4572 = vst.msk [vmem:[%s6841_s28 + $0x70] sm:$0xf] %vm4536_vm0, %v4942_v10 }
 0x27e   : > { %v4950_v20 = vpack.c.bf16 %v4348_v37, %v4348_v37  ;;  %4556 = vst.msk [vmem:[%s6841_s28 + $0x38] sm:$0xf] %vm4536_vm0, %v4928_v59  ;;  %v4327_v45 = vadd.f32 %v7618_v3, %v4276_v63  ;;  %v4274_v54 = vmul.f32 %v7581_v58, %v4223_v25  ;;  %v2700_v14 = vadd.f32 %v7512_v32, %v5374_v35 }
 0x27f   : > { %4554 = vst.msk [vmem:[%s6841_s28 + $0x30] sm:$0xf] %vm4536_vm0, %v4926_v57  ;;  %v4298_v21 = vmul.f32 %v7581_v58, %v4247_v23  ;;  %v3500_v12 = vadd.f32 %v7512_v32, %v5574_v16  ;;  %v2692_v61 = vadd.f32 %v7512_v32, %v2691_v52  ;;  %v3492_v28 = vadd.f32 %v7512_v32, %v3491_v33 }
 0x280   : > { %v4299_v4 = vmul.f32 %v7581_v58, %v4248_v60  ;;  %4582 = vst.msk [vmem:[%s6841_s28 + $0x90] sm:$0xf] %vm4536_vm0, %v4950_v20  ;;  %v4929_v40 = vpack.c.bf16 %v4327_v45, %v4327_v45  ;;  %v4325_v35 = vadd.f32 %v7618_v3, %v4274_v54  ;;  %v3700_v55 = vmax.f32 %v2700_v14, 0.0  ;;  %4573 = vst.msk [vmem:[%s6841_s28 + $0x74] sm:$0xf] %vm4536_vm0, %v4943_v39 }
 0x281   : > { %v4349_v13 = vadd.f32 %v7618_v3, %v4298_v21  ;;  %v3900_v36 = vmax.f32 %v3500_v12, 0.0  ;;  %v3698_v48 = vmax.f32 %v2692_v61, 0.0  ;;  %v3898_v37 = vmax.f32 %v3492_v28, 0.0  ;;  %v5378_v16 = vpop.f32.mrb[196].mxu0 }
 0x282   : > { %v4949_v9 = vpack.c.bf16 %v4347_v11, %v4347_v11  ;;  %4557 = vst.msk [vmem:[%s6841_s28 + $0x3c] sm:$0xf] %vm4536_vm0, %v4929_v40  ;;  %v4927_v52 = vpack.c.bf16 %v4325_v35, %v4325_v35  ;;  %v4228_v60 = vmax.f32 %v7610_v51, %v3700_v55  ;;  %v2703_v33 = vadd.f32 %v7512_v32, %v5375_v19  ;;  %v2707_v59 = vpop.f32.mrb[197].mxu0 }
 0x283   : > { %v4951_v63 = vpack.c.bf16 %v4349_v13, %v4349_v13  ;;  %v4252_v25 = vmax.f32 %v7613_v1, %v3900_v36  ;;  %v4226_v57 = vmax.f32 %v7624_v53, %v3698_v48  ;;  %v4250_v20 = vmax.f32 %v7627_v7, %v3898_v37  ;;  %v5379_v23 = vpop.f32.mrb[198].mxu0 }
 0x284   : > { %4555 = vst.msk [vmem:[%s6841_s28 + $0x34] sm:$0xf] %vm4536_vm0, %v4927_v52  ;;  %v4279_v51 = vmul.f32 %v7581_v58, %v4228_v60  ;;  %v3701_v19 = vmax.f32 %v2703_v33, 0.0  ;;  %v3503_v11 = vadd.f32 %v7512_v32, %v5575_v34  ;;  %v2695_v26 = vadd.f32 %v7512_v32, %v2694_v56  ;;  %v2710_v45 = vpop.f32.mrb[199].mxu0  ;;  %4581 = vst.msk [vmem:[%s6841_s28 + $0x8c] sm:$0xf] %vm4536_vm0, %v4949_v9 }
 0x285   : > { %v4350_v8 = vadd.f32 %v7618_v3, %v4299_v4  ;;  %4583 = vst.msk [vmem:[%s6841_s28 + $0x94] sm:$0xf] %vm4536_vm0, %v4951_v63  ;;  %v4277_v1 = vmul.f32 %v7581_v58, %v4226_v57  ;;  %v4301_v53 = vmul.f32 %v7581_v58, %v4250_v20  ;;  %v3495_v7 = vadd.f32 %v7512_v32, %v3494_v17 }
 0x286   : > { %v4330_v34 = vadd.f32 %v7618_v3, %v4279_v51  ;;  %v4229_v56 = vmax.f32 %v7654_v2, %v3701_v19  ;;  %v3901_v54 = vmax.f32 %v3503_v11, 0.0  ;;  %v3699_v14 = vmax.f32 %v2695_v26, 0.0 }
 0x287   : > { %v4300_v41 = vmul.f32 %v7581_v58, %v4249_v22  ;;  %v4328_v18 = vadd.f32 %v7618_v3, %v4277_v1  ;;  %v4352_v21 = vadd.f32 %v7618_v3, %v4301_v53  ;;  %v3899_v12 = vmax.f32 %v3495_v7, 0.0 }
 0x288   : > { %v4932_v61 = vpack.c.bf16 %v4330_v34, %v4330_v34  ;;  %v4280_v17 = vmul.f32 %v7581_v58, %v4229_v56  ;;  %v7785_v28 = vmax.f32 %v7657_v62, %v3901_v54  ;;  %v4227_v2 = vmax.f32 %v7598_v30, %v3699_v14  ;;  %v4563_v56 = vld [vmem:[%s6841_s28 + $0x54] sm:$0x1] }
 0x289   : > { %v4294_v4 = vmul.f32 %v7581_v58, %v7674_v24  ;;  %v4930_v22 = vpack.c.bf16 %v4328_v18, %v4328_v18  ;;  %v4954_v40 = vpack.c.bf16 %v4352_v21, %v4352_v21  ;;  %v4251_v35 = vmax.f32 %v7601_v31, %v3899_v12  ;;  %v4576_v21 = vld [vmem:[%s6841_s28 + $0x80] sm:$0x1] }
 0x28a   : > { %v4952_v55 = vpack.c.bf16 %v4350_v8, %v4350_v8  ;;  %4560 = vst.msk [vmem:[%s6841_s28 + $0x48] sm:$0xf] %vm4536_vm0, %v4932_v61  ;;  %v4331_v13 = vadd.f32 %v7618_v3, %v4280_v17  ;;  %v4278_v62 = vmul.f32 %v7581_v58, %v4227_v2  ;;  %v2716_v36 = vadd.f32 %v7512_v32, %v5378_v16  ;;  %v4589_v2 = vld [vmem:[%s6841_s28 + $0xac] sm:$0x1] }
 0x28b   : > { %4558 = vst.msk [vmem:[%s6841_s28 + $0x40] sm:$0xf] %vm4536_vm0, %v4930_v22  ;;  %v4302_v30 = vmul.f32 %v7581_v58, %v4251_v35  ;;  %v2708_v31 = vadd.f32 %v7512_v32, %v2707_v59  ;;  %v2719_v24 = vadd.f32 %v7512_v32, %v5379_v23  ;;  %v2711_v48 = vadd.f32 %v7512_v32, %v2710_v45 }
 0x28c   : > { %v4351_v37 = vadd.f32 %v7618_v3, %v4300_v41  ;;  %4586 = vst.msk [vmem:[%s6841_s28 + $0xa0] sm:$0xf] %vm4536_vm0, %v4954_v40  ;;  %v4933_v0 = vpack.c.bf16 %v4331_v13, %v4331_v13  ;;  %v4329_v39 = vadd.f32 %v7618_v3, %v4278_v62  ;;  %v3704_v16 = vmax.f32 %v2716_v36, 0.0  ;;  %4584 = vst.msk [vmem:[%s6841_s28 + $0x98] sm:$0xf] %vm4536_vm0, %v4952_v55 }
 0x28d   : > { %v4353_v9 = vadd.f32 %v7618_v3, %v4302_v30  ;;  %v3702_v32 = vmax.f32 %v2708_v31, 0.0  ;;  %v3705_v52 = vmax.f32 %v2719_v24, 0.0  ;;  %v3703_v60 = vmax.f32 %v2711_v48, 0.0 }
 0x28e   : > { %v4295_v46 = vmul.f32 %v7581_v58, %v7651_v44  ;;  %v4303_v15 = vmul.f32 %v7581_v58, %v4252_v25  ;;  %4561 = vst.msk [vmem:[%s6841_s28 + $0x4c] sm:$0xf] %vm4536_vm0, %v4933_v0  ;;  %v4931_v33 = vpack.c.bf16 %v4329_v39, %v4329_v39  ;;  %v4232_v59 = vmax.f32 %v6778_v50, %v3704_v16 }
 0x28f   : > { %v4955_v63 = vpack.c.bf16 %v4353_v9, %v4353_v9  ;;  %v4230_v57 = vmax.f32 %v7671_v6, %v3702_v32  ;;  %v4233_v20 = vmax.f32 %v6790_v49, %v3705_v52  ;;  %v4231_v44 = vmax.f32 %v7648_v47, %v3703_v60 }
 0x290   : > { %v4953_v23 = vpack.c.bf16 %v4351_v37, %v4351_v37  ;;  %4559 = vst.msk [vmem:[%s6841_s28 + $0x44] sm:$0xf] %vm4536_vm0, %v4931_v33  ;;  %v4283_v25 = vmul.f32 %v7581_v58, %v4232_v59  ;;  %v4345_v50 = vadd.f32 %v7618_v3, %v4294_v4  ;;  %v4343_v29 = vadd.f32 %v7618_v3, %v7692_v27 }
 0x291   : > { %4587 = vst.msk [vmem:[%s6841_s28 + $0xa4] sm:$0xf] %vm4536_vm0, %v4955_v63  ;;  %v4281_v6 = vmul.f32 %v7581_v58, %v4230_v57  ;;  %v4284_v49 = vmul.f32 %v7581_v58, %v4233_v20  ;;  %v4282_v47 = vmul.f32 %v7581_v58, %v4231_v44  ;;  %v4346_v42 = vadd.f32 %v7618_v3, %v4295_v46 }
 0x292   : > { %4585 = vst.msk [vmem:[%s6841_s28 + $0x9c] sm:$0xf] %vm4536_vm0, %v4953_v23  ;;  %v4334_v43 = vadd.f32 %v7618_v3, %v4283_v25  ;;  %v4354_v10 = vadd.f32 %v7618_v3, %v4303_v15  ;;  %v4947_v26 = vpack.c.bf16 %v4345_v50, %v4345_v50  ;;  %v4945_v53 = vpack.c.bf16 %v4343_v29, %v4343_v29 }
 0x293   : > { %v4332_v51 = vadd.f32 %v7618_v3, %v4281_v6  ;;  %v4335_v19 = vadd.f32 %v7618_v3, %v4284_v49  ;;  %v4333_v11 = vadd.f32 %v7618_v3, %v4282_v47  ;;  %v4293_v7 = vmul.f32 %v7581_v58, %v6912_v38 }
 0x294   : > { %v4936_v27 = vpack.c.bf16 %v4334_v43, %v4334_v43  ;;  %v4948_v34 = vpack.c.bf16 %v4346_v42, %v4346_v42  ;;  %v4956_v54 = vpack.c.bf16 %v4354_v10, %v4354_v10  ;;  %4579 = vst.msk [vmem:[%s6841_s28 + $0x84] sm:$0xf] %vm4536_vm0, %v4947_v26  ;;  %4575 = vst.msk [vmem:[%s6841_s28 + $0x7c] sm:$0xf] %vm4536_vm0, %v4945_v53 }
 0x295   : > { %v4934_v45 = vpack.c.bf16 %v4332_v51, %v4332_v51  ;;  %v4937_v8 = vpack.c.bf16 %v4335_v19, %v4335_v19  ;;  %v4935_v1 = vpack.c.bf16 %v4333_v11, %v4333_v11  ;;  %v4344_v38 = vadd.f32 %v7618_v3, %v4293_v7 }
 0x296   : > { %4566 = vst.msk [vmem:[%s6841_s28 + $0x58] sm:$0xf] %vm4536_vm0, %v4936_v27  ;;  %4580 = vst.msk [vmem:[%s6841_s28 + $0x88] sm:$0xf] %vm4536_vm0, %v4948_v34  ;;  %v4304_v18 = vmul.f32 %v7581_v58, %v7785_v28 }
 0x297   : > { %4562 = vst.msk [vmem:[%s6841_s28 + $0x50] sm:$0xf] %vm4536_vm0, %v4934_v45  ;;  %4567 = vst.msk [vmem:[%s6841_s28 + $0x5c] sm:$0xf] %vm4536_vm0, %v4937_v8  ;;  %v4564_v14 = vsel %vm6923_vm3, %v4935_v1, %v4563_v56  ;;  %v4946_v41 = vpack.c.bf16 %v4344_v38, %v4344_v38 }
 0x298   : > { %4565 = vst [vmem:[%s6841_s28 + $0x54] sm:$0x1] %v4564_v14  ;;  %4588 = vst.msk [vmem:[%s6841_s28 + $0xa8] sm:$0xf] %vm4536_vm0, %v4956_v54  ;;  %v4355_v61 = vadd.f32 %v7618_v3, %v4304_v18 }
 0x299   : > { %v4577_v12 = vsel %vm6923_vm3, %v4946_v41, %v4576_v21 }
 0x29a   : > { %4578 = vst [vmem:[%s6841_s28 + $0x80] sm:$0x1] %v4577_v12  ;;  %v4957_v17 = vpack.c.bf16 %v4355_v61, %v4355_v61 }
 0x29c   : > { %v4590_v4 = vsel %vm6923_vm3, %v4957_v17, %v4589_v2 }
 0x29d   : > { %4591 = vst [vmem:[%s6841_s28 + $0xac] sm:$0x1] %v4590_v4 }
 0x29e PF: > { %s15_s18 = sadd.s32 1, %s5819_s18  }
 0x29f   : > { %p12_p4 = scmp.ge.s32.totalorder %s15_s18, 4  }
 0x2a1   :  { %14 = sbr.rel (!%p12_p4) target bundleno = 1 (0x1), region = 70 }

// kernel: tfnet_forward.3
= control target key start
LH: loop header
LB: loop body
LE: loop exit
PB: predicated region body
PF: predicated region fallthrough
CT: control target
= control target key end

     0   :  { %16 = vsyncpa [#allocation3], 0  ;;  %s4743_s0 = inlined_call_operand.vmem [shape: bf16[128,1600], index: 0, kind: input, shape index: {}]   ;;  %s4744_s1 = inlined_call_operand.vmem [shape: bf16[1600,128], index: 1, kind: input, shape index: {}]   ;;  %s4745_s2 = inlined_call_operand.vmem [shape: f32[1,128], index: 2, kind: input, shape index: {}]   ;;  %s4746_s3 = inlined_call_operand.vmem [shape: f32[1,128], index: 3, kind: input, shape index: {}]   ;;  %s4747_s4 = inlined_call_operand.vmem [shape: f32[1,128], index: 4, kind: input, shape index: {}]   ;;  %s4748_s5 = inlined_call_operand.vmem [shape: bf16[128,384], index: 5, kind: input, shape index: {}]   ;;  %s4749_s6 = inlined_call_operand.vmem [shape: f32[1,384], index: 6, kind: input, shape index: {}]   ;;  %s4750_s7 = inlined_call_operand.vmem [shape: bf16[384,192], index: 7, kind: input, shape index: {}]   ;;  %s4751_s8 = inlined_call_operand.vmem [shape: f32[1,192], index: 8, kind: input, shape index: {}]   ;;  %s4752_s9 = inlined_call_operand.vmem [shape: bf16[192,128], index: 9, kind: input, shape index: {}]   ;;  %s4753_s10 = inlined_call_operand.vmem [shape: f32[1,128], index: 10, kind: input, shape index: {}]   ;;  %s4754_s11 = inlined_call_operand.hbm [shape: f32[2,4,128], index: 11, kind: output, shape index: {}]  }
   0x1   :  { %18 = vsyncpa [#allocation3 + $0x1], 0  ;;  %s3951_s17 = smov 0   ;;  %s3953_s18 = smov 0  }
   0x2   :  { %s3955_s19 = smov 0   ;;  %s3957_s20 = smov 0  }
   0x3 LB: > { %s3972_s21 = sadd.s32 4294967295, %s3885_s20   ;;  %s2933_s22 = sadd.s32 4294967294, %s3885_s20   ;;  %s3885_s20 = sphi %s3957_s20, %s4762_s20   ;;  %s3881_s19 = sphi %s3955_s19, %s4761_s19   ;;  %s3877_s18 = sphi %s3953_s18, %s4760_s18   ;;  %s3873_s17 = sphi %s3951_s17, %s4759_s17  }
   0x4   : > { %s3976_s23 = sadd.s32 1, %s3885_s20   ;;  %s267_s24 = sadd.s32 1, %s3881_s19 }
   0x5   : > { %s264_s25 = ssub.s32 %s3885_s20, %s3976_s23  ;;  %p277_p0 = scmp.ne.s32.totalorder %s3881_s19, %s3877_s18 }
   0x6   : > { %p265_p1 = scmp.eq.s32.totalorder %s264_s25, 0  ;;  %p278_p2 = scmp.eq.s32.totalorder %s3972_s21, 1 }
   0x7   : > { %p283_p3 = scmp.ne.s32.totalorder %s3877_s18, %s3873_s17  ;;  %p284_p4 = scmp.eq.s32.totalorder %s2933_s22, 1 }
   0x8   : > { %s3987_s26 = scalar_select %p265_p1, %s3881_s19, %s267_s24  }
   0x9   : > { %p3989_p5 = por %p278_p2, %p277_p0  ;;  %p3993_p6 = por %p284_p4, %p283_p3 }
   0xa   : > { %4755 = sst [smem:[#allocation5_spill]] %s3987_s26  ;;  %p2936_p7 = scmp.ge.s32.totalorder %s3885_s20, 1 }
   0xb   : > { %p342_p8 = scmp.lt.s32.totalorder %s3885_s20, 3 }
   0xd   : > { %p343_p9 = pnand %p2936_p7, %p342_p8 }
   0xe   : > { %v3531_v0 = vld [vmem:[%s4744_s1 + $0x40] sm:$0xff] (!%p343_p9)   ;;  %v3535_v4 = vld [vmem:[%s4744_s1 + $0x48] sm:$0xff] (!%p343_p9)   ;;  %v3539_v8 = vld [vmem:[%s4744_s1 + $0x50] sm:$0xff] (!%p343_p9)   ;;  %s2938_s24 = sshll.u32 (!%p343_p9), %s3972_s21, 3  ;;  %vm1514_vm0 = vcmask (!%p343_p9), 523264   ;;  %vm3889_vm1 = vmmov (!%p343_p9), 0  }
   0xf   : > { %346 = sbr.rel (%p343_p9) target bundleno = 1098 (0x44a), region = 64  ;;  %v3532_v1 = vld [vmem:[%s4744_s1] sm:$0xff] (!%p343_p9)   ;;  %3189 = vmatprep.subr.bf16.mxu0 (!%p343_p9), %v3531_v0  ;;  %v3536_v5 = vld [vmem:[%s4744_s1 + $0x8] sm:$0xff] (!%p343_p9)   ;;  %v3540_v9 = vld [vmem:[%s4744_s1 + $0x10] sm:$0xff] (!%p343_p9)   ;;  %p384_p10 = scmp.lt.s32.totalorder (!%p343_p9), %s2938_s24, 15  ;;  %vm2102_vm2 = vcmask (!%p343_p9), 1041409  }
  0x10   : > { %v3533_v2 = vld [vmem:[%s4744_s1 + $0xc0] sm:$0xff] (!%p343_p9)   ;;  %3190 = vmatpush3.bf16.msra.mxu0 (!%p343_p9), %v3532_v1  ;;  %v3537_v6 = vld [vmem:[%s4744_s1 + $0xc8] sm:$0xff] (!%p343_p9)   ;;  %v3541_v10 = vld [vmem:[%s4744_s1 + $0xd0] sm:$0xff] (!%p343_p9)   ;;  %vm2105_vm3 = vcmask (!%p343_p9), 1042434   ;;  %vm2108_vm4 = vcmask (!%p343_p9), 1043459  }
  0x11   : > { %v3534_v3 = vld [vmem:[%s4744_s1 + $0x80] sm:$0xff] (!%p343_p9)   ;;  %3229 = vmatprep.subr.bf16.mxu1 (!%p343_p9), %v3533_v2  ;;  %3191 = vmatprep.subr.bf16.mxu0 (!%p343_p9), %v3535_v4  ;;  %v3538_v7 = vld [vmem:[%s4744_s1 + $0x88] sm:$0xff] (!%p343_p9)   ;;  %v3542_v11 = vld [vmem:[%s4744_s1 + $0x90] sm:$0xff] (!%p343_p9)  }
  0x12   : > { %3230 = vmatpush3.bf16.msra.mxu1 (!%p343_p9), %v3534_v3  ;;  %v3543_v12 = vld [vmem:[%s4744_s1 + $0x58] sm:$0xff] (!%p343_p9)   ;;  %v3547_v16 = vld [vmem:[%s4744_s1 + $0x60] sm:$0xff] (!%p343_p9)   ;;  %v3551_v20 = vld [vmem:[%s4744_s1 + $0x68] sm:$0xff] (!%p343_p9)  }
  0x13   : > { %3231 = vmatprep.subr.bf16.mxu1 (!%p343_p9), %v3537_v6  ;;  %v3544_v13 = vld [vmem:[%s4744_s1 + $0x18] sm:$0xff] (!%p343_p9)   ;;  %v3548_v17 = vld [vmem:[%s4744_s1 + $0x20] sm:$0xff] (!%p343_p9)   ;;  %v3552_v21 = vld [vmem:[%s4744_s1 + $0x28] sm:$0xff] (!%p343_p9)  }
  0x14   : > { %3192 = vmatpush3.bf16.msra.mxu0 (!%p343_p9), %v3536_v5  ;;  %v3545_v14 = vld [vmem:[%s4744_s1 + $0xd8] sm:$0xff] (!%p343_p9)   ;;  %v3549_v18 = vld [vmem:[%s4744_s1 + $0xe0] sm:$0xff] (!%p343_p9)   ;;  %v3553_v22 = vld [vmem:[%s4744_s1 + $0xe8] sm:$0xff] (!%p343_p9)  }
  0x15   : > { %3193 = vmatprep.subr.bf16.mxu0 (!%p343_p9), %v3539_v8  ;;  %v3546_v15 = vld [vmem:[%s4744_s1 + $0x98] sm:$0xff] (!%p343_p9)   ;;  %v3550_v19 = vld [vmem:[%s4744_s1 + $0xa0] sm:$0xff] (!%p343_p9)   ;;  %v3554_v23 = vld [vmem:[%s4744_s1 + $0xa8] sm:$0xff] (!%p343_p9)  }
  0x16   : > { %3232 = vmatpush3.bf16.msra.mxu1 %v3538_v7  ;;  %s4764_s24 = smov (!%p384_p10, %s2938_s24), 15  ;;  %v3555_v24 = vld [vmem:[%s4744_s1 + $0x70] sm:$0xff]   ;;  %v3559_v28 = vld [vmem:[%s4744_s1 + $0x78] sm:$0xff]   ;;  %v3566_v34 = vld [vmem:[%s4744_s1 + $0x140] sm:$0xff]  }
  0x17   : > { %3233 = vmatprep.subr.bf16.mxu1 %v3541_v10  ;;  %s3488_s13 = smul.u32 52, %s4764_s24  ;;  %v3556_v25 = vld [vmem:[%s4744_s1 + $0x30] sm:$0xff]   ;;  %v3560_v29 = vld [vmem:[%s4744_s1 + $0x38] sm:$0xff]   ;;  %v3570_v37 = vld [vmem:[%s4744_s1 + $0x100] sm:$0xff]   ;;  %s3186_s24 = sshll.u32 %s3972_s21, 6 }
  0x18   : > { %3194 = vmatpush3.bf16.msra.mxu0 %v3540_v9  ;;  %v3557_v26 = vld [vmem:[%s4744_s1 + $0xf0] sm:$0xff]   ;;  %v3561_v30 = vld [vmem:[%s4744_s1 + $0xf8] sm:$0xff]   ;;  %v3571_v38 = vld [vmem:[%s4744_s1 + $0x1c0] sm:$0xff]   ;;  %s4701_s16 = scalar_lea.hbm %s4754_s11, %s3186_s24 }
  0x19   : > { %3195 = vmatprep.subr.bf16.mxu0 %v3543_v12  ;;  %v3558_v27 = vld [vmem:[%s4744_s1 + $0xb0] sm:$0xff]   ;;  %s4090_s26 = scalar_lea.vmem %s4743_s0, %s3488_s13  ;;  %v3565_v33 = vld [vmem:[%s4744_s1 + $0xb8] sm:$0xff]   ;;  %v3572_v39 = vld [vmem:[%s4744_s1 + $0x180] sm:$0xff]   ;;  %s380_s13 = sand.u32 1, %s3877_s18  }
  0x1a   : > { %3234 = vmatpush3.bf16.msra.mxu1 %v3542_v11  ;;  %v3562_v31 = vld [vmem:[%s4090_s26] ss:$52 sps:$4 sm:$0xff]   ;;  %v3564_v32 = vld [vmem:[%s4090_s26 + $0x4] ss:$52 sps:$4 sm:$0xff]   ;;  %v3567_v35 = vld [vmem:[%s4090_s26 + $0x8] ss:$52 sps:$4 sm:$0xff]  }
  0x1b   : > { %3235 = vmatprep.subr.bf16.mxu1 %v3545_v14  ;;  %1559 = vmatprep.mubr.bf16.mxu0 %v3564_v32  ;;  %v3569_v36 = vld [vmem:[%s4090_s26 + $0xc] ss:$52 sps:$4 sm:$0xff]   ;;  %v3579_v45 = vld [vmem:[%s4090_s26 + $0x68] ss:$52 sps:$4 sm:$0xff]   ;;  %v3580_v46 = vld [vmem:[%s4744_s1 + $0x150] sm:$0xff]   ;;  %s2937_s25 = sshll.u32 %s380_s13, 2 }
  0x1c   : > { %3196 = vmatpush3.bf16.msra.mxu0 %v3544_v13  ;;  %1624 = vmatprep.mubr.bf16.mxu1 %v3569_v36  ;;  %v3573_v40 = vld [vmem:[%s4744_s1 + $0x148] sm:$0xff]   ;;  %v3583_v48 = vld [vmem:[%s4744_s1 + $0x110] sm:$0xff]   ;;  %v3587_v52 = vld [vmem:[%s4744_s1 + $0x158] sm:$0xff]   ;;  %s382_s12 = scalar_lea.vmem [#allocation2], %s2937_s25  ;;  %s2861_s22 = scalar_lea.sflag [#allocation3], %s380_s13 }
  0x1d   : > { %3197 = vmatprep.subr.bf16.mxu0 %v3547_v16  ;;  %v3574_v41 = vld [vmem:[%s4744_s1 + $0x108] sm:$0xff]   ;;  %v3584_v49 = vld [vmem:[%s4090_s26 + $0x70] ss:$52 sps:$4 sm:$0xff]   ;;  %v3588_v53 = vld [vmem:[%s4744_s1 + $0x118] sm:$0xff]   ;;  %s3890_s25 = smov [#allocation2]  }
  0x1e   : > { %3236 = vmatpush3.bf16.msra.mxu1 %v3546_v15  ;;  %v3575_v42 = vld [vmem:[%s4744_s1 + $0x1c8] sm:$0xff]   ;;  %v3585_v50 = vld [vmem:[%s4744_s1 + $0x1d0] sm:$0xff]   ;;  %v3589_v54 = vld [vmem:[%s4744_s1 + $0x1d8] sm:$0xff]   ;;  %s3827_s29 = sshll.u32 %s3890_s25, 4  ;;  %s3828_s29 = int_to_ptr.vmem [resolvable:$false] %s3827_s29 }
  0x1f   : > { %3237 = vmatprep.subr.bf16.mxu1 %v3549_v18  ;;  %v3576_v43 = vld [vmem:[%s4090_s26 + $0x6c] ss:$52 sps:$4 sm:$0xff]   ;;  %v3581_v47 = vld [vmem:[%s4090_s26 + $0x74] ss:$52 sps:$4 sm:$0xff]   ;;  %v3592_v56 = vld [vmem:[%s4744_s1 + $0x198] sm:$0xff]   ;;  %s3829_s30 = scalar_lea.vmem %s3828_s29, 128 }
  0x20   : > { %3198 = vmatpush3.bf16.msra.mxu0 %v3548_v17  ;;  %v3578_v44 = vld [vmem:[%s4744_s1 + $0x188] sm:$0xff]   ;;  %v3586_v51 = vld [vmem:[%s4744_s1 + $0x190] sm:$0xff]   ;;  %v3594_v58 = vld [vmem:[%s4744_s1 + $0x160] sm:$0xff]  }
  0x21   : > { %3199 = vmatprep.subr.bf16.mxu0 %v3551_v20  ;;  %v3590_v55 = vld [vmem:[%s4090_s26 + $0xd4] ss:$52 sps:$4 sm:$0xff]   ;;  %v3593_v57 = vld [vmem:[%s4090_s26 + $0xd0] ss:$52 sps:$4 sm:$0xff]   ;;  %v3598_v61 = vld [vmem:[%s4090_s26 + $0xd8] ss:$52 sps:$4 sm:$0xff]  }
  0x22   : > { %3238 = vmatpush3.bf16.msra.mxu1 %v3550_v19  ;;  %v3595_v59 = vld [vmem:[%s4090_s26 + $0xdc] ss:$52 sps:$4 sm:$0xff]   ;;  %v3597_v60 = vld [vmem:[%s4744_s1 + $0x120] sm:$0xff]   ;;  %v3601_v0 = vld [vmem:[%s4744_s1 + $0x168] sm:$0xff]  }
  0x23   : > { %3239 = vmatprep.subr.bf16.mxu1 %v3553_v22  ;;  %v3599_v62 = vld [vmem:[%s4744_s1 + $0x1e0] sm:$0xff]   ;;  %v3602_v1 = vld [vmem:[%s4744_s1 + $0x128] sm:$0xff]   ;;  %v3604_v3 = vld [vmem:[%s4090_s26 + $0x13c] ss:$52 sps:$4 sm:$0xff]  }
  0x24   : > { %3200 = vmatpush3.bf16.msra.mxu0 %v3552_v21  ;;  %v3600_v63 = vld [vmem:[%s4744_s1 + $0x1a0] sm:$0xff]   ;;  %v3603_v2 = vld [vmem:[%s4744_s1 + $0x1e8] sm:$0xff]   ;;  %v3608_v6 = vld [vmem:[%s4744_s1 + $0x170] sm:$0xff]  }
  0x25   : > { %3201 = vmatprep.subr.bf16.mxu0 %v3555_v24  ;;  %v3606_v4 = vld [vmem:[%s4744_s1 + $0x1a8] sm:$0xff]   ;;  %v3609_v7 = vld [vmem:[%s4090_s26 + $0x144] ss:$52 sps:$4 sm:$0xff]   ;;  %v3611_v8 = vld [vmem:[%s4744_s1 + $0x130] sm:$0xff]  }
  0x26   : > { %3240 = vmatpush3.bf16.msra.mxu1 %v3554_v23  ;;  %v3607_v5 = vld [vmem:[%s4090_s26 + $0x138] ss:$52 sps:$4 sm:$0xff]   ;;  %v3612_v9 = vld [vmem:[%s4090_s26 + $0x140] ss:$52 sps:$4 sm:$0xff]   ;;  %v3618_v15 = vld [vmem:[%s4090_s26 + $0x10] ss:$52 sps:$4 sm:$0xff]  }
  0x27   : > { %3241 = vmatprep.subr.bf16.mxu1 %v3557_v26  ;;  %v3613_v10 = vld [vmem:[%s4744_s1 + $0x1f0] sm:$0xff]   ;;  %v3615_v12 = vld [vmem:[%s4744_s1 + $0x178] sm:$0xff]   ;;  %v3622_v18 = vld [vmem:[%s4744_s1 + $0x240] sm:$0xff]  }
  0x28   : > { %3202 = vmatpush3.bf16.msra.mxu0 %v3556_v25  ;;  %v3614_v11 = vld [vmem:[%s4744_s1 + $0x1b0] sm:$0xff]   ;;  %v3616_v13 = vld [vmem:[%s4744_s1 + $0x138] sm:$0xff]   ;;  %v3626_v21 = vld [vmem:[%s4744_s1 + $0x200] sm:$0xff]  }
  0x29   : > { %3203 = vmatprep.subr.bf16.mxu0 %v3559_v28  ;;  %v3617_v14 = vld [vmem:[%s4744_s1 + $0x1f8] sm:$0xff]   ;;  %v3620_v16 = vld [vmem:[%s4090_s26 + $0x14] ss:$52 sps:$4 sm:$0xff]   ;;  %v3627_v22 = vld [vmem:[%s4744_s1 + $0x2c0] sm:$0xff]  }
  0x2a   : > { %3242 = vmatpush3.bf16.msra.mxu1 %v3558_v27  ;;  %v3621_v17 = vld [vmem:[%s4744_s1 + $0x1b8] sm:$0xff]   ;;  %v3628_v23 = vld [vmem:[%s4744_s1 + $0x280] sm:$0xff]   ;;  %v3629_v24 = vld [vmem:[%s4744_s1 + $0x248] sm:$0xff]  }
  0x2b   : > { %3243 = vmatprep.subr.bf16.mxu1 %v3561_v30  ;;  %v3623_v19 = vld [vmem:[%s4090_s26 + $0x18] ss:$52 sps:$4 sm:$0xff]   ;;  %v3625_v20 = vld [vmem:[%s4090_s26 + $0x1c] ss:$52 sps:$4 sm:$0xff]  }
  0x2c   : > { %3204 = vmatpush3.bf16.msra.mxu0 %v3560_v29  ;;  %v3630_v25 = vld [vmem:[%s4744_s1 + $0x208] sm:$0xff]   ;;  %v3632_v27 = vld [vmem:[%s4090_s26 + $0x7c] ss:$52 sps:$4 sm:$0xff]  }
  0x2d   : > { %3269 = vmatprep.subr.bf16.mxu0 %v3566_v34  ;;  %v3631_v26 = vld [vmem:[%s4744_s1 + $0x2c8] sm:$0xff]   ;;  %v3636_v30 = vld [vmem:[%s4744_s1 + $0x250] sm:$0xff]   ;;  %v3643_v36 = vld [vmem:[%s4744_s1 + $0x258] sm:$0xff]  }
  0x2e   : > { %3244 = vmatpush3.bf16.msra.mxu1 %v3565_v33  ;;  %v3634_v28 = vld [vmem:[%s4744_s1 + $0x288] sm:$0xff]   ;;  %v3639_v32 = vld [vmem:[%s4744_s1 + $0x210] sm:$0xff]  }
  0x2f   : > { %1560 = vmatmul.mubr.bf16.vlgmr.msra.gmra.mrb[0].mxu0 %v3562_v31  ;;  %3309 = vmatprep.subr.bf16.mxu1 %v3571_v38  ;;  %v3635_v29 = vld [vmem:[%s4090_s26 + $0x78] ss:$52 sps:$4 sm:$0xff]   ;;  %v3640_v33 = vld [vmem:[%s4090_s26 + $0x80] ss:$52 sps:$4 sm:$0xff]  }
  0x30   : > { %3270 = vmatpush3.bf16.msra.mxu0 %v3570_v37  ;;  %1567 = vmatprep.mubr.bf16.mxu0 %v3576_v43  ;;  %v3637_v31 = vld [vmem:[%s4090_s26 + $0x84] ss:$52 sps:$4 sm:$0xff]   ;;  %v3641_v34 = vld [vmem:[%s4744_s1 + $0x2d0] sm:$0xff]   ;;  %v3651_v43 = vld [vmem:[%s4090_s26 + $0xec] ss:$52 sps:$4 sm:$0xff]  }
  0x31   : > { %1625 = vmatmul.mubr.bf16.vlgmr.msra.gmra.mrb[0].mxu1 %v3567_v35  ;;  %3271 = vmatprep.subr.bf16.mxu0 %v3573_v40  ;;  %v3642_v35 = vld [vmem:[%s4744_s1 + $0x290] sm:$0xff]   ;;  %v3644_v37 = vld [vmem:[%s4744_s1 + $0x218] sm:$0xff]  }
  0x32   : > { %3310 = vmatpush3.bf16.msra.mxu1 %v3572_v39  ;;  %1632 = vmatprep.mubr.bf16.mxu1 %v3581_v47  ;;  %v3645_v38 = vld [vmem:[%s4744_s1 + $0x2d8] sm:$0xff]   ;;  %v3656_v47 = vld [vmem:[%s4744_s1 + $0x2a0] sm:$0xff]  }
  0x33   : > { %3311 = vmatprep.subr.bf16.mxu1 %v3575_v42  ;;  %v3646_v39 = vld [vmem:[%s4090_s26 + $0xe4] ss:$52 sps:$4 sm:$0xff]  }
  0x34   : > { %3272 = vmatpush3.bf16.msra.mxu0 %v3574_v41  ;;  %v3648_v40 = vld [vmem:[%s4744_s1 + $0x298] sm:$0xff]   ;;  %v3649_v41 = vld [vmem:[%s4090_s26 + $0xe0] ss:$52 sps:$4 sm:$0xff]  }
  0x35   : > { %3273 = vmatprep.subr.bf16.mxu0 %v3580_v46  ;;  %v3650_v42 = vld [vmem:[%s4744_s1 + $0x260] sm:$0xff]  }
  0x36   : > { %3312 = vmatpush3.bf16.msra.mxu1 %v3578_v44  ;;  %v3653_v44 = vld [vmem:[%s4744_s1 + $0x220] sm:$0xff]  }
  0x37   : > { %1568 = vmatmul.mubr.bf16.gmra.mrb[4].mxu0 %v3579_v45  ;;  %3313 = vmatprep.subr.bf16.mxu1 %v3585_v50  ;;  %v3654_v45 = vld [vmem:[%s4090_s26 + $0xe8] ss:$52 sps:$4 sm:$0xff]   ;;  %v3655_v46 = vld [vmem:[%s4744_s1 + $0x2e0] sm:$0xff]  }
  0x38   : > { %3274 = vmatpush3.bf16.msra.mxu0 %v3583_v48  ;;  %1575 = vmatprep.mubr.bf16.mxu0 %v3590_v55  ;;  %v3657_v48 = vld [vmem:[%s4744_s1 + $0x268] sm:$0xff]  }
  0x39   : > { %1633 = vmatmul.mubr.bf16.gmra.mrb[4].mxu1 %v3584_v49  ;;  %3275 = vmatprep.subr.bf16.mxu0 %v3587_v52  ;;  %v3658_v49 = vld [vmem:[%s4744_s1 + $0x228] sm:$0xff]  }
  0x3a   : > { %3314 = vmatpush3.bf16.msra.mxu1 %v3586_v51  ;;  %1640 = vmatprep.mubr.bf16.mxu1 %v3595_v59  ;;  %v3659_v50 = vld [vmem:[%s4744_s1 + $0x2e8] sm:$0xff]   ;;  %v3670_v59 = vld [vmem:[%s4744_s1 + $0x2b0] sm:$0xff]  }
  0x3b   : > { %3315 = vmatprep.subr.bf16.mxu1 %v3589_v54  ;;  %v3660_v51 = vld [vmem:[%s4090_s26 + $0x14c] ss:$52 sps:$4 sm:$0xff]   ;;  %v3664_v54 = vld [vmem:[%s4744_s1 + $0x270] sm:$0xff]  }
  0x3c   : > { %3276 = vmatpush3.bf16.msra.mxu0 %v3588_v53  ;;  %v3662_v52 = vld [vmem:[%s4744_s1 + $0x2a8] sm:$0xff]  }
  0x3d   : > { %3277 = vmatprep.subr.bf16.mxu0 %v3594_v58  ;;  %v3663_v53 = vld [vmem:[%s4090_s26 + $0x148] ss:$52 sps:$4 sm:$0xff]   ;;  %v3669_v58 = vld [vmem:[%s4744_s1 + $0x2f0] sm:$0xff]  }
  0x3e   : > { %3316 = vmatpush3.bf16.msra.mxu1 %v3592_v56  ;;  %v3665_v55 = vld [vmem:[%s4090_s26 + $0x154] ss:$52 sps:$4 sm:$0xff]  }
  0x3f   : > { %1576 = vmatmul.mubr.bf16.gmra.mrb[8].mxu0 %v3593_v57  ;;  %3317 = vmatprep.subr.bf16.mxu1 %v3599_v62  ;;  %v3667_v56 = vld [vmem:[%s4744_s1 + $0x230] sm:$0xff]   ;;  %v3673_v62 = vld [vmem:[%s4744_s1 + $0x2f8] sm:$0xff]  }
  0x40   : > { %3278 = vmatpush3.bf16.msra.mxu0 %v3597_v60  ;;  %1583 = vmatprep.mubr.bf16.mxu0 %v3604_v3  ;;  %v3668_v57 = vld [vmem:[%s4090_s26 + $0x150] ss:$52 sps:$4 sm:$0xff]   ;;  %v3671_v60 = vld [vmem:[%s4744_s1 + $0x278] sm:$0xff]  }
  0x41   : > { %1641 = vmatmul.mubr.bf16.gmra.mrb[8].mxu1 %v3598_v61  ;;  %3279 = vmatprep.subr.bf16.mxu0 %v3601_v0  ;;  %v3672_v61 = vld [vmem:[%s4744_s1 + $0x238] sm:$0xff]  }
  0x42   : > { %3318 = vmatpush3.bf16.msra.mxu1 %v3600_v63  ;;  %1648 = vmatprep.mubr.bf16.mxu1 %v3609_v7  ;;  %v3674_v63 = vld [vmem:[%s4090_s26 + $0x20] ss:$52 sps:$4 sm:$0xff]   ;;  %v3676_v0 = vld [vmem:[%s4090_s26 + $0x24] ss:$52 sps:$4 sm:$0xff]   ;;  %v3679_v3 = vld [vmem:[%s4090_s26 + $0x28] ss:$52 sps:$4 sm:$0xff]  }
  0x43   : > { %3319 = vmatprep.subr.bf16.mxu1 %v3603_v2  ;;  %v3678_v2 = vld [vmem:[%s4744_s1 + $0x300] sm:$0xff]   ;;  %v3684_v7 = vld [vmem:[%s4090_s26 + $0x88] ss:$52 sps:$4 sm:$0xff]  }
  0x44   : > { %3280 = vmatpush3.bf16.msra.mxu0 %v3602_v1  ;;  %v3677_v1 = vld [vmem:[%s4744_s1 + $0x2b8] sm:$0xff]  }
  0x45   : > { %3281 = vmatprep.subr.bf16.mxu0 %v3608_v6  ;;  %v3685_v6 = vld [vmem:[%s4744_s1 + $0x308] sm:$0xff]  }
  0x46   : > { %3320 = vmatpush3.bf16.msra.mxu1 %v3606_v4  ;;  %v3681_v4 = vld [vmem:[%s4090_s26 + $0x2c] ss:$52 sps:$4 sm:$0xff]  }
  0x47   : > { %1584 = vmatmul.mubr.bf16.gmra.mrb[12].mxu0 %v3607_v5  ;;  %3321 = vmatprep.subr.bf16.mxu1 %v3613_v10  ;;  %v3682_v5 = vld [vmem:[%s4090_s26 + $0x8c] ss:$52 sps:$4 sm:$0xff]   ;;  %v3692_v10 = vld [vmem:[%s4744_s1 + $0x310] sm:$0xff]  }
  0x48   : > { %3282 = vmatpush3.bf16.msra.mxu0 %v3611_v8  ;;  %1689 = vmatprep.mubr.bf16.mxu0 %v3620_v16  ;;  %v3686_v8 = vld [vmem:[%s4090_s26 + $0x94] ss:$52 sps:$4 sm:$0xff]   ;;  %v3695_v16 = vld [vmem:[%s4090_s26 + $0xf8] ss:$52 sps:$4 sm:$0xff]  }
  0x49   : > { %1649 = vmatmul.mubr.bf16.gmra.mrb[12].mxu1 %v3612_v9  ;;  %3283 = vmatprep.subr.bf16.mxu0 %v3615_v12  ;;  %v3689_v9 = vld [vmem:[%s4090_s26 + $0xf4] ss:$52 sps:$4 sm:$0xff]   ;;  %v3693_v12 = vld [vmem:[%s4090_s26 + $0xfc] ss:$52 sps:$4 sm:$0xff]  }
  0x4a   : > { %3322 = vmatpush3.bf16.msra.mxu1 %v3614_v11  ;;  %1754 = vmatprep.mubr.bf16.mxu1 %v3625_v20  ;;  %v3688_v11 = vld [vmem:[%s4090_s26 + $0x90] ss:$52 sps:$4 sm:$0xff]   ;;  %v3702_v20 = vld [vmem:[%s4090_s26 + $0x160] ss:$52 sps:$4 sm:$0xff]  }
  0x4b   : > { %3323 = vmatprep.subr.bf16.mxu1 %v3617_v14  ;;  %v3691_v14 = vld [vmem:[%s4090_s26 + $0xf0] ss:$52 sps:$4 sm:$0xff]  }
  0x4c   : > { %3284 = vmatpush3.bf16.msra.mxu0 %v3616_v13  ;;  %v3699_v13 = vld [vmem:[%s4744_s1 + $0x318] sm:$0xff]  }
  0x4d   : > { %3349 = vmatprep.subr.bf16.mxu0 %v3622_v18  ;;  %v3698_v18 = vld [vmem:[%s4090_s26 + $0x158] ss:$52 sps:$4 sm:$0xff]  }
  0x4e   : > { %3324 = vmatpush3.bf16.msra.mxu1 %v3621_v17  ;;  %v3700_v17 = vld [vmem:[%s4090_s26 + $0x164] ss:$52 sps:$4 sm:$0xff]  }
  0x4f   : > { %1690 = vmatmul.mubr.bf16.vlgmr.msra.gmra.mrb[16].mxu0 %v3618_v15  ;;  %3389 = vmatprep.subr.bf16.mxu1 %v3627_v22  ;;  %v3696_v15 = vld [vmem:[%s4090_s26 + $0x15c] ss:$52 sps:$4 sm:$0xff]   ;;  %v3705_v22 = vld [vmem:[%s4090_s26 + $0x100] ss:$52 sps:$4 sm:$0xff]  }
  0x50   : > { %3350 = vmatpush3.bf16.msra.mxu0 %v3626_v21  ;;  %1697 = vmatprep.mubr.bf16.mxu0 %v3632_v27  ;;  %v3704_v21 = vld [vmem:[%s4090_s26 + $0x98] ss:$52 sps:$4 sm:$0xff]  }
  0x51   : > { %1755 = vmatmul.mubr.bf16.vlgmr.msra.gmra.mrb[16].mxu1 %v3623_v19  ;;  %3351 = vmatprep.subr.bf16.mxu0 %v3629_v24  ;;  %v3703_v19 = vld [vmem:[%s4090_s26 + $0x30] ss:$52 sps:$4 sm:$0xff]  }
  0x52   : > { %3390 = vmatpush3.bf16.msra.mxu1 %v3628_v23  ;;  %1762 = vmatprep.mubr.bf16.mxu1 %v3637_v31  ;;  %v3706_v23 = vld [vmem:[%s4090_s26 + $0x168] ss:$52 sps:$4 sm:$0xff]   ;;  %s2874_s26 = sshll.u32 %s382_s12, 4  ;;  %s4703_s26 = int_to_ptr.vmem [resolvable:$true] %s2874_s26 }
  0x53   : > { %3391 = vmatprep.subr.bf16.mxu1 %v3631_v26  ;;  %v3709_v26 = vld [vmem:[%s4748_s5 + $0x4] ss:$12 sps:$4 sm:$0xff]   ;;  %s3823_s21 = scalar_lea.vmem %s4703_s26, 64  ;;  %p3830_p0 = scmp.lt.s32.totalorder %s4703_s26, %s3828_s29 }
  0x54   : > { %3352 = vmatpush3.bf16.msra.mxu0 %v3630_v25  ;;  %v4364_v25 = vld [vmem:[%s4745_s2] ss:$0 sm:$0xff]  ;;  %p3824_p11 = scmp.ne.s32.totalorder %s4703_s26, %s3823_s21  ;;  %p3831_p1 = scmp.lt.s32.totalorder %s3829_s30, %s3823_s21 }
  0x55   : > { %3353 = vmatprep.subr.bf16.mxu0 %v3636_v30 }
  0x56   : > { %3392 = vmatpush3.bf16.msra.mxu1 %v3634_v28  ;;  %v3707_v28 = vld [vmem:[%s4748_s5] ss:$12 sps:$4 sm:$0xff]   ;;  %p3825_p12 = pnand %p3824_p11, %p3989_p5  ;;  %p3832_p2 = por %p3831_p1, %p3830_p0 }
  0x57   : > { %1698 = vmatmul.mubr.bf16.gmra.mrb[20].mxu0 %v3635_v29  ;;  %3393 = vmatprep.subr.bf16.mxu1 %v3641_v34  ;;  %v3710_v29 = vld [vmem:[%s4748_s5 + $0x8] ss:$12 sps:$4 sm:$0xff]  }
  0x58   : > { %3354 = vmatpush3.bf16.msra.mxu0 %v3639_v32  ;;  %1705 = vmatprep.mubr.bf16.mxu0 %v3646_v39  ;;  %v3887_v32 = vmov 0.0   ;;  %p3826_p13 = pneg %p3825_p12 }
  0x59   : > { %1763 = vmatmul.mubr.bf16.gmra.mrb[20].mxu1 %v3640_v33  ;;  %3355 = vmatprep.subr.bf16.mxu0 %v3643_v36 }
  0x5a   : > { %3394 = vmatpush3.bf16.msra.mxu1 %v3642_v35  ;;  %1770 = vmatprep.mubr.bf16.mxu1 %v3651_v43  ;;  %p3833_p3 = pnand %p3832_p2, %p3826_p13 }
  0x5b   : > { %3395 = vmatprep.subr.bf16.mxu1 %v3645_v38  ;;  %v3713_v38 = vld [vmem:[%s4748_s5 + $0x1c] ss:$12 sps:$4 sm:$0xff]  }
  0x5c   : > { %3356 = vmatpush3.bf16.msra.mxu0 %v3644_v37 }
  0x5d   : > { %3357 = vmatprep.subr.bf16.mxu0 %v3650_v42  ;;  %v3714_v42 = vld [vmem:[%s4748_s5 + $0x20] ss:$12 sps:$4 sm:$0xff]  }
  0x5e   : > { %3396 = vmatpush3.bf16.msra.mxu1 %v3648_v40 }
  0x5f   : > { %1706 = vmatmul.mubr.bf16.gmra.mrb[24].mxu0 %v3649_v41  ;;  %3397 = vmatprep.subr.bf16.mxu1 %v3655_v46  ;;  %v3711_v41 = vld [vmem:[%s4748_s5 + $0x18] ss:$12 sps:$4 sm:$0xff]  }
  0x60   : > { %3358 = vmatpush3.bf16.msra.mxu0 %v3653_v44  ;;  %1713 = vmatprep.mubr.bf16.mxu0 %v3660_v51 }
  0x61   : > { %1771 = vmatmul.mubr.bf16.gmra.mrb[24].mxu1 %v3654_v45  ;;  %3359 = vmatprep.subr.bf16.mxu0 %v3657_v48 }
  0x62   : > { %3398 = vmatpush3.bf16.msra.mxu1 %v3656_v47  ;;  %1778 = vmatprep.mubr.bf16.mxu1 %v3665_v55  ;;  %v3717_v47 = vld [vmem:[%s4748_s5 + $0x34] ss:$12 sps:$4 sm:$0xff]   ;;  %v3721_v55 = vld [vmem:[%s4748_s5 + $0x4c] ss:$12 sps:$4 sm:$0xff]  }
  0x63   : > { %3399 = vmatprep.subr.bf16.mxu1 %v3659_v50  ;;  %v3718_v50 = vld [vmem:[%s4748_s5 + $0x38] ss:$12 sps:$4 sm:$0xff]  }
  0x64   : > { %3360 = vmatpush3.bf16.msra.mxu0 %v3658_v49  ;;  %v3715_v49 = vld [vmem:[%s4748_s5 + $0x30] ss:$12 sps:$4 sm:$0xff]  }
  0x65   : > { %3361 = vmatprep.subr.bf16.mxu0 %v3664_v54 }
  0x66   : > { %3400 = vmatpush3.bf16.msra.mxu1 %v3662_v52 }
  0x67   : > { %1714 = vmatmul.mubr.bf16.gmra.mrb[28].mxu0 %v3663_v53  ;;  %3401 = vmatprep.subr.bf16.mxu1 %v3669_v58  ;;  %v3722_v58 = vld [vmem:[%s4748_s5 + $0x50] ss:$12 sps:$4 sm:$0xff]  }
  0x68   : > { %3362 = vmatpush3.bf16.msra.mxu0 %v3667_v56  ;;  %1819 = vmatprep.mubr.bf16.mxu0 %v3676_v0 }
  0x69   : > { %1779 = vmatmul.mubr.bf16.gmra.mrb[28].mxu1 %v3668_v57  ;;  %3363 = vmatprep.subr.bf16.mxu0 %v3671_v60  ;;  %v3719_v57 = vld [vmem:[%s4748_s5 + $0x48] ss:$12 sps:$4 sm:$0xff]  }
  0x6a   : > { %3402 = vmatpush3.bf16.msra.mxu1 %v3670_v59  ;;  %1884 = vmatprep.mubr.bf16.mxu1 %v3681_v4  ;;  %v3723_v4 = vld [vmem:[%s4748_s5 + $0x60] ss:$12 sps:$4 sm:$0xff]  }
  0x6b   : > { %3403 = vmatprep.subr.bf16.mxu1 %v3673_v62 }
  0x6c   : > { %3364 = vmatpush3.bf16.msra.mxu0 %v3672_v61 }
  0x6d   : > { %3446 = vmatprep.subr.bf16.mxu0 %v3678_v2 }
  0x6e   : > { %3404 = vmatpush3.bf16.msra.mxu1 %v3677_v1 }
  0x6f   : > { %1820 = vmatmul.mubr.bf16.vlgmr.msra.gmra.mrb[32].mxu0 %v3674_v63  ;;  %2240 = vmatprep.subr.bf16.mxu1 %v3709_v26 }
  0x70   : > { %3447 = vmatpush3.bf16.msra.mxu0 %v3678_v2  ;;  %1827 = vmatprep.mubr.bf16.mxu0 %v3682_v5  ;;  %v3725_v2 = vld [vmem:[%s4748_s5 + $0x64] ss:$12 sps:$4 sm:$0xff]   ;;  %v3726_v5 = vld [vmem:[%s4748_s5 + $0x68] ss:$12 sps:$4 sm:$0xff]  }
  0x71   : > { %1885 = vmatmul.mubr.bf16.vlgmr.msra.gmra.mrb[32].mxu1 %v3679_v3  ;;  %3448 = vmatprep.subr.bf16.mxu0 %v3685_v6 }
  0x72   : > { %1892 = vmatprep.mubr.bf16.mxu1 %v3686_v8  ;;  %2241 = vmatpush1.bf16.msra.mxu1 %v3707_v28 }
  0x73   : > { %2242 = vmatprep.subr.bf16.mxu1 %v3713_v38 }
  0x74   : > { %3449 = vmatpush3.bf16.msra.mxu0 %v3685_v6 }
  0x75   : > { %3450 = vmatprep.subr.bf16.mxu0 %v3692_v10 }
  0x76   : > { %2243 = vmatpush1.bf16.msra.mxu1 %v3711_v41 }
  0x77   : > { %1828 = vmatmul.mubr.bf16.gmra.mrb[36].mxu0 %v3684_v7  ;;  %2244 = vmatprep.subr.bf16.mxu1 %v3717_v47 }
  0x78   : > { %1835 = vmatprep.mubr.bf16.mxu0 %v3689_v9  ;;  %3451 = vmatpush3.bf16.msra.mxu0 %v3692_v10  ;;  %v3729_v9 = vld [vmem:[%s4748_s5 + $0x7c] ss:$12 sps:$4 sm:$0xff]  }
  0x79   : > { %1893 = vmatmul.mubr.bf16.gmra.mrb[36].mxu1 %v3688_v11  ;;  %3452 = vmatprep.subr.bf16.mxu0 %v3699_v13  ;;  %v3727_v11 = vld [vmem:[%s4748_s5 + $0x78] ss:$12 sps:$4 sm:$0xff]  }
  0x7a   : > { %1900 = vmatprep.mubr.bf16.mxu1 %v3693_v12  ;;  %2245 = vmatpush1.bf16.msra.mxu1 %v3715_v49  ;;  %v3730_v12 = vld [vmem:[%s4748_s5 + $0x80] ss:$12 sps:$4 sm:$0xff]  }
  0x7b   : > { %2246 = vmatprep.subr.bf16.mxu1 %v3721_v55 }
  0x7c   : > { %3453 = vmatpush3.bf16.msra.mxu0 %v3699_v13 }
  0x7d   : > { %3462 = vmatprep.subr.bf16.mxu0 %v3887_v32 }
  0x7e   : > { %2247 = vmatpush1.bf16.msra.mxu1 %v3719_v57 }
  0x7f   : > { %1836 = vmatmul.mubr.bf16.gmra.mrb[40].mxu0 %v3691_v14  ;;  %2248 = vmatprep.subr.bf16.mxu1 %v3725_v2 }
  0x80   : > { %1843 = vmatprep.mubr.bf16.mxu0 %v3696_v15 }
  0x81   : > { %1901 = vmatmul.mubr.bf16.gmra.mrb[40].mxu1 %v3695_v16 }
  0x82   : > { %1908 = vmatprep.mubr.bf16.mxu1 %v3700_v17  ;;  %2249 = vmatpush1.bf16.msra.mxu1 %v3723_v4 }
  0x83   : > { %2250 = vmatprep.subr.bf16.mxu1 %v3729_v9 }
  0x86   : > { %2251 = vmatpush1.bf16.msra.mxu1 %v3727_v11 }
  0x87   : > { %1844 = vmatmul.mubr.bf16.gmra.mrb[44].mxu0 %v3698_v18  ;;  %v3733_v18 = vld [vmem:[%s4748_s5 + $0x94] ss:$12 sps:$4 sm:$0xff]  }
  0x88   : > { %3454 = vmatprep.mubr.msk.bf16.mxu0 %vm1514_vm0, %v3703_v19  ;;  %2252 = vmatprep.subr.bf16.mxu1 %v3733_v18 }
  0x89   : > { %1909 = vmatmul.mubr.bf16.gmra.mrb[44].mxu1 %v3702_v20 }
  0x8f   : > { %3455 = vmatmul.mubr.msk.bf16.vlgmr.msra.gmra.mrb[48].mxu0 %vm1514_vm0, %v3704_v21 }
  0x90   : > { %3458 = vmatprep.mubr.msk.bf16.mxu0 %vm1514_vm0, %v3705_v22  ;;  %3463 = vmatpush3.bf16.msra.mxu0 %v3710_v29  ;;  %v3731_v22 = vld [vmem:[%s4748_s5 + $0x90] ss:$12 sps:$4 sm:$0xff]   ;;  %v3735_v29 = vld [vmem:[%s4748_s5 + $0xa8] ss:$12 sps:$4 sm:$0xff]  }
  0x91   : > { %3464 = vmatprep.subr.bf16.mxu0 %v3887_v32  ;;  %2253 = vmatpush1.bf16.msra.mxu1 %v3731_v22 }
  0x94   : > { %3465 = vmatpush3.bf16.msra.mxu0 %v3714_v42 }
  0x95   : > { %3466 = vmatprep.subr.bf16.mxu0 %v3887_v32 }
  0x97   : > { %3459 = vmatmul.mubr.msk.bf16.gmra.mrb[52].mxu0 %vm1514_vm0, %v3706_v23  ;;  %v3734_v23 = vld [vmem:[%s4748_s5 + $0x98] ss:$12 sps:$4 sm:$0xff]  }
  0x98   : > { %3467 = vmatpush3.bf16.msra.mxu0 %v3718_v50  ;;  %3478 = vmatprep.mubr.msk.bf16.mxu0 %vm3889_vm1, %v3887_v32 }
  0x99   : > { %3468 = vmatprep.subr.bf16.mxu0 %v3887_v32 }
  0x9c   : > { %3469 = vmatpush3.bf16.msra.mxu0 %v3722_v58 }
  0x9d   : > { %3470 = vmatprep.subr.bf16.mxu0 %v3887_v32 }
  0xa0   : > { %3471 = vmatpush3.bf16.msra.mxu0 %v3726_v5 }
  0xa1   : > { %3472 = vmatprep.subr.bf16.mxu0 %v3887_v32 }
  0xa4   : > { %3473 = vmatpush3.bf16.msra.mxu0 %v3730_v12 }
  0xa5   : > { %3474 = vmatprep.subr.bf16.mxu0 %v3887_v32 }
  0xa8   : > { %3475 = vmatpush3.bf16.msra.mxu0 %v3734_v23 }
  0xa9   : > { %3476 = vmatprep.subr.bf16.mxu0 %v3887_v32 }
 0x102   : > { %v3205_v24 = vpop.f32.mrb[0].mxu0 }
 0x103   : > { %v3206_v27 = vpop.f32.mrb[1].mxu0 }
 0x104   : > { %v3207_v30 = vadd.f32 %v3206_v27, %v3205_v24  ;;  %v3208_v31 = vpop.f32.mrb[2].mxu0  ;;  %v3245_v33 = vpop.f32.mrb[0].mxu1 }
 0x105   : > { %v3209_v34 = vpop.f32.mrb[3].mxu0  ;;  %v3246_v37 = vpop.f32.mrb[1].mxu1 }
 0x106   : > { %v1562_v35 = vadd.f32 %v3207_v30, %v4364_v25  ;;  %v3210_v36 = vadd.f32 %v3209_v34, %v3208_v31  ;;  %v3247_v39 = vadd.f32 %v3246_v37, %v3245_v33  ;;  %v3248_v40 = vpop.f32.mrb[2].mxu1  ;;  %v3737_v30 = vld [vmem:[%s4748_s5 + $0xac] ss:$12 sps:$4 sm:$0xff]   ;;  %v3738_v34 = vld [vmem:[%s4748_s5 + $0xb0] ss:$12 sps:$4 sm:$0xff]  }
 0x107   : > { %v3249_v44 = vpop.f32.mrb[3].mxu1  ;;  %2254 = vmatprep.subr.bf16.mxu1 %v3737_v30  ;;  %3477 = vmatpush3.bf16.msra.mxu0 %v3738_v34 }
 0x108   : > { %v1565_v43 = vadd.f32 %v3210_v36, %v4364_v25  ;;  %v4388_v45 = vadd.f32 %v3247_v39, %v1562_v35  ;;  %v3250_v46 = vadd.f32 %v3249_v44, %v3248_v40  ;;  %v3888_v35 = vmov 0   ;;  %2255 = vmatpush1.bf16.msra.mxu1 %v3735_v29  ;;  %v3741_v39 = vld [vmem:[%s4750_s7 + $0x4] ss:$8 sps:$4 sm:$0xff]  }
 0x109   : > { %2272 = vmatprep.mubr.bf16.mxu1 %v3888_v35  ;;  %2819 = vmatprep.subr.bf16.mxu0 %v3888_v35 }
 0x10a   : > { %v4394_v48 = vadd.f32 %v3250_v46, %v1565_v43  ;;  %v3211_v51 = vpop.f32.mrb[4].mxu0  ;;  %2627 = vmatprep.subr.bf16.mxu1 %v3741_v39 }
 0x10b   : > { %v3212_v52 = vpop.f32.mrb[5].mxu0 }
 0x10c   : > { %v3213_v53 = vadd.f32 %v3212_v52, %v3211_v51  ;;  %v3214_v54 = vpop.f32.mrb[6].mxu0  ;;  %v3251_v60 = vpop.f32.mrb[4].mxu1 }
 0x10d   : > { %v3215_v56 = vpop.f32.mrb[7].mxu0  ;;  %v3252_v62 = vpop.f32.mrb[5].mxu1 }
 0x10e   : > { %v1570_v59 = vadd.f32 %v3213_v53, %v4364_v25  ;;  %v3216_v61 = vadd.f32 %v3215_v56, %v3214_v54  ;;  %v3253_v0 = vadd.f32 %v3252_v62, %v3251_v60  ;;  %v3254_v1 = vpop.f32.mrb[6].mxu1 }
 0x10f   : > { %v3255_v3 = vpop.f32.mrb[7].mxu1 }
 0x110   : > { %v1573_v63 = vadd.f32 %v3216_v61, %v4364_v25  ;;  %v4424_v6 = vadd.f32 %v3253_v0, %v1570_v59  ;;  %v3256_v7 = vadd.f32 %v3255_v3, %v3254_v1 }
 0x112   : > { %v4426_v8 = vadd.f32 %v3256_v7, %v1573_v63  ;;  %v3217_v10 = vpop.f32.mrb[8].mxu0 }
 0x113   : > { %v3218_v13 = vpop.f32.mrb[9].mxu0 }
 0x114   : > { %v3219_v14 = vadd.f32 %v3218_v13, %v3217_v10  ;;  %v3220_v15 = vpop.f32.mrb[10].mxu0  ;;  %v3257_v16 = vpop.f32.mrb[8].mxu1 }
 0x115   : > { %v3221_v17 = vpop.f32.mrb[11].mxu0  ;;  %v3258_v21 = vpop.f32.mrb[9].mxu1 }
 0x116   : > { %v1578_v19 = vadd.f32 %v3219_v14, %v4364_v25  ;;  %v3222_v20 = vadd.f32 %v3221_v17, %v3220_v15  ;;  %v3259_v24 = vadd.f32 %v3258_v21, %v3257_v16  ;;  %v3260_v26 = vpop.f32.mrb[10].mxu1 }
 0x117   : > { %v3261_v28 = vpop.f32.mrb[11].mxu1 }
 0x118   : > { %v1581_v27 = vadd.f32 %v3222_v20, %v4364_v25  ;;  %v4456_v31 = vadd.f32 %v3259_v24, %v1578_v19  ;;  %v3262_v33 = vadd.f32 %v3261_v28, %v3260_v26 }
 0x11a   : > { %v4464_v36 = vadd.f32 %v3262_v33, %v1581_v27  ;;  %v3223_v37 = vpop.f32.mrb[12].mxu0 }
 0x11b   : > { %v3224_v38 = vpop.f32.mrb[13].mxu0 }
 0x11c   : > { %v3225_v40 = vadd.f32 %v3224_v38, %v3223_v37  ;;  %v3226_v41 = vpop.f32.mrb[14].mxu0  ;;  %v3263_v42 = vpop.f32.mrb[12].mxu1 }
 0x11d   : > { %v3227_v43 = vpop.f32.mrb[15].mxu0  ;;  %v3264_v46 = vpop.f32.mrb[13].mxu1 }
 0x11e   : > { %v1586_v44 = vadd.f32 %v3225_v40, %v4364_v25  ;;  %v3228_v32 = vadd.f32 %v3227_v43, %v3226_v41  ;;  %v3265_v47 = vadd.f32 %v3264_v46, %v3263_v42  ;;  %v3266_v49 = vpop.f32.mrb[14].mxu1 }
 0x11f   : > { %v3267_v51 = vpop.f32.mrb[15].mxu1 }
 0x120   : > { %v1589_v50 = vadd.f32 %v3228_v32, %v4364_v25  ;;  %v1651_v52 = vadd.f32 %v3265_v47, %v1586_v44  ;;  %v3268_v53 = vadd.f32 %v3267_v51, %v3266_v49 }
 0x122   : > { %v1654_v54 = vadd.f32 %v3268_v53, %v1589_v50  ;;  %v3285_v55 = vpop.f32.mrb[16].mxu0 }
 0x123   : > { %v3286_v56 = vpop.f32.mrb[17].mxu0 }
 0x124   : > { %v3287_v57 = vadd.f32 %v3286_v56, %v3285_v55  ;;  %v3288_v58 = vpop.f32.mrb[18].mxu0  ;;  %v3325_v61 = vpop.f32.mrb[16].mxu1 }
 0x125   : > { %v3289_v59 = vpop.f32.mrb[19].mxu0  ;;  %v3326_v63 = vpop.f32.mrb[17].mxu1 }
 0x126   : > { %v1692_v60 = vadd.f32 %v3287_v57, %v4388_v45  ;;  %v3290_v62 = vadd.f32 %v3289_v59, %v3288_v58  ;;  %v3327_v1 = vadd.f32 %v3326_v63, %v3325_v61  ;;  %v3328_v2 = vpop.f32.mrb[18].mxu1 }
 0x127   : > { %v3329_v3 = vpop.f32.mrb[19].mxu1 }
 0x128   : > { %v1695_v0 = vadd.f32 %v3290_v62, %v4394_v48  ;;  %v1757_v25 = vadd.f32 %v3327_v1, %v1692_v60  ;;  %v3330_v4 = vadd.f32 %v3329_v3, %v3328_v2 }
 0x12a   : > { %v1760_v5 = vadd.f32 %v3330_v4, %v1695_v0  ;;  %v3291_v7 = vpop.f32.mrb[20].mxu0 }
 0x12b   : > { %v3292_v9 = vpop.f32.mrb[21].mxu0 }
 0x12c   : > { %v3293_v10 = vadd.f32 %v3292_v9, %v3291_v7  ;;  %v3294_v11 = vpop.f32.mrb[22].mxu0  ;;  %v3331_v12 = vpop.f32.mrb[20].mxu1 }
 0x12d   : > { %v3295_v13 = vpop.f32.mrb[23].mxu0  ;;  %v3332_v15 = vpop.f32.mrb[21].mxu1 }
 0x12e   : > { %v1700_v14 = vadd.f32 %v3293_v10, %v4424_v6  ;;  %v3296_v45 = vadd.f32 %v3295_v13, %v3294_v11  ;;  %v3333_v16 = vadd.f32 %v3332_v15, %v3331_v12  ;;  %v3334_v17 = vpop.f32.mrb[22].mxu1 }
 0x12f   : > { %v3335_v18 = vpop.f32.mrb[23].mxu1 }
 0x130   : > { %v1703_v48 = vadd.f32 %v3296_v45, %v4426_v8  ;;  %v1765_v19 = vadd.f32 %v3333_v16, %v1700_v14  ;;  %v3336_v20 = vadd.f32 %v3335_v18, %v3334_v17 }
 0x132   : > { %v1768_v21 = vadd.f32 %v3336_v20, %v1703_v48  ;;  %v3297_v22 = vpop.f32.mrb[24].mxu0 }
 0x133   : > { %v3298_v23 = vpop.f32.mrb[25].mxu0 }
 0x134   : > { %v3299_v24 = vadd.f32 %v3298_v23, %v3297_v22  ;;  %v3300_v26 = vpop.f32.mrb[26].mxu0  ;;  %v3337_v27 = vpop.f32.mrb[24].mxu1 }
 0x135   : > { %v3301_v28 = vpop.f32.mrb[27].mxu0  ;;  %v3338_v6 = vpop.f32.mrb[25].mxu1 }
 0x136   : > { %v1708_v29 = vadd.f32 %v3299_v24, %v4456_v31  ;;  %v3302_v30 = vadd.f32 %v3301_v28, %v3300_v26  ;;  %v3339_v33 = vadd.f32 %v3338_v6, %v3337_v27  ;;  %v3340_v34 = vpop.f32.mrb[26].mxu1 }
 0x137   : > { %v3341_v38 = vpop.f32.mrb[27].mxu1 }
 0x138   : > { %v1711_v37 = vadd.f32 %v3302_v30, %v4464_v36  ;;  %v1773_v8 = vadd.f32 %v3339_v33, %v1708_v29  ;;  %v3342_v39 = vadd.f32 %v3341_v38, %v3340_v34 }
 0x13a   : > { %v1776_v40 = vadd.f32 %v3342_v39, %v1711_v37  ;;  %v3303_v41 = vpop.f32.mrb[28].mxu0 }
 0x13b   : > { %v3304_v42 = vpop.f32.mrb[29].mxu0 }
 0x13c   : > { %v3305_v43 = vadd.f32 %v3304_v42, %v3303_v41  ;;  %v3306_v44 = vpop.f32.mrb[30].mxu0  ;;  %v3343_v47 = vpop.f32.mrb[28].mxu1 }
 0x13d   : > { %v3307_v32 = vpop.f32.mrb[31].mxu0  ;;  %v3344_v50 = vpop.f32.mrb[29].mxu1 }
 0x13e   : > { %v1716_v46 = vadd.f32 %v3305_v43, %v1651_v52  ;;  %v3308_v49 = vadd.f32 %v3307_v32, %v3306_v44  ;;  %v3345_v51 = vadd.f32 %v3344_v50, %v3343_v47  ;;  %v3346_v53 = vpop.f32.mrb[30].mxu1 }
 0x13f   : > { %v3347_v55 = vpop.f32.mrb[31].mxu1 }
 0x140   : > { %v1719_v31 = vadd.f32 %v3308_v49, %v1654_v54  ;;  %v1781_v56 = vadd.f32 %v3345_v51, %v1716_v46  ;;  %v3348_v57 = vadd.f32 %v3347_v55, %v3346_v53 }
 0x142   : > { %v1784_v36 = vadd.f32 %v3348_v57, %v1719_v31  ;;  %v3365_v58 = vpop.f32.mrb[32].mxu0 }
 0x143   : > { %v3366_v59 = vpop.f32.mrb[33].mxu0 }
 0x144   : > { %v3367_v60 = vadd.f32 %v3366_v59, %v3365_v58  ;;  %v3368_v61 = vpop.f32.mrb[34].mxu0  ;;  %v3405_v62 = vpop.f32.mrb[32].mxu1 }
 0x145   : > { %v3369_v63 = vpop.f32.mrb[35].mxu0  ;;  %v3406_v2 = vpop.f32.mrb[33].mxu1 }
 0x146   : > { %v1822_v0 = vadd.f32 %v3367_v60, %v1757_v25  ;;  %v3370_v1 = vadd.f32 %v3369_v63, %v3368_v61  ;;  %v3407_v52 = vadd.f32 %v3406_v2, %v3405_v62  ;;  %v3408_v3 = vpop.f32.mrb[34].mxu1 }
 0x147   : > { %v3409_v7 = vpop.f32.mrb[35].mxu1 }
 0x148   : > { %v1825_v4 = vadd.f32 %v3370_v1, %v1760_v5  ;;  %v3410_v54 = vadd.f32 %v3409_v7, %v3408_v3  ;;  %v1887_v9 = vadd.f32 %v3407_v52, %v1822_v0 }
 0x14a   : > { %v3371_v10 = vpop.f32.mrb[36].mxu0  ;;  %v1890_v12 = vadd.f32 %v3410_v54, %v1825_v4 }
 0x14b   : > { %v3372_v11 = vpop.f32.mrb[37].mxu0 }
 0x14c   : > { %v3373_v13 = vadd.f32 %v3372_v11, %v3371_v10  ;;  %v3374_v14 = vpop.f32.mrb[38].mxu0  ;;  %v3411_v45 = vpop.f32.mrb[36].mxu1 }
 0x14d   : > { %v3375_v15 = vpop.f32.mrb[39].mxu0  ;;  %v3412_v48 = vpop.f32.mrb[37].mxu1 }
 0x14e   : > { %v1830_v16 = vadd.f32 %v3373_v13, %v1765_v19  ;;  %v3376_v17 = vadd.f32 %v3375_v15, %v3374_v14  ;;  %v3413_v18 = vadd.f32 %v3412_v48, %v3411_v45  ;;  %v3414_v25 = vpop.f32.mrb[38].mxu1 }
 0x14f   : > { %v3415_v22 = vpop.f32.mrb[39].mxu1 }
 0x150   : > { %v1833_v20 = vadd.f32 %v3376_v17, %v1768_v21  ;;  %v3416_v23 = vadd.f32 %v3415_v22, %v3414_v25  ;;  %v1895_v24 = vadd.f32 %v3413_v18, %v1830_v16 }
 0x152   : > { %v3377_v5 = vpop.f32.mrb[40].mxu0  ;;  %v1898_v27 = vadd.f32 %v3416_v23, %v1833_v20 }
 0x153   : > { %v3378_v26 = vpop.f32.mrb[41].mxu0 }
 0x154   : > { %v3379_v28 = vadd.f32 %v3378_v26, %v3377_v5  ;;  %v3380_v29 = vpop.f32.mrb[42].mxu0  ;;  %v3417_v30 = vpop.f32.mrb[40].mxu1 }
 0x155   : > { %v3381_v6 = vpop.f32.mrb[43].mxu0  ;;  %v3418_v37 = vpop.f32.mrb[41].mxu1 }
 0x156   : > { %v1838_v33 = vadd.f32 %v3379_v28, %v1773_v8  ;;  %v3382_v34 = vadd.f32 %v3381_v6, %v3380_v29  ;;  %v3419_v38 = vadd.f32 %v3418_v37, %v3417_v30  ;;  %v3420_v19 = vpop.f32.mrb[42].mxu1 }
 0x157   : > { %v3421_v41 = vpop.f32.mrb[43].mxu1 }
 0x158   : > { %v1841_v39 = vadd.f32 %v3382_v34, %v1776_v40  ;;  %v3422_v42 = vadd.f32 %v3421_v41, %v3420_v19  ;;  %v1903_v43 = vadd.f32 %v3419_v38, %v1838_v33  ;;  %v3097_v34 = vld [vmem:[%s4746_s3] ss:$0 sm:$0xff] }
 0x159   : > { %v3098_v41 = vld [vmem:[%s4747_s4] ss:$0 sm:$0xff] }
 0x15a   : > { %v3383_v21 = vpop.f32.mrb[44].mxu0  ;;  %v1906_v32 = vadd.f32 %v3422_v42, %v1841_v39 }
 0x15b   : > { %v3384_v44 = vpop.f32.mrb[45].mxu0 }
 0x15c   : > { %v3385_v46 = vadd.f32 %v3384_v44, %v3383_v21  ;;  %v3386_v47 = vpop.f32.mrb[46].mxu0  ;;  %v3423_v49 = vpop.f32.mrb[44].mxu1 }
 0x15d   : > { %v3387_v50 = vpop.f32.mrb[47].mxu0  ;;  %v3424_v53 = vpop.f32.mrb[45].mxu1 }
 0x15e   : > { %v1846_v31 = vadd.f32 %v3385_v46, %v1781_v56  ;;  %v3388_v51 = vadd.f32 %v3387_v50, %v3386_v47  ;;  %v3425_v55 = vadd.f32 %v3424_v53, %v3423_v49  ;;  %v3426_v8 = vpop.f32.mrb[46].mxu1 }
 0x15f   : > { %v3427_v58 = vpop.f32.mrb[47].mxu1 }
 0x160   : > { %v1849_v57 = vadd.f32 %v3388_v51, %v1784_v36  ;;  %v3428_v59 = vadd.f32 %v3427_v58, %v3426_v8  ;;  %v1911_v60 = vadd.f32 %v3425_v55, %v1846_v31 }
 0x162   : > { %v3456_v40 = vpop.f32.mrb[48].mxu0  ;;  %v1914_v63 = vadd.f32 %v3428_v59, %v1849_v57 }
 0x163   : > { %v1960_v61 = vadd.f32 %v3456_v40, %v1895_v24  ;;  %v1951_v62 = vpop.f32.mrb[49].mxu0 }
 0x164   : > { %v1952_v0 = vadd.f32 %v1951_v62, %v1887_v9  ;;  %v3457_v1 = vpop.f32.mrb[50].mxu0 }
 0x165   : > { %v1963_v2 = vadd.f32 %v3457_v1, %v1898_v27  ;;  %v1954_v52 = vpop.f32.mrb[51].mxu0  ;;  %v1984_v4 = vmax.f32 %v1960_v61, 0.0 }
 0x166   : > { %v1955_v3 = vadd.f32 %v1954_v52, %v1890_v12  ;;  %v1982_v56 = vmax.f32 %v1952_v0, 0.0 }
 0x167   : > { %v1985_v7 = vmax.f32 %v1963_v2, 0.0 }
 0x168   : > { %v1983_v54 = vmax.f32 %v1955_v3, 0.0 }
 0x169   : > { %v1997_v10 = vmax.f32 %v1984_v4, %v1985_v7 }
 0x16a   : > { %v1990_v11 = vmax.f32 %v1982_v56, %v1983_v54  ;;  %v3460_v13 = vpop.f32.mrb[52].mxu0 }
 0x16b   : > { %v1998_v36 = vrot.slane %v1997_v10, 4  ;;  %v1976_v14 = vadd.f32 %v3460_v13, %v1911_v60  ;;  %v1967_v45 = vpop.f32.mrb[53].mxu0 }
 0x16c   : > { %v1991_v15 = vrot.slane %v1990_v11, 4  ;;  %v1968_v16 = vadd.f32 %v1967_v45, %v1903_v43  ;;  %v3461_v17 = vpop.f32.mrb[54].mxu0  ;;  %v3747_v45 = vld [vmem:[%s4750_s7 + $0x24] ss:$8 sps:$4 sm:$0xff]  }
 0x16d   : > { %v1999_v48 = vmax.f32 %v1997_v10, %v1998_v36  ;;  %v1979_v18 = vadd.f32 %v3461_v17, %v1914_v63  ;;  %v1970_v9 = vpop.f32.mrb[55].mxu0  ;;  %v1988_v12 = vmax.f32 %v1976_v14, 0.0  ;;  %v3744_v36 = vld [vmem:[%s4750_s7 + $0x14] ss:$8 sps:$4 sm:$0xff]   ;;  %v3742_v14 = vld [vmem:[%s4750_s7 + $0x10] ss:$8 sps:$4 sm:$0xff]  }
 0x16e   : > { %v1992_v25 = vmax.f32 %v1990_v11, %v1991_v15  ;;  %v1971_v20 = vadd.f32 %v1970_v9, %v1906_v32  ;;  %v1986_v5 = vmax.f32 %v1968_v16, 0.0  ;;  %v3739_v11 = vld [vmem:[%s4750_s7] ss:$8 sps:$4 sm:$0xff]   ;;  %v3750_v16 = vld [vmem:[%s4750_s7 + $0x34] ss:$8 sps:$4 sm:$0xff]  }
 0x16f   : > { %v2000_v22 = vrot.slane %v1999_v48, 2  ;;  %v1989_v23 = vmax.f32 %v1979_v18, 0.0  ;;  %v3745_v15 = vld [vmem:[%s4750_s7 + $0x20] ss:$8 sps:$4 sm:$0xff]   ;;  %v3748_v17 = vld [vmem:[%s4750_s7 + $0x30] ss:$8 sps:$4 sm:$0xff]  }
 0x170   : > { %v1993_v24 = vrot.slane %v1992_v25, 2  ;;  %v1987_v26 = vmax.f32 %v1971_v20, 0.0  ;;  %v3751_v18 = vld [vmem:[%s4750_s7 + $0x40] ss:$8 sps:$4 sm:$0xff]   ;;  %v3756_v9 = vld [vmem:[%s4750_s7 + $0x54] ss:$8 sps:$4 sm:$0xff]  }
 0x171   : > { %v2001_v27 = vmax.f32 %v1999_v48, %v2000_v22  ;;  %v2011_v28 = vmax.f32 %v1988_v12, %v1989_v23  ;;  %v3753_v48 = vld [vmem:[%s4750_s7 + $0x44] ss:$8 sps:$4 sm:$0xff]   ;;  %v3757_v22 = vld [vmem:[%s4750_s7 + $0x60] ss:$8 sps:$4 sm:$0xff]   ;;  %v3762_v12 = vld [vmem:[%s4750_s7 + $0x74] ss:$8 sps:$4 sm:$0xff]  }
 0x172   : > { %v1994_v29 = vmax.f32 %v1992_v25, %v1993_v24  ;;  %v2004_v30 = vmax.f32 %v1986_v5, %v1987_v26  ;;  %v3754_v25 = vld [vmem:[%s4750_s7 + $0x50] ss:$8 sps:$4 sm:$0xff]   ;;  %v3759_v20 = vld [vmem:[%s4750_s7 + $0x64] ss:$8 sps:$4 sm:$0xff]   ;;  %v3763_v5 = vld [vmem:[%s4750_s7 + $0x80] ss:$8 sps:$4 sm:$0xff]  }
 0x173   : > { %v2002_v6 = vrot.slane %v2001_v27, 1  ;;  %v2012_v33 = vrot.slane %v2011_v28, 4  ;;  %v3760_v23 = vld [vmem:[%s4750_s7 + $0x70] ss:$8 sps:$4 sm:$0xff]   ;;  %v3765_v24 = vld [vmem:[%s4750_s7 + $0x84] ss:$8 sps:$4 sm:$0xff]  }
 0x174   : > { %v1995_v37 = vrot.slane %v1994_v29, 1  ;;  %v2005_v38 = vrot.slane %v2004_v30, 4  ;;  %v3768_v26 = vld [vmem:[%s4750_s7 + $0x94] ss:$8 sps:$4 sm:$0xff]  }
 0x175   : > { %v2003_v19 = vmax.f32 %v2001_v27, %v2002_v6  ;;  %v2013_v39 = vmax.f32 %v2011_v28, %v2012_v33  ;;  %v3766_v27 = vld [vmem:[%s4750_s7 + $0x90] ss:$8 sps:$4 sm:$0xff]   ;;  %v3771_v28 = vld [vmem:[%s4750_s7 + $0xa4] ss:$8 sps:$4 sm:$0xff]  }
 0x176   : > { %v1996_v42 = vmax.f32 %v1994_v29, %v1995_v37  ;;  %v2006_v43 = vmax.f32 %v2004_v30, %v2005_v38  ;;  %v3769_v29 = vld [vmem:[%s4750_s7 + $0xa0] ss:$8 sps:$4 sm:$0xff]   ;;  %v3774_v30 = vld [vmem:[%s4750_s7 + $0xb4] ss:$8 sps:$4 sm:$0xff]   ;;  %v3772_v6 = vld [vmem:[%s4750_s7 + $0xb0] ss:$8 sps:$4 sm:$0xff]  }
 0x177   : > { %v2026_v21 = vmul.f32 %v3097_v34, %v2003_v19  ;;  %v2014_v44 = vrot.slane %v2013_v39, 2  ;;  %v3777_v33 = vld [vmem:[%s4750_s7 + $0xc4] ss:$8 sps:$4 sm:$0xff]   ;;  %v3780_v37 = vld [vmem:[%s4750_s7 + $0xd4] ss:$8 sps:$4 sm:$0xff]  }
 0x178   : > { %v2025_v32 = vmul.f32 %v3097_v34, %v1996_v42  ;;  %v2007_v46 = vrot.slane %v2006_v43, 2  ;;  %v3778_v38 = vld [vmem:[%s4750_s7 + $0xd0] ss:$8 sps:$4 sm:$0xff]   ;;  %v3783_v19 = vld [vmem:[%s4750_s7 + $0xe4] ss:$8 sps:$4 sm:$0xff]  }
 0x179   : > { %v2037_v47 = vadd.f32 %v3098_v41, %v2026_v21  ;;  %v2015_v49 = vmax.f32 %v2013_v39, %v2014_v44  ;;  %v3781_v39 = vld [vmem:[%s4750_s7 + $0xe0] ss:$8 sps:$4 sm:$0xff]   ;;  %v3784_v42 = vld [vmem:[%s4750_s7 + $0xf0] ss:$8 sps:$4 sm:$0xff]  }
 0x17a   : > { %v2036_v50 = vadd.f32 %v3098_v41, %v2025_v32  ;;  %v2008_v31 = vmax.f32 %v2006_v43, %v2007_v46  ;;  %v3789_v43 = vld [vmem:[%s4750_s7 + $0x104] ss:$8 sps:$4 sm:$0xff]   ;;  %v3813_v32 = vld [vmem:[%s4752_s9 + $0x10] sm:$0xff]   ;;  %v3814_v46 = vld [vmem:[%s4752_s9 + $0x18] sm:$0xff]  }
 0x17b   : > { %v2041_v51 = vpack.c.bf16 %v2037_v47, %v2037_v47  ;;  %v2016_v53 = vrot.slane %v2015_v49, 1  ;;  %v3811_v21 = vld [vmem:[%s4752_s9] sm:$0xff]   ;;  %v3812_v44 = vld [vmem:[%s4752_s9 + $0x8] sm:$0xff]  }
 0x17c   : > { %v2040_v55 = vpack.c.bf16 %v2036_v50, %v2036_v50  ;;  %v2009_v8 = vrot.slane %v2008_v31, 1  ;;  %v3815_v47 = vld [vmem:[%s4752_s9 + $0x20] sm:$0xff]   ;;  %v3817_v50 = vld [vmem:[%s4752_s9 + $0x30] sm:$0xff]  }
 0x17d   : > { %v2098_v57 = vunpack.c.l.b16 %v2041_v51  ;;  %v2017_v58 = vmax.f32 %v2015_v49, %v2016_v53  ;;  %v3816_v49 = vld [vmem:[%s4752_s9 + $0x28] sm:$0xff]   ;;  %v3819_v51 = vld [vmem:[%s4752_s9 + $0x40] sm:$0xff]  }
 0x17e   : > { %v2097_v59 = vunpack.c.l.b16 %v2040_v55  ;;  %v2010_v60 = vmax.f32 %v2008_v31, %v2009_v8  ;;  %v3818_v31 = vld [vmem:[%s4752_s9 + $0x38] sm:$0xff]   ;;  %v3820_v53 = vld [vmem:[%s4752_s9 + $0x48] sm:$0xff]   ;;  %v2078_v55 = vlaneseq }
 0x17f   : > { %v2101_v40 = vrot.slane %v2098_v57, 7  ;;  %v2028_v61 = vmul.f32 %v3097_v34, %v2017_v58  ;;  %v2076_v58 = vld [vmem:[%s4749_s6] sm:$0x7] }
 0x180   : > { %v2027_v62 = vmul.f32 %v3097_v34, %v2010_v60  ;;  %v3775_v34 = vld [vmem:[%s4750_s7 + $0xc0] ss:$8 sps:$4 sm:$0xff]   ;;  %v4620_v8 = vshrl.u32 %v2078_v55, 7 }
 0x181   : > { %v2039_v63 = vadd.f32 %v3098_v41, %v2028_v61  ;;  %v2103_v0 = vsel %vm2102_vm2, %v2101_v40, %v2097_v59 }
 0x182   : > { %v2038_v1 = vadd.f32 %v3098_v41, %v2027_v62  ;;  %v3786_v41 = vld [vmem:[%s4750_s7 + $0xf4] ss:$8 sps:$4 sm:$0xff]   ;;  %v2080_v57 = vsub.s32 0, %v4620_v8  ;;  %v2084_v59 = vsub.s32 1, %v4620_v8 }
 0x183   : > { %v2043_v2 = vpack.c.bf16 %v2039_v63, %v2039_v63 }
 0x184   : > { %v2042_v52 = vpack.c.bf16 %v2038_v1, %v2038_v1  ;;  %v2081_v60 = vrot.slane %v2076_v58, %v2080_v57  ;;  %v2085_v40 = vrot.slane %v2076_v58, %v2084_v59 }
 0x185   : > { %v2100_v3 = vunpack.c.l.b16 %v2043_v2 }
 0x186   : > { %v2099_v4 = vunpack.c.l.b16 %v2042_v52 }
 0x187   : > { %v2107_v56 = vrot.slane %v2100_v3, 5 }
 0x188   : > { %v2104_v7 = vrot.slane %v2099_v4, 6 }
 0x18a   : > { %v2106_v54 = vsel %vm2105_vm3, %v2104_v7, %v2103_v0 }
 0x18b   : > { %v2109_v10 = vsel %vm2108_vm4, %v2107_v56, %v2106_v54 }
 0x18c   : > { %v2110_v13 = vpack.c.b16 %v2109_v10, %v2109_v10 }
 0x18e   : > { %2273 = vmatmul.mubr.bf16.vlgmr.msra.gmra.mrb[48].mxu1 %v2110_v13  ;;  %3479 = vmatmul.mubr.bf16.vlgmr.msra.gmra.mrb[56].mxu0 %v2110_v13 }
 0x18f   : > { %2628 = vmatpush1.bf16.msra.mxu1 %v3739_v11  ;;  %2820 = vmatpush1.bf16.msra.mxu0 %v3811_v21  ;;  %v3787_v11 = vld [vmem:[%s4750_s7 + $0x100] ss:$8 sps:$4 sm:$0xff]  }
 0x190   : > { %2629 = vmatprep.subr.bf16.mxu1 %v3744_v36  ;;  %2821 = vmatprep.subr.bf16.mxu0 %v3888_v35  ;;  %v3792_v36 = vld [vmem:[%s4750_s7 + $0x114] ss:$8 sps:$4 sm:$0xff]  }
 0x193   : > { %2630 = vmatpush1.bf16.msra.mxu1 %v3742_v14  ;;  %2822 = vmatpush1.bf16.msra.mxu0 %v3812_v44  ;;  %v3790_v14 = vld [vmem:[%s4750_s7 + $0x110] ss:$8 sps:$4 sm:$0xff]  }
 0x194   : > { %2631 = vmatprep.subr.bf16.mxu1 %v3747_v45  ;;  %2823 = vmatprep.subr.bf16.mxu0 %v3888_v35  ;;  %v3795_v45 = vld [vmem:[%s4750_s7 + $0x124] ss:$8 sps:$4 sm:$0xff]  }
 0x197   : > { %2632 = vmatpush1.bf16.msra.mxu1 %v3745_v15  ;;  %2824 = vmatpush1.bf16.msra.mxu0 %v3813_v32  ;;  %v3793_v15 = vld [vmem:[%s4750_s7 + $0x120] ss:$8 sps:$4 sm:$0xff]  }
 0x198   : > { %2633 = vmatprep.subr.bf16.mxu1 %v3750_v16  ;;  %2825 = vmatprep.subr.bf16.mxu0 %v3888_v35  ;;  %v3798_v16 = vld [vmem:[%s4750_s7 + $0x134] ss:$8 sps:$4 sm:$0xff]   ;;  %v3171_v32 = vld [vmem:[%s4753_s10] ss:$0 sm:$0xff] }
 0x19b   : > { %2634 = vmatpush1.bf16.msra.mxu1 %v3748_v17  ;;  %2826 = vmatpush1.bf16.msra.mxu0 %v3814_v46  ;;  %v3796_v17 = vld [vmem:[%s4750_s7 + $0x130] ss:$8 sps:$4 sm:$0xff]  }
 0x19c   : > { %2635 = vmatprep.subr.bf16.mxu1 %v3753_v48  ;;  %2827 = vmatprep.subr.bf16.mxu0 %v3888_v35  ;;  %v3801_v48 = vld [vmem:[%s4750_s7 + $0x144] ss:$8 sps:$4 sm:$0xff]  }
 0x19f   : > { %2636 = vmatpush1.bf16.msra.mxu1 %v3751_v18  ;;  %2828 = vmatpush1.bf16.msra.mxu0 %v3815_v47  ;;  %v3799_v18 = vld [vmem:[%s4750_s7 + $0x140] ss:$8 sps:$4 sm:$0xff]  }
 0x1a0   : > { %2637 = vmatprep.subr.bf16.mxu1 %v3756_v9  ;;  %2829 = vmatprep.subr.bf16.mxu0 %v3888_v35  ;;  %v2088_v9 = vsub.s32 2, %v4620_v8 }
 0x1a3   : > { %2638 = vmatpush1.bf16.msra.mxu1 %v3754_v25  ;;  %2830 = vmatpush1.bf16.msra.mxu0 %v3816_v49  ;;  %v3804_v25 = vld [vmem:[%s4750_s7 + $0x154] ss:$8 sps:$4 sm:$0xff]  }
 0x1a4   : > { %2639 = vmatprep.subr.bf16.mxu1 %v3759_v20  ;;  %2831 = vmatprep.subr.bf16.mxu0 %v3888_v35  ;;  %v3802_v20 = vld [vmem:[%s4750_s7 + $0x150] ss:$8 sps:$4 sm:$0xff]  }
 0x1a7   : > { %2640 = vmatpush1.bf16.msra.mxu1 %v3757_v22  ;;  %2832 = vmatpush1.bf16.msra.mxu0 %v3817_v50  ;;  %v2089_v22 = vrot.slane %v2076_v58, %v2088_v9 }
 0x1a8   : > { %2641 = vmatprep.subr.bf16.mxu1 %v3762_v12  ;;  %2833 = vmatprep.subr.bf16.mxu0 %v3888_v35  ;;  %v3807_v12 = vld [vmem:[%s4750_s7 + $0x164] ss:$8 sps:$4 sm:$0xff]  }
 0x1ab   : > { %2642 = vmatpush1.bf16.msra.mxu1 %v3760_v23  ;;  %2834 = vmatpush1.bf16.msra.mxu0 %v3818_v31  ;;  %v3805_v23 = vld [vmem:[%s4750_s7 + $0x160] ss:$8 sps:$4 sm:$0xff]  }
 0x1ac   : > { %2643 = vmatprep.subr.bf16.mxu1 %v3765_v24  ;;  %2835 = vmatprep.subr.bf16.mxu0 %v3888_v35 }
 0x1af   : > { %2644 = vmatpush1.bf16.msra.mxu1 %v3763_v5  ;;  %2836 = vmatpush1.bf16.msra.mxu0 %v3819_v51  ;;  %v3810_v5 = vld [vmem:[%s4750_s7 + $0x174] ss:$8 sps:$4 sm:$0xff]  }
 0x1b0   : > { %2645 = vmatprep.subr.bf16.mxu1 %v3768_v26  ;;  %2837 = vmatprep.subr.bf16.mxu0 %v3888_v35  ;;  %v3808_v26 = vld [vmem:[%s4750_s7 + $0x170] ss:$8 sps:$4 sm:$0xff]  }
 0x1b3   : > { %2646 = vmatpush1.bf16.msra.mxu1 %v3766_v27  ;;  %2838 = vmatpush1.bf16.msra.mxu0 %v3820_v53 }
 0x1b4   : > { %2647 = vmatprep.subr.bf16.mxu1 %v3771_v28  ;;  %2839 = vmatprep.subr.bf16.mxu0 %v3888_v35 }
 0x1b7   : > { %2648 = vmatpush1.bf16.msra.mxu1 %v3769_v29  ;;  %v3821_v29 = vld [vmem:[%s4752_s9 + $0x50] sm:$0xff]  }
 0x1b8   : > { %2649 = vmatprep.subr.bf16.mxu1 %v3774_v30  ;;  %2840 = vmatpush1.bf16.msra.mxu0 %v3821_v29  ;;  %v3822_v30 = vld [vmem:[%s4752_s9 + $0x58] sm:$0xff]  }
 0x1b9   : > { %2841 = vmatprep.subr.bf16.mxu0 %v3888_v35 }
 0x1bb   : > { %2650 = vmatpush1.bf16.msra.mxu1 %v3772_v6  ;;  %v2375_v6 = vld [vmem:[%s4751_s8] sm:$0x3] }
 0x1bc   : > { %2651 = vmatprep.subr.bf16.mxu1 %v3777_v33  ;;  %2842 = vmatpush1.bf16.msra.mxu0 %v3822_v30  ;;  %v2380_v33 = vrot.slane %v2375_v6, %v2080_v57 }
 0x1bf   : > { %2652 = vmatpush1.bf16.msra.mxu1 %v3775_v34  ;;  %v2384_v34 = vrot.slane %v2375_v6, %v2084_v59 }
 0x1c0   : > { %2653 = vmatprep.subr.bf16.mxu1 %v3780_v37 }
 0x1c3   : > { %2654 = vmatpush1.bf16.msra.mxu1 %v3778_v38 }
 0x1c4   : > { %2655 = vmatprep.subr.bf16.mxu1 %v3783_v19 }
 0x1c7   : > { %2656 = vmatpush1.bf16.msra.mxu1 %v3781_v39 }
 0x1c8   : > { %2657 = vmatprep.subr.bf16.mxu1 %v3786_v41 }
 0x1cb   : > { %2658 = vmatpush1.bf16.msra.mxu1 %v3784_v42 }
 0x1cc   : > { %2668 = vmatprep.subr.bf16.mxu1 %v3789_v43 }
 0x261   : > { %v2274_v61 = vpop.f32.mrb[48].mxu1  ;;  %v2315_v62 = vpop.f32.mrb[56].mxu0 }
 0x262   : > { %v2275_v63 = vadd.f32 %v2274_v61, %v2081_v60  ;;  %v2276_v0 = vpop.f32.mrb[49].mxu1  ;;  %v3480_v1 = vpop.f32.mrb[57].mxu0  ;;  %v2316_v24 = vadd.f32 %v2315_v62, %v2089_v22 }
 0x263   : > { %v2277_v2 = vadd.f32 %v2276_v0, %v2085_v40  ;;  %v2278_v52 = vpop.f32.mrb[50].mxu1  ;;  %v2318_v3 = vpop.f32.mrb[58].mxu0 }
 0x264   : > { %v2321_v4 = vmax.f32 %v2275_v63, 0.0  ;;  %v2279_v7 = vpop.f32.mrb[51].mxu1  ;;  %v3481_v56 = vpop.f32.mrb[59].mxu0  ;;  %v2323_v27 = vmax.f32 %v2316_v24, 0.0 }
 0x265   : > { %v2322_v54 = vmax.f32 %v2277_v2, 0.0 }
 0x266   : > { %v2324_v13 = vpack.c.bf16 %v2321_v4, %v2321_v4  ;;  %v2326_v28 = vpack.c.bf16 %v2323_v27, %v2323_v27 }
 0x267   : > { %v2325_v10 = vpack.c.bf16 %v2322_v54, %v2322_v54 }
 0x269   : > { %2659 = vmatprep.mubr.bf16.mxu1 %v2325_v10 }
 0x26a   : > { %2660 = vmatmul.mubr.bf16.vlgmr.msra.gmra.mrb[52].mxu1 %v2324_v13 }
 0x26b   : > { %2669 = vmatpush1.bf16.msra.mxu1 %v3787_v11  ;;  %2700 = vmatprep.mubr.bf16.mxu1 %v3888_v35 }
 0x26c   : > { %2670 = vmatprep.subr.bf16.mxu1 %v3792_v36 }
 0x26f   : > { %2671 = vmatpush1.bf16.msra.mxu1 %v3790_v14 }
 0x270   : > { %2672 = vmatprep.subr.bf16.mxu1 %v3795_v45 }
 0x273   : > { %2673 = vmatpush1.bf16.msra.mxu1 %v3793_v15 }
 0x274   : > { %2674 = vmatprep.subr.bf16.mxu1 %v3798_v16 }
 0x277   : > { %2675 = vmatpush1.bf16.msra.mxu1 %v3796_v17 }
 0x278   : > { %2676 = vmatprep.subr.bf16.mxu1 %v3801_v48 }
 0x27b   : > { %2677 = vmatpush1.bf16.msra.mxu1 %v3799_v18 }
 0x27c   : > { %2678 = vmatprep.subr.bf16.mxu1 %v3804_v25 }
 0x27f   : > { %2679 = vmatpush1.bf16.msra.mxu1 %v3802_v20 }
 0x280   : > { %2680 = vmatprep.subr.bf16.mxu1 %v3807_v12 }
 0x283   : > { %2681 = vmatpush1.bf16.msra.mxu1 %v3805_v23 }
 0x284   : > { %2682 = vmatprep.subr.bf16.mxu1 %v3810_v5 }
 0x287   : > { %2683 = vmatpush1.bf16.msra.mxu1 %v3808_v26 }
 0x28a   : > { %2701 = vmatmul.mubr.bf16.vlgmr.msra.gmra.mrb[52].mxu1 %v2326_v28 }
 0x35d   : > { %v2702_v37 = vpop.f32.mrb[52].mxu1 }
 0x35e   : > { %v3482_v38 = vadd.f32 %v2702_v37, %v2380_v33  ;;  %v2704_v35 = vpop.f32.mrb[53].mxu1 }
 0x35f   : > { %v3483_v19 = vadd.f32 %v2704_v35, %v2384_v34  ;;  %v2706_v39 = vpop.f32.mrb[54].mxu1 }
 0x360   : > { %v2709_v41 = vmax.f32 %v3482_v38, 0.0  ;;  %v2707_v42 = vpop.f32.mrb[55].mxu1 }
 0x361   : > { %v2710_v43 = vmax.f32 %v3483_v19, 0.0 }
 0x362   : > { %v2711_v44 = vpack.c.bf16 %v2709_v41, %v2709_v41 }
 0x363   : > { %v2712_v21 = vpack.c.bf16 %v2710_v43, %v2710_v43 }
 0x365   : > { %3184 = vmatprep.mubr.msk.bf16.mxu0 %vm1514_vm0, %v2712_v21 }
 0x366   : > { %2852 = vmatmul.mubr.bf16.vlgmr.msra.gmra.mrb[60].mxu0 %v2711_v44 }
 0x439   : > { %v2853_v46 = vpop.f32.mrb[60].mxu0 }
 0x43a   : > { %v2854_v47 = vadd.f32 %v3171_v32, %v2853_v46  ;;  %v2855_v49 = vpop.f32.mrb[61].mxu0 }
 0x43b   : > { %v2856_v50 = vpop.f32.mrb[62].mxu0 }
 0x43c   : > { %2859 = vst [vmem:[%s382_s12] sm:$0xf] %v2854_v47  ;;  %v2857_v31 = vpop.f32.mrb[63].mxu0 }
 0x43d   : > { %3836 = shalt.err (!%p3833_p3)
}
 0x43e   : > { %s3837_s13 = scalar_lea.hbm %s4701_s16, 64  ;;  %s3841_s14 = scalar_lea.hbm %s4754_s11, 128 }
 0x43f   : > { %p3838_p4 = scmp.ne.s32.totalorder %s4701_s16, %s3837_s13  ;;  %p3842_p9 = scmp.lt.u32.totalorder %s4701_s16, %s4754_s11 }
 0x440   : > { %p3843_p10 = scmp.lt.u32.totalorder %s3841_s14, %s3837_s13  ;;  %p3845_p12 = scmp.lt.u32.totalorder %s3837_s13, %s4701_s16 }
 0x441   : > { %p3839_p7 = pnand %p3838_p4, %p3989_p5 }
 0x442   : > { %p3844_p11 = por %p3843_p10, %p3842_p9 }
 0x443   : > { %p3840_p8 = pneg %p3839_p7 }
 0x444   : > { %p3846_p13 = por %p3845_p12, %p3844_p11 }
 0x446   : > { %p3847_p0 = pnand %p3846_p13, %p3840_p8 }
 0x448   : > { %3850 = shalt.err (!%p3847_p0)
}
 0x449   : > { %3489 = dma.vmem_to_hbm [thread:$0]  (%p3989_p5), %s4703_s26, 64, %s4701_s16, %s2861_s22  }
 0x44a PF: > { %p3495_p1 = scmp.ge.s32.totalorder %s3885_s20, 2  ;;  %s2886_s21 = sand.u32 1, %s3873_s17  }
 0x44b   : > { %s2887_s29 = scalar_lea.sflag [#allocation3], %s2886_s21 }
 0x44c   : > { %p3492_p2 = pnand %p3495_p1, %p3993_p6 }
 0x44e   : > { %3868 = dma.done.wait (!%p3492_p2), %s2887_s29, 64  }
 0x44f   : > { %3870 = vsyncadd (!%p3492_p2), %s2887_s29, 4294967232  ;;  %s4758_s30 = sld [smem:[#allocation5_spill]]  ;;  %p21_p3 = scmp.ge.s32.totalorder %s3976_s23, 4  }
 0x450   : > { %s4759_s17 = smov %s3877_s18  ;;  %s4760_s18 = smov %s3881_s19 }
 0x451   : > { %s4762_s20 = smov %s3976_s23  ;;  %23 = sbr.rel (!%p21_p3) target bundleno = 3 (0x3), region = 99 }
 0x455   : > { %s4761_s19 = smov %s4758_s30 }
 0x458   :  { %2892 = vsyncpa [#allocation3], 1 }
 0x459   :  { %2894 = vsyncpa [#allocation3 + $0x1], 1 }

</bundles_post_ra>
